<compile_context>
chip_gen: v6e
topology: v6e:2x2x1
jax: 0.10.0
libtpu: 0.0.40
codegen_flags: <defaults>
</compile_context>

<pallas_src>
import numpy as np
import jax
import jax.numpy as jnp
from jax.experimental import pallas as pl
from jax.experimental.pallas import tpu as pltpu

KPAD = 128          # static padded cluster count (one lane tile)
NITER = 20          # k-means iteration limit (matches the torch module)
_CHUNK_MAX = 1024   # in-kernel row-chunk size


def _round_up(x, m):
    return ((x + m - 1) // m) * m


def _pick_vmem_limit(npad, c, chunk):
    """Generation-aware scoped-VMEM limit + residency check."""
    cap = 64 * 1024 * 1024                      # conservative fallback (v7x)
    try:
        info = pltpu.get_tpu_info()
        cap = int(getattr(info, "vmem_capacity_bytes", cap))
    except Exception:
        pass
    resident = (
        2 * npad * c * 2                        # xn bf16 (double-buffered across images)
        + 2 * npad * 4                          # alpha column
        + 2 * c * KPAD * 4                      # initial centroids
        + 2 * (npad * 4 + KPAD * 4 + KPAD * KPAD * 4)   # outputs
        + c * KPAD * 10 + 2 * KPAD * 4          # centroid / sums / counts scratch
        + chunk * (KPAD * 24 + c * 8)           # per-chunk temporaries
    )
    budget = int(cap * 0.8)
    if resident > budget:
        # TODO(synk): streaming (non-VMEM-resident) fallback for very large
        # images is not implemented; would need per-tile bf16 streaming.
        raise NotImplementedError(
            f"mask_features too large for VMEM-resident k-means kernel "
            f"(~{resident} B needed, ~{budget} B available)")
    return max(32 * 1024 * 1024, min(budget, 2 * resident))


# ----------------------------------------------------------------------------
# Kernel 1: masked F.normalize  (f32 x, alpha) -> bf16 xn
# ----------------------------------------------------------------------------
def _normalize_kernel(x_ref, a_ref, o_ref):
    x = x_ref[...]                                       # [chunk, C] f32
    a = a_ref[...]                                       # [chunk, 1] f32 (0/1)
    ss = jnp.sum(x * x, axis=-1, keepdims=True)
    o_ref[...] = (x * (a * jax.lax.rsqrt(jnp.maximum(ss, 1e-24)))
                  ).astype(jnp.bfloat16)


def _normalize(x, a_col, chunk, vmem_limit):
    bsz, npad, c = x.shape
    return pl.pallas_call(
        _normalize_kernel,
        out_shape=jax.ShapeDtypeStruct((bsz, npad, c), jnp.bfloat16),
        grid=(bsz, npad // chunk),
        in_specs=[pl.BlockSpec((None, chunk, c), lambda i, t: (i, t, 0)),
                  pl.BlockSpec((None, chunk, 1), lambda i, t: (i, t, 0))],
        out_specs=pl.BlockSpec((None, chunk, c), lambda i, t: (i, t, 0)),
        compiler_params=pltpu.CompilerParams(
            dimension_semantics=("parallel", "parallel"),
            vmem_limit_bytes=vmem_limit),
    )(x, a_col)


# ----------------------------------------------------------------------------
# Kernel 2: fused k-means (NITER sweeps) + labels + affinity + centroid pdist
# ----------------------------------------------------------------------------
def _make_fused_kmeans_kernel(npad, chunk, niter, inv_tau1, inv_tau2):
    n_chunks = npad // chunk

    def kernel(xn_ref, a_ref, cent0_ref, pen_ref,        # inputs
               lbl_ref, aff_ref, edc_ref,                 # outputs
               cent, centb, cbias, sums, cnts):           # scratch
        it = pl.program_id(1)

        @pl.when(it == 0)
        def _init():
            cent[...] = cent0_ref[...]                    # [C, KPAD] f32

        # ------------------- k-means sweeps (it < niter) -------------------
        @pl.when(it < niter)
        def _sweep():
            centb[...] = cent[...].astype(jnp.bfloat16)   # cast once / iteration
            cbias[...] = (jnp.sum(cent[...] * cent[...], axis=0, keepdims=True)
                          + pen_ref[...])                 # ||c||^2 + pad penalty
            sums[...] = jnp.zeros_like(sums)
            cnts[...] = jnp.zeros_like(cnts)
            write_labels = it == niter - 1

            def body(i, carry):
                r0 = pl.multiple_of(i * chunk, chunk)
                x = xn_ref[pl.ds(r0, chunk), :]           # [chunk, C] bf16
                a = a_ref[pl.ds(r0, chunk), :]            # [chunk, 1] f32 (0/1)
                # ||x - c||^2 argmin needs only ||c||^2 - 2 x.c (||x||^2 = alpha)
                xy = jax.lax.dot_general(
                    x, centb[...], (((1,), (0,)), ((), ())),
                    preferred_element_type=jnp.float32)   # [chunk, KPAD]
                score = cbias[...] - 2.0 * xy
                lane = jax.lax.broadcasted_iota(jnp.int32, score.shape, 1)
                mins = jnp.min(score, axis=-1, keepdims=True)
                # first-minimum tie-break (== torch.argmin)
                lblc = jnp.min(jnp.where(score <= mins, lane, KPAD),
                               axis=-1, keepdims=True)    # [chunk, 1] i32
                onehot = jnp.where(lane == lblc, a, 0.0)  # alpha-masked one-hot
                # segment-sum in bf16 on the MXU, f32 accumulation
                sums[...] += jax.lax.dot_general(
                    x, onehot.astype(jnp.bfloat16), (((0,), (0,)), ((), ())),
                    preferred_element_type=jnp.float32)   # [C, KPAD]
                cnts[...] += jnp.sum(onehot, axis=0, keepdims=True)

                @pl.when(write_labels)
                def _():
                    lbl_ref[pl.ds(r0, chunk), :] = lblc
                return carry

            jax.lax.fori_loop(0, n_chunks, body, 0)

            cnt = cnts[...]                               # [1, KPAD]
            cent[...] = jnp.where(cnt > 0.0,
                                  sums[...] / jnp.maximum(cnt, 1.0),
                                  cent[...])

        # ------------- affinity + centroid affinity (it == niter) -----------
        @pl.when(it == niter)
        def _finalize():
            centb[...] = cent[...].astype(jnp.bfloat16)
            csq = jnp.sum(cent[...] * cent[...], axis=0, keepdims=True)  # [1,KPAD]
            aff_ref[...] = jnp.zeros_like(aff_ref)

            def body(i, carry):
                r0 = pl.multiple_of(i * chunk, chunk)
                x = xn_ref[pl.ds(r0, chunk), :]
                a = a_ref[pl.ds(r0, chunk), :]
                lblc = lbl_ref[pl.ds(r0, chunk), :]       # labels from last sweep
                xy = jax.lax.dot_general(
                    x, centb[...], (((1,), (0,)), ((), ())),
                    preferred_element_type=jnp.float32)
                d = jnp.sqrt(jnp.maximum(a + csq - 2.0 * xy, 0.0))
                lane = jax.lax.broadcasted_iota(jnp.int32, d.shape, 1)
                onehot = jnp.where(lane == lblc, a, 0.0)
                aff_ref[...] += jnp.sum(jnp.exp(d * inv_tau1) * onehot,
                                        axis=0, keepdims=True)
                return carry

            jax.lax.fori_loop(0, n_chunks, body, 0)
            # per-cluster mean of exp(dist/tau1)
            aff_ref[...] = aff_ref[...] / jnp.maximum(cnts[...], 1.0)

            # centroid pairwise affinity exp(-||ci - cj|| / tau2)
            cT = cent[...]                                # [C, KPAD]
            cxy = jax.lax.dot_general(cT, cT, (((0,), (0,)), ((), ())),
                                      preferred_element_type=jnp.float32)
            ri = jax.lax.broadcasted_iota(jnp.int32, (KPAD, KPAD), 0)
            li = jax.lax.broadcasted_iota(jnp.int32, (KPAD, KPAD), 1)
            diag = jnp.where(ri == li, cxy, 0.0)
            cc_col = jnp.sum(diag, axis=1, keepdims=True)   # [KPAD, 1]
            cc_row = jnp.sum(diag, axis=0, keepdims=True)   # [1, KPAD]
            cd2 = jnp.maximum(cc_col + cc_row - 2.0 * cxy, 0.0)
            edc_ref[...] = jnp.exp(-jnp.sqrt(cd2) * inv_tau2)

    return kernel


def _fused_kmeans(xn, a_col, cent0_t, pen, niter, tau1, tau2, chunk, vmem_limit):
    bsz, npad, c = xn.shape
    kernel = _make_fused_kmeans_kernel(npad, chunk, niter,
                                       1.0 / float(tau1), 1.0 / float(tau2))
    idx = lambda i, it: (i, 0, 0)
    return pl.pallas_call(
        kernel,
        out_shape=(jax.ShapeDtypeStruct((bsz, npad, 1), jnp.int32),    # labels
                   jax.ShapeDtypeStruct((bsz, 1, KPAD), jnp.float32),  # aff mean
                   jax.ShapeDtypeStruct((bsz, KPAD, KPAD), jnp.float32)),  # edc
        grid=(bsz, niter + 1),
        in_specs=[pl.BlockSpec((None, npad, c), idx),       # xn (resident, 1 fetch)
                  pl.BlockSpec((None, npad, 1), idx),       # alpha column
                  pl.BlockSpec((None, c, KPAD), idx),       # initial centroids^T
                  pl.BlockSpec((None, 1, KPAD), idx)],      # pad penalty
        out_specs=(pl.BlockSpec((None, npad, 1), idx),
                   pl.BlockSpec((None, 1, KPAD), idx),
                   pl.BlockSpec((None, KPAD, KPAD), idx)),
        scratch_shapes=[pltpu.VMEM((c, KPAD), jnp.float32),   # cent
                        pltpu.VMEM((c, KPAD), jnp.bfloat16),  # cent (bf16)
                        pltpu.VMEM((1, KPAD), jnp.float32),   # cbias
                        pltpu.VMEM((c, KPAD), jnp.float32),   # segment sums
                        pltpu.VMEM((1, KPAD), jnp.float32)],  # counts
        compiler_params=pltpu.CompilerParams(
            dimension_semantics=("parallel", "arbitrary"),
            vmem_limit_bytes=vmem_limit),
    )(xn, a_col, cent0_t, pen)


# ----------------------------------------------------------------------------
# One jitted device program for the whole batch
# ----------------------------------------------------------------------------
def _build_batched_fn(tau1, tau2, niter):
    def fn(mf, a_col, sel, pen, chunk):
        bsz, c, h, w = mf.shape
        n = h * w
        npad = a_col.shape[1]
        vmem_limit = _pick_vmem_limit(npad, c, chunk)
        x = jnp.transpose(mf.astype(jnp.float32), (0, 2, 3, 1)).reshape(bsz, n, c)
        if npad > n:
            x = jnp.concatenate(
                [x, jnp.zeros((bsz, npad - n, c), jnp.float32)], axis=1)
        xn = _normalize(x, a_col, chunk, vmem_limit)              # bf16 [B,npad,C]
        # TODO(synk): kmeans_pytorch uses random centroid init; replaced with a
        # deterministic evenly-spaced init over masked pixels (sel built on host).
        cent0 = jnp.take_along_axis(xn, sel[:, :, None], axis=1)  # [B, KPAD, C]
        cent0_t = jnp.swapaxes(cent0, 1, 2).astype(jnp.float32)   # [B, C, KPAD]
        return _fused_kmeans(xn, a_col, cent0_t, pen, niter, tau1, tau2,
                             chunk, vmem_limit)
    return jax.jit(fn, static_argnums=(4,))


# ----------------------------------------------------------------------------
# Host-side glue: nearest-exact resize, hull-ratio gate
# ----------------------------------------------------------------------------
def nearest_exact_resize_bool(mask, out_hw):
    """F.interpolate(..., mode='nearest-exact') for a 2D boolean mask."""
    in_h, in_w = mask.shape
    out_h, out_w = out_hw
    ys = np.clip(np.floor((np.arange(out_h) + 0.5) * (in_h / out_h)).astype(np.int64),
                 0, in_h - 1)
    xs = np.clip(np.floor((np.arange(out_w) + 0.5) * (in_w / out_w)).astype(np.int64),
                 0, in_w - 1)
    return mask[ys][:, xs]


def get_hull_ratio(mask_2d):
    # TODO(synk): skimage.morphology.convex_hull_image has no Pallas/JAX
    # equivalent; using the bounding-box fill ratio as a deterministic surrogate.
    m = np.asarray(mask_2d)
    s = int(m.sum())
    if s == 0:
        return 0.0
    rows = np.nonzero(m.any(axis=1))[0]
    cols = np.nonzero(m.any(axis=0))[0]
    bbox = (rows[-1] - rows[0] + 1) * (cols[-1] - cols[0] + 1)
    return float(s) / float(bbox)


# ----------------------------------------------------------------------------
# Criterion
# ----------------------------------------------------------------------------
class SetCriterionContrastive:
    def __init__(self, weight_dict, n_clusters=10, n_sample_style='choice',
                 tau1=10.0, tau2=10.0):
        assert n_sample_style in ['range', 'choice'], n_sample_style
        self.weight_dict = weight_dict
        self.is_range = n_sample_style == 'range'
        if isinstance(n_clusters, int):
            n_clusters = (n_clusters, n_clusters)
        if self.is_range:
            assert len(n_clusters) == 2
        self.n_clusters = n_clusters
        self.tau1 = tau1
        self.tau2 = tau2
        self._batched_fn = _build_batched_fn(tau1, tau2, NITER)

    def __call__(self, outputs, targets):
        return self.loss_contrastive(outputs, targets)

    def loss_contrastive(self, outputs, targets):
        if 'mask_features' not in outputs or len(targets) == 0:
            return {}
        mask_features = outputs['mask_features']            # [B, C, H, W]
        alphas = [t['alpha'] for t in targets]
        assert len(alphas) == mask_features.shape[0]
        if self.is_range:
            n_clusters = int(np.random.randint(self.n_clusters[0],
                                               self.n_clusters[1] + 1))
        else:
            n_clusters = int(np.random.choice(self.n_clusters))

        B, C, H, W = mask_features.shape
        N = H * W
        chunk = min(_CHUNK_MAX, _round_up(N, 128))
        npad = _round_up(N, chunk)

        # ---- host prep for the single batched device call ----
        a_col = np.zeros((B, npad, 1), np.float32)
        sel = np.zeros((B, KPAD), np.int32)
        pen = np.full((B, 1, KPAD), 1e30, np.float32)
        alphas_r, ks, valid = [], [], []
        for b in range(B):
            alpha = nearest_exact_resize_bool(np.asarray(alphas[b]), (H, W))
            alphas_r.append(alpha)
            a_flat = alpha.reshape(-1).astype(np.float32)
            A = int(a_flat.sum())
            K = min(n_clusters, A, KPAD)
            ks.append(K)
            valid.append(K > 1)
            a_col[b, :N, 0] = a_flat
            if A > 0:
                idx = np.nonzero(a_flat)[0]
                kk = max(K, 1)
                sel[b, :kk] = idx[np.floor(np.linspace(0, A - 1, kk)).astype(np.int64)]
                pen[b, 0, :kk] = 0.0

        loss_centroid = np.float32(0.0)
        loss_affinity = np.float32(0.0)
        n_valid = 0
        if any(valid):
            labels, aff_mean, edc = self._batched_fn(
                mask_features, jnp.asarray(a_col), jnp.asarray(sel),
                jnp.asarray(pen), chunk)
            labels = np.asarray(labels)      # [B, npad, 1]
            aff_mean = np.asarray(aff_mean)  # [B, 1, KPAD]
            edc = np.asarray(edc)            # [B, KPAD, KPAD]

            # ---- host hull-ratio gating + loss accumulation ----
            for b in range(B):
                if not valid[b]:
                    continue
                alpha = alphas_r[b]
                lbl_map = np.where(alpha, labels[b, :N, 0].reshape(H, W), -1)
                accepted = [k for k in range(ks[b])
                            if get_hull_ratio(lbl_map == k) > 0.1]
                if accepted:
                    loss_affinity = loss_affinity + aff_mean[b, 0, accepted].sum(
                        dtype=np.float32)
                if len(accepted) > 1:
                    acc = np.asarray(accepted, np.int64)
                    loss_centroid = loss_centroid + edc[b][np.ix_(acc, acc)].mean(
                        dtype=np.float32)
                    n_valid += 1
        if n_valid > 1:
            loss_centroid = loss_centroid / n_valid
            loss_affinity = loss_affinity / n_valid
        out_dtype = getattr(mask_features, 'dtype', jnp.float32)
        return {'loss_centroid': jnp.asarray(loss_centroid, dtype=out_dtype),
                'loss_affinity': jnp.asarray(loss_affinity, dtype=out_dtype)}


# ----------------------------------------------------------------------------
if __name__ == "__main__":
    key = jax.random.PRNGKey(0)
    B, C, H, W = 2, 32, 16, 16      # mask_features NCHW
    Ha, Wa = 32, 32                 # alpha masks at a different resolution
    k1, k2, k3 = jax.random.split(key, 3)
    mask_features = jax.random.normal(k1, (B, C, H, W), dtype=jnp.float32)
    alpha0 = jax.random.normal(k2, (Ha, Wa)) > -1.0
    alpha1 = jax.random.normal(k3, (Ha, Wa)) > -1.0
    outputs = {'mask_features': mask_features}
    targets = [{'alpha': alpha0}, {'alpha': alpha1}]

    criterion = SetCriterionContrastive(
        weight_dict={'loss_centroid': 1.0, 'loss_affinity': 1.0},
        n_clusters=4, n_sample_style='choice', tau1=10.0, tau2=10.0)

    losses = criterion(outputs, targets)
    jax.block_until_ready(losses)
    print("KERNEL_OK")
</pallas_src>

<mosaic_0001>
module attributes {stable_mosaic.version = 11 : i64} {
  func.func @_normalize_kernel(%arg0: i32, %arg1: i32, %arg2: memref<1x256x32xf32, #tpu.memory_space<vmem>>, %arg3: memref<1x256x1xf32, #tpu.memory_space<vmem>>, %arg4: memref<1x256x32xbf16, #tpu.memory_space<vmem>>) attributes {dimension_semantics = [#tpu.dimension_semantics<parallel>, #tpu.dimension_semantics<parallel>], iteration_bounds = array<i64: 2, 1>, scalar_prefetch = 0 : i64, scratch_operands = 0 : i64, tpu.core_type = #tpu.core_type<tc>, window_params = [{transform_indices = @transform_0, window_bounds = array<i64: 1, 256, 32>}, {transform_indices = @transform_1, window_bounds = array<i64: 1, 256, 1>}, {transform_indices = @transform_2, window_bounds = array<i64: 1, 256, 32>}]} {
    %c0 = arith.constant 0 : index
    %c0_0 = arith.constant 0 : index
    %c0_1 = arith.constant 0 : index
    %0 = vector.load %arg2[%c0, %c0_0, %c0_1] : memref<1x256x32xf32, #tpu.memory_space<vmem>>, vector<1x256x32xf32>
    %1 = vector.shape_cast %0 : vector<1x256x32xf32> to vector<256x32xf32>
    %c0_2 = arith.constant 0 : index
    %c0_3 = arith.constant 0 : index
    %c0_4 = arith.constant 0 : index
    %2 = vector.load %arg3[%c0_2, %c0_3, %c0_4] : memref<1x256x1xf32, #tpu.memory_space<vmem>>, vector<1x256x1xf32>
    %3 = vector.shape_cast %2 : vector<1x256x1xf32> to vector<256x1xf32>
    %4 = arith.mulf %1, %1 : vector<256x32xf32>
    %cst = arith.constant dense<0.000000e+00> : vector<256xf32>
    %5 = vector.multi_reduction <add>, %4, %cst [1] : vector<256x32xf32> to vector<256xf32>
    %6 = vector.shape_cast %5 : vector<256xf32> to vector<256x1xf32>
    %cst_5 = arith.constant 1.000000e-24 : f32
    %7 = vector.broadcast %cst_5 : f32 to vector<256x1xf32>
    %8 = arith.maximumf %6, %7 : vector<256x1xf32>
    %9 = math.rsqrt %8 : vector<256x1xf32>
    %10 = arith.mulf %3, %9 : vector<256x1xf32>
    %11 = vector.broadcast %10 : vector<256x1xf32> to vector<256x32xf32>
    %12 = arith.mulf %1, %11 : vector<256x32xf32>
    %13 = arith.truncf %12 : vector<256x32xf32> to vector<256x32xbf16>
    %c0_6 = arith.constant 0 : index
    %c0_7 = arith.constant 0 : index
    %c0_8 = arith.constant 0 : index
    %14 = vector.load %arg4[%c0_6, %c0_7, %c0_8] : memref<1x256x32xbf16, #tpu.memory_space<vmem>>, vector<1x256x32xbf16>
    %15 = vector.shape_cast %14 : vector<1x256x32xbf16> to vector<256x32xbf16>
    %16 = vector.shape_cast %13 : vector<256x32xbf16> to vector<1x256x32xbf16>
    tpu.vector_store %arg4[%c0_6, %c0_7, %c0_8], %16 {strides = array<i32>} : memref<1x256x32xbf16, #tpu.memory_space<vmem>>, vector<1x256x32xbf16>,
    return
  }
  func.func @transform_0(%arg0: i32, %arg1: i32) -> (i32, i32, i32) {
    %c0_i32 = arith.constant 0 : i32
    %c0_i32_0 = arith.constant 0 : i32
    return %arg0, %arg1, %c0_i32 : i32, i32, i32
  }
  func.func @transform_1(%arg0: i32, %arg1: i32) -> (i32, i32, i32) {
    %c0_i32 = arith.constant 0 : i32
    %c0_i32_0 = arith.constant 0 : i32
    return %arg0, %arg1, %c0_i32 : i32, i32, i32
  }
  func.func @transform_2(%arg0: i32, %arg1: i32) -> (i32, i32, i32) {
    %c0_i32 = arith.constant 0 : i32
    %c0_i32_0 = arith.constant 0 : i32
    return %arg0, %arg1, %c0_i32 : i32, i32, i32
  }
}

module attributes {stable_mosaic.version = 11 : i64} {
  func.func @kernel(%arg0: i32, %arg1: i32, %arg2: memref<1x256x32xbf16, #tpu.memory_space<vmem>>, %arg3: memref<1x256x1xf32, #tpu.memory_space<vmem>>, %arg4: memref<1x32x128xf32, #tpu.memory_space<vmem>>, %arg5: memref<1x1x128xf32, #tpu.memory_space<vmem>>, %arg6: memref<1x256x1xi32, #tpu.memory_space<vmem>>, %arg7: memref<1x1x128xf32, #tpu.memory_space<vmem>>, %arg8: memref<1x128x128xf32, #tpu.memory_space<vmem>>, %arg9: memref<32x128xf32, #tpu.memory_space<vmem>>, %arg10: memref<32x128xbf16, #tpu.memory_space<vmem>>, %arg11: memref<1x128xf32, #tpu.memory_space<vmem>>, %arg12: memref<32x128xf32, #tpu.memory_space<vmem>>, %arg13: memref<1x128xf32, #tpu.memory_space<vmem>>) attributes {dimension_semantics = [#tpu.dimension_semantics<parallel>, #tpu.dimension_semantics<arbitrary>], iteration_bounds = array<i64: 2, 21>, scalar_prefetch = 0 : i64, scratch_operands = 5 : i64, tpu.core_type = #tpu.core_type<tc>, window_params = [{transform_indices = @transform_0, window_bounds = array<i64: 1, 256, 32>}, {transform_indices = @transform_1, window_bounds = array<i64: 1, 256, 1>}, {transform_indices = @transform_2, window_bounds = array<i64: 1, 32, 128>}, {transform_indices = @transform_3, window_bounds = array<i64: 1, 1, 128>}, {transform_indices = @transform_4, window_bounds = array<i64: 1, 256, 1>}, {transform_indices = @transform_5, window_bounds = array<i64: 1, 1, 128>}, {transform_indices = @transform_6, window_bounds = array<i64: 1, 128, 128>}]} {
    %c0_i32 = arith.constant 0 : i32
    %0 = arith.cmpi eq, %arg1, %c0_i32 : i32
    %1 = arith.extui %0 : i1 to i32
    %c0_i32_0 = arith.constant 0 : i32
    %2 = arith.cmpi ne, %1, %c0_i32_0 : i32
    scf.if %2 {
      %c0 = arith.constant 0 : index
      %c0_4 = arith.constant 0 : index
      %c0_5 = arith.constant 0 : index
      %9 = vector.load %arg4[%c0, %c0_4, %c0_5] : memref<1x32x128xf32, #tpu.memory_space<vmem>>, vector<1x32x128xf32>
      %10 = vector.shape_cast %9 : vector<1x32x128xf32> to vector<32x128xf32>
      %c0_6 = arith.constant 0 : index
      %c0_7 = arith.constant 0 : index
      %11 = vector.load %arg9[%c0_6, %c0_7] : memref<32x128xf32, #tpu.memory_space<vmem>>, vector<32x128xf32>
      tpu.vector_store %arg9[%c0_6, %c0_7], %10 {strides = array<i32>} : memref<32x128xf32, #tpu.memory_space<vmem>>, vector<32x128xf32>,
    } else {
    }
    %c20_i32 = arith.constant 20 : i32
    %3 = arith.cmpi slt, %arg1, %c20_i32 : i32
    %4 = arith.extui %3 : i1 to i32
    %c0_i32_1 = arith.constant 0 : i32
    %5 = arith.cmpi ne, %4, %c0_i32_1 : i32
    scf.if %5 {
      %c0 = arith.constant 0 : index
      %c0_4 = arith.constant 0 : index
      %9 = vector.load %arg9[%c0, %c0_4] : memref<32x128xf32, #tpu.memory_space<vmem>>, vector<32x128xf32>
      %10 = arith.truncf %9 : vector<32x128xf32> to vector<32x128xbf16>
      %c0_5 = arith.constant 0 : index
      %c0_6 = arith.constant 0 : index
      %11 = vector.load %arg10[%c0_5, %c0_6] : memref<32x128xbf16, #tpu.memory_space<vmem>>, vector<32x128xbf16>
      tpu.vector_store %arg10[%c0_5, %c0_6], %10 {strides = array<i32>} : memref<32x128xbf16, #tpu.memory_space<vmem>>, vector<32x128xbf16>,
      %c0_7 = arith.constant 0 : index
      %c0_8 = arith.constant 0 : index
      %12 = vector.load %arg9[%c0_7, %c0_8] : memref<32x128xf32, #tpu.memory_space<vmem>>, vector<32x128xf32>
      %c0_9 = arith.constant 0 : index
      %c0_10 = arith.constant 0 : index
      %13 = vector.load %arg9[%c0_9, %c0_10] : memref<32x128xf32, #tpu.memory_space<vmem>>, vector<32x128xf32>
      %14 = arith.mulf %12, %13 : vector<32x128xf32>
      %cst = arith.constant dense<0.000000e+00> : vector<128xf32>
      %15 = vector.multi_reduction <add>, %14, %cst [0] : vector<32x128xf32> to vector<128xf32>
      %16 = vector.shape_cast %15 : vector<128xf32> to vector<1x128xf32>
      %c0_11 = arith.constant 0 : index
      %c0_12 = arith.constant 0 : index
      %c0_13 = arith.constant 0 : index
      %17 = vector.load %arg5[%c0_11, %c0_12, %c0_13] : memref<1x1x128xf32, #tpu.memory_space<vmem>>, vector<1x1x128xf32>
      %18 = vector.shape_cast %17 : vector<1x1x128xf32> to vector<1x128xf32>
      %19 = arith.addf %16, %18 : vector<1x128xf32>
      %c0_14 = arith.constant 0 : index
      %c0_15 = arith.constant 0 : index
      %20 = vector.load %arg11[%c0_14, %c0_15] : memref<1x128xf32, #tpu.memory_space<vmem>>, vector<1x128xf32>
      tpu.vector_store %arg11[%c0_14, %c0_15], %19 {strides = array<i32>} : memref<1x128xf32, #tpu.memory_space<vmem>>, vector<1x128xf32>,
      %cst_16 = arith.constant 0.000000e+00 : f32
      %21 = vector.broadcast %cst_16 : f32 to vector<32x128xf32>
      %c0_17 = arith.constant 0 : index
      %c0_18 = arith.constant 0 : index
      %22 = vector.load %arg12[%c0_17, %c0_18] : memref<32x128xf32, #tpu.memory_space<vmem>>, vector<32x128xf32>
      tpu.vector_store %arg12[%c0_17, %c0_18], %21 {strides = array<i32>} : memref<32x128xf32, #tpu.memory_space<vmem>>, vector<32x128xf32>,
      %cst_19 = arith.constant 0.000000e+00 : f32
      %23 = vector.broadcast %cst_19 : f32 to vector<1x128xf32>
      %c0_20 = arith.constant 0 : index
      %c0_21 = arith.constant 0 : index
      %24 = vector.load %arg13[%c0_20, %c0_21] : memref<1x128xf32, #tpu.memory_space<vmem>>, vector<1x128xf32>
      tpu.vector_store %arg13[%c0_20, %c0_21], %23 {strides = array<i32>} : memref<1x128xf32, #tpu.memory_space<vmem>>, vector<1x128xf32>,
      %c19_i32 = arith.constant 19 : i32
      %25 = arith.cmpi eq, %arg1, %c19_i32 : i32
      %c0_i32_22 = arith.constant 0 : i32
      %c256_i32 = arith.constant 256 : i32
      %26 = arith.muli %c0_i32_22, %c256_i32 : i32
      %27 = tpu.assume_multiple %26, 256 : i32
      %c0_23 = arith.constant 0 : index
      %28 = arith.index_cast %27 : i32 to index
      %c0_24 = arith.constant 0 : index
      %29 = vector.load %arg2[%c0_23, %28, %c0_24] : memref<1x256x32xbf16, #tpu.memory_space<vmem>>, vector<1x256x32xbf16>
      %30 = vector.shape_cast %29 : vector<1x256x32xbf16> to vector<256x32xbf16>
      %c0_25 = arith.constant 0 : index
      %31 = arith.index_cast %27 : i32 to index
      %c0_26 = arith.constant 0 : index
      %32 = vector.load %arg3[%c0_25, %31, %c0_26] : memref<1x256x1xf32, #tpu.memory_space<vmem>>, vector<1x256x1xf32>
      %33 = vector.shape_cast %32 : vector<1x256x1xf32> to vector<256x1xf32>
      %c0_27 = arith.constant 0 : index
      %c0_28 = arith.constant 0 : index
      %34 = vector.load %arg10[%c0_27, %c0_28] : memref<32x128xbf16, #tpu.memory_space<vmem>>, vector<32x128xbf16>
      %cst_29 = arith.constant dense<0.000000e+00> : vector<256x128xf32>
      %35 = tpu.matmul %30, %34, %cst_29 {dimension_numbers = #tpu.dot_dimension_numbers<[1], [0], [0], [1], [0, 0, 1, 1], [], []>} : vector<256x32xbf16>, vector<32x128xbf16>, vector<256x128xf32> -> vector<256x128xf32>
      %c0_30 = arith.constant 0 : index
      %c0_31 = arith.constant 0 : index
      %36 = vector.load %arg11[%c0_30, %c0_31] : memref<1x128xf32, #tpu.memory_space<vmem>>, vector<1x128xf32>
      %cst_32 = arith.constant 2.000000e+00 : f32
      %37 = vector.broadcast %cst_32 : f32 to vector<256x128xf32>
      %38 = arith.mulf %37, %35 : vector<256x128xf32>
      %39 = vector.broadcast %36 : vector<1x128xf32> to vector<256x128xf32>
      %40 = arith.subf %39, %38 : vector<256x128xf32>
      %41 = tpu.iota {dimensions = array<i32: 1>} : vector<256x128xi32>
      %cst_33 = arith.constant dense<0x7F800000> : vector<256xf32>
      %42 = vector.multi_reduction <minimumf>, %40, %cst_33 [1] : vector<256x128xf32> to vector<256xf32>
      %43 = vector.shape_cast %42 : vector<256xf32> to vector<256x1xf32>
      %44 = vector.broadcast %43 : vector<256x1xf32> to vector<256x128xf32>
      %45 = arith.cmpf ole, %40, %44 : vector<256x128xf32>
      %c128_i32 = arith.constant 128 : i32
      %46 = vector.broadcast %c128_i32 : i32 to vector<256x128xi32>
      %47 = arith.select %45, %41, %46 : vector<256x128xi1>, vector<256x128xi32>
      %cst_34 = arith.constant dense<2147483647> : vector<256xi32>
      %48 = vector.multi_reduction <minsi>, %47, %cst_34 [1] : vector<256x128xi32> to vector<256xi32>
      %49 = vector.shape_cast %48 : vector<256xi32> to vector<256x1xi32>
      %50 = vector.broadcast %49 : vector<256x1xi32> to vector<256x128xi32>
      %51 = arith.cmpi eq, %41, %50 : vector<256x128xi32>
      %cst_35 = arith.constant 0.000000e+00 : f32
      %52 = vector.shape_cast %33 : vector<256x1xf32> to vector<256x1xf32>
      %53 = vector.broadcast %52 : vector<256x1xf32> to vector<256x128xf32>
      %54 = vector.broadcast %cst_35 : f32 to vector<256x128xf32>
      %55 = arith.select %51, %53, %54 : vector<256x128xi1>, vector<256x128xf32>
      %c0_36 = arith.constant 0 : index
      %c0_37 = arith.constant 0 : index
      %56 = vector.load %arg12[%c0_36, %c0_37] : memref<32x128xf32, #tpu.memory_space<vmem>>, vector<32x128xf32>
      %57 = arith.truncf %55 : vector<256x128xf32> to vector<256x128xbf16>
      %cst_38 = arith.constant dense<0.000000e+00> : vector<32x128xf32>
      %58 = tpu.matmul %30, %57, %cst_38 {dimension_numbers = #tpu.dot_dimension_numbers<[0], [0], [1], [1], [0, 1, 1, 1], [], []>} : vector<256x32xbf16>, vector<256x128xbf16>, vector<32x128xf32> -> vector<32x128xf32>
      %59 = arith.addf %56, %58 : vector<32x128xf32>
      %c0_39 = arith.constant 0 : index
      %c0_40 = arith.constant 0 : index
      %60 = vector.load %arg12[%c0_39, %c0_40] : memref<32x128xf32, #tpu.memory_space<vmem>>, vector<32x128xf32>
      tpu.vector_store %arg12[%c0_39, %c0_40], %59 {strides = array<i32>} : memref<32x128xf32, #tpu.memory_space<vmem>>, vector<32x128xf32>,
      %c0_41 = arith.constant 0 : index
      %c0_42 = arith.constant 0 : index
      %61 = vector.load %arg13[%c0_41, %c0_42] : memref<1x128xf32, #tpu.memory_space<vmem>>, vector<1x128xf32>
      %cst_43 = arith.constant dense<0.000000e+00> : vector<128xf32>
      %62 = vector.multi_reduction <add>, %55, %cst_43 [0] : vector<256x128xf32> to vector<128xf32>
      %63 = vector.shape_cast %62 : vector<128xf32> to vector<1x128xf32>
      %64 = arith.addf %61, %63 : vector<1x128xf32>
      %c0_44 = arith.constant 0 : index
      %c0_45 = arith.constant 0 : index
      %65 = vector.load %arg13[%c0_44, %c0_45] : memref<1x128xf32, #tpu.memory_space<vmem>>, vector<1x128xf32>
      tpu.vector_store %arg13[%c0_44, %c0_45], %64 {strides = array<i32>} : memref<1x128xf32, #tpu.memory_space<vmem>>, vector<1x128xf32>,
      %66 = arith.extui %25 : i1 to i32
      %c0_i32_46 = arith.constant 0 : i32
      %67 = arith.cmpi ne, %66, %c0_i32_46 : i32
      scf.if %67 {
        %c0_57 = arith.constant 0 : index
        %81 = arith.index_cast %27 : i32 to index
        %c0_58 = arith.constant 0 : index
        %82 = vector.load %arg6[%c0_57, %81, %c0_58] : memref<1x256x1xi32, #tpu.memory_space<vmem>>, vector<1x256x1xi32>
        %83 = vector.shape_cast %82 : vector<1x256x1xi32> to vector<256x1xi32>
        %84 = vector.shape_cast %49 : vector<256x1xi32> to vector<1x256x1xi32>
        tpu.vector_store %arg6[%c0_57, %81, %c0_58], %84 {strides = array<i32>} : memref<1x256x1xi32, #tpu.memory_space<vmem>>, vector<1x256x1xi32>,
      } else {
      }
      %c1_i32 = arith.constant 1 : i32
      %c0_47 = arith.constant 0 : index
      %c0_48 = arith.constant 0 : index
      %68 = vector.load %arg13[%c0_47, %c0_48] : memref<1x128xf32, #tpu.memory_space<vmem>>, vector<1x128xf32>
      %cst_49 = arith.constant 0.000000e+00 : f32
      %69 = vector.broadcast %cst_49 : f32 to vector<1x128xf32>
      %70 = arith.cmpf ogt, %68, %69 : vector<1x128xf32>
      %c0_50 = arith.constant 0 : index
      %c0_51 = arith.constant 0 : index
      %71 = vector.load %arg12[%c0_50, %c0_51] : memref<32x128xf32, #tpu.memory_space<vmem>>, vector<32x128xf32>
      %cst_52 = arith.constant 1.000000e+00 : f32
      %72 = vector.broadcast %cst_52 : f32 to vector<1x128xf32>
      %73 = arith.maximumf %68, %72 : vector<1x128xf32>
      %74 = vector.broadcast %73 : vector<1x128xf32> to vector<32x128xf32>
      %75 = arith.divf %71, %74 : vector<32x128xf32>
      %c0_53 = arith.constant 0 : index
      %c0_54 = arith.constant 0 : index
      %76 = vector.load %arg9[%c0_53, %c0_54] : memref<32x128xf32, #tpu.memory_space<vmem>>, vector<32x128xf32>
      %77 = vector.shape_cast %70 : vector<1x128xi1> to vector<1x128xi1>
      %78 = vector.broadcast %77 : vector<1x128xi1> to vector<32x128xi1>
      %79 = arith.select %78, %75, %76 : vector<32x128xi1>, vector<32x128xf32>
      %c0_55 = arith.constant 0 : index
      %c0_56 = arith.constant 0 : index
      %80 = vector.load %arg9[%c0_55, %c0_56] : memref<32x128xf32, #tpu.memory_space<vmem>>, vector<32x128xf32>
      tpu.vector_store %arg9[%c0_55, %c0_56], %79 {strides = array<i32>} : memref<32x128xf32, #tpu.memory_space<vmem>>, vector<32x128xf32>,
    } else {
    }
    %c20_i32_2 = arith.constant 20 : i32
    %6 = arith.cmpi eq, %arg1, %c20_i32_2 : i32
    %7 = arith.extui %6 : i1 to i32
    %c0_i32_3 = arith.constant 0 : i32
    %8 = arith.cmpi ne, %7, %c0_i32_3 : i32
    scf.if %8 {
      %c0 = arith.constant 0 : index
      %c0_4 = arith.constant 0 : index
      %9 = vector.load %arg9[%c0, %c0_4] : memref<32x128xf32, #tpu.memory_space<vmem>>, vector<32x128xf32>
      %10 = arith.truncf %9 : vector<32x128xf32> to vector<32x128xbf16>
      %c0_5 = arith.constant 0 : index
      %c0_6 = arith.constant 0 : index
      %11 = vector.load %arg10[%c0_5, %c0_6] : memref<32x128xbf16, #tpu.memory_space<vmem>>, vector<32x128xbf16>
      tpu.vector_store %arg10[%c0_5, %c0_6], %10 {strides = array<i32>} : memref<32x128xbf16, #tpu.memory_space<vmem>>, vector<32x128xbf16>,
      %c0_7 = arith.constant 0 : index
      %c0_8 = arith.constant 0 : index
      %12 = vector.load %arg9[%c0_7, %c0_8] : memref<32x128xf32, #tpu.memory_space<vmem>>, vector<32x128xf32>
      %c0_9 = arith.constant 0 : index
      %c0_10 = arith.constant 0 : index
      %13 = vector.load %arg9[%c0_9, %c0_10] : memref<32x128xf32, #tpu.memory_space<vmem>>, vector<32x128xf32>
      %14 = arith.mulf %12, %13 : vector<32x128xf32>
      %cst = arith.constant dense<0.000000e+00> : vector<128xf32>
      %15 = vector.multi_reduction <add>, %14, %cst [0] : vector<32x128xf32> to vector<128xf32>
      %16 = vector.shape_cast %15 : vector<128xf32> to vector<1x128xf32>
      %cst_11 = arith.constant 0.000000e+00 : f32
      %17 = vector.broadcast %cst_11 : f32 to vector<1x128xf32>
      %c0_12 = arith.constant 0 : index
      %c0_13 = arith.constant 0 : index
      %c0_14 = arith.constant 0 : index
      %18 = vector.load %arg7[%c0_12, %c0_13, %c0_14] : memref<1x1x128xf32, #tpu.memory_space<vmem>>, vector<1x1x128xf32>
      %19 = vector.shape_cast %18 : vector<1x1x128xf32> to vector<1x128xf32>
      %20 = vector.shape_cast %17 : vector<1x128xf32> to vector<1x1x128xf32>
      tpu.vector_store %arg7[%c0_12, %c0_13, %c0_14], %20 {strides = array<i32>} : memref<1x1x128xf32, #tpu.memory_space<vmem>>, vector<1x1x128xf32>,
      %c0_i32_15 = arith.constant 0 : i32
      %c256_i32 = arith.constant 256 : i32
      %21 = arith.muli %c0_i32_15, %c256_i32 : i32
      %22 = tpu.assume_multiple %21, 256 : i32
      %c0_16 = arith.constant 0 : index
      %23 = arith.index_cast %22 : i32 to index
      %c0_17 = arith.constant 0 : index
      %24 = vector.load %arg2[%c0_16, %23, %c0_17] : memref<1x256x32xbf16, #tpu.memory_space<vmem>>, vector<1x256x32xbf16>
      %25 = vector.shape_cast %24 : vector<1x256x32xbf16> to vector<256x32xbf16>
      %c0_18 = arith.constant 0 : index
      %26 = arith.index_cast %22 : i32 to index
      %c0_19 = arith.constant 0 : index
      %27 = vector.load %arg3[%c0_18, %26, %c0_19] : memref<1x256x1xf32, #tpu.memory_space<vmem>>, vector<1x256x1xf32>
      %28 = vector.shape_cast %27 : vector<1x256x1xf32> to vector<256x1xf32>
      %c0_20 = arith.constant 0 : index
      %29 = arith.index_cast %22 : i32 to index
      %c0_21 = arith.constant 0 : index
      %30 = vector.load %arg6[%c0_20, %29, %c0_21] : memref<1x256x1xi32, #tpu.memory_space<vmem>>, vector<1x256x1xi32>
      %31 = vector.shape_cast %30 : vector<1x256x1xi32> to vector<256x1xi32>
      %c0_22 = arith.constant 0 : index
      %c0_23 = arith.constant 0 : index
      %32 = vector.load %arg10[%c0_22, %c0_23] : memref<32x128xbf16, #tpu.memory_space<vmem>>, vector<32x128xbf16>
      %cst_24 = arith.constant dense<0.000000e+00> : vector<256x128xf32>
      %33 = tpu.matmul %25, %32, %cst_24 {dimension_numbers = #tpu.dot_dimension_numbers<[1], [0], [0], [1], [0, 0, 1, 1], [], []>} : vector<256x32xbf16>, vector<32x128xbf16>, vector<256x128xf32> -> vector<256x128xf32>
      %34 = vector.broadcast %28 : vector<256x1xf32> to vector<256x128xf32>
      %35 = vector.broadcast %16 : vector<1x128xf32> to vector<256x128xf32>
      %36 = arith.addf %34, %35 : vector<256x128xf32>
      %cst_25 = arith.constant 2.000000e+00 : f32
      %37 = vector.broadcast %cst_25 : f32 to vector<256x128xf32>
      %38 = arith.mulf %37, %33 : vector<256x128xf32>
      %39 = arith.subf %36, %38 : vector<256x128xf32>
      %cst_26 = arith.constant 0.000000e+00 : f32
      %40 = vector.broadcast %cst_26 : f32 to vector<256x128xf32>
      %41 = arith.maximumf %39, %40 : vector<256x128xf32>
      %42 = math.sqrt %41 : vector<256x128xf32>
      %43 = tpu.iota {dimensions = array<i32: 1>} : vector<256x128xi32>
      %44 = vector.broadcast %31 : vector<256x1xi32> to vector<256x128xi32>
      %45 = arith.cmpi eq, %43, %44 : vector<256x128xi32>
      %cst_27 = arith.constant 0.000000e+00 : f32
      %46 = vector.shape_cast %28 : vector<256x1xf32> to vector<256x1xf32>
      %47 = vector.broadcast %46 : vector<256x1xf32> to vector<256x128xf32>
      %48 = vector.broadcast %cst_27 : f32 to vector<256x128xf32>
      %49 = arith.select %45, %47, %48 : vector<256x128xi1>, vector<256x128xf32>
      %c0_28 = arith.constant 0 : index
      %c0_29 = arith.constant 0 : index
      %c0_30 = arith.constant 0 : index
      %50 = vector.load %arg7[%c0_28, %c0_29, %c0_30] : memref<1x1x128xf32, #tpu.memory_space<vmem>>, vector<1x1x128xf32>
      %51 = vector.shape_cast %50 : vector<1x1x128xf32> to vector<1x128xf32>
      %cst_31 = arith.constant 1.000000e-01 : f32
      %52 = vector.broadcast %cst_31 : f32 to vector<256x128xf32>
      %53 = arith.mulf %42, %52 : vector<256x128xf32>
      %54 = math.exp %53 : vector<256x128xf32>
      %55 = arith.mulf %54, %49 : vector<256x128xf32>
      %cst_32 = arith.constant dense<0.000000e+00> : vector<128xf32>
      %56 = vector.multi_reduction <add>, %55, %cst_32 [0] : vector<256x128xf32> to vector<128xf32>
      %57 = vector.shape_cast %56 : vector<128xf32> to vector<1x128xf32>
      %58 = arith.addf %51, %57 : vector<1x128xf32>
      %c0_33 = arith.constant 0 : index
      %c0_34 = arith.constant 0 : index
      %c0_35 = arith.constant 0 : index
      %59 = vector.load %arg7[%c0_33, %c0_34, %c0_35] : memref<1x1x128xf32, #tpu.memory_space<vmem>>, vector<1x1x128xf32>
      %60 = vector.shape_cast %59 : vector<1x1x128xf32> to vector<1x128xf32>
      %61 = vector.shape_cast %58 : vector<1x128xf32> to vector<1x1x128xf32>
      tpu.vector_store %arg7[%c0_33, %c0_34, %c0_35], %61 {strides = array<i32>} : memref<1x1x128xf32, #tpu.memory_space<vmem>>, vector<1x1x128xf32>,
      %c1_i32 = arith.constant 1 : i32
      %c0_36 = arith.constant 0 : index
      %c0_37 = arith.constant 0 : index
      %c0_38 = arith.constant 0 : index
      %62 = vector.load %arg7[%c0_36, %c0_37, %c0_38] : memref<1x1x128xf32, #tpu.memory_space<vmem>>, vector<1x1x128xf32>
      %63 = vector.shape_cast %62 : vector<1x1x128xf32> to vector<1x128xf32>
      %c0_39 = arith.constant 0 : index
      %c0_40 = arith.constant 0 : index
      %64 = vector.load %arg13[%c0_39, %c0_40] : memref<1x128xf32, #tpu.memory_space<vmem>>, vector<1x128xf32>
      %cst_41 = arith.constant 1.000000e+00 : f32
      %65 = vector.broadcast %cst_41 : f32 to vector<1x128xf32>
      %66 = arith.maximumf %64, %65 : vector<1x128xf32>
      %67 = arith.divf %63, %66 : vector<1x128xf32>
      %c0_42 = arith.constant 0 : index
      %c0_43 = arith.constant 0 : index
      %c0_44 = arith.constant 0 : index
      %68 = vector.load %arg7[%c0_42, %c0_43, %c0_44] : memref<1x1x128xf32, #tpu.memory_space<vmem>>, vector<1x1x128xf32>
      %69 = vector.shape_cast %68 : vector<1x1x128xf32> to vector<1x128xf32>
      %70 = vector.shape_cast %67 : vector<1x128xf32> to vector<1x1x128xf32>
      tpu.vector_store %arg7[%c0_42, %c0_43, %c0_44], %70 {strides = array<i32>} : memref<1x1x128xf32, #tpu.memory_space<vmem>>, vector<1x1x128xf32>,
      %c0_45 = arith.constant 0 : index
      %c0_46 = arith.constant 0 : index
      %71 = vector.load %arg9[%c0_45, %c0_46] : memref<32x128xf32, #tpu.memory_space<vmem>>, vector<32x128xf32>
      %cst_47 = arith.constant dense<0.000000e+00> : vector<128x128xf32>
      %72 = tpu.matmul %71, %71, %cst_47 {dimension_numbers = #tpu.dot_dimension_numbers<[0], [0], [1], [1], [0, 1, 1, 1], [], []>} : vector<32x128xf32>, vector<32x128xf32>, vector<128x128xf32> -> vector<128x128xf32>
      %73 = tpu.iota {dimensions = array<i32: 0>} : vector<128x128xi32>
      %74 = tpu.iota {dimensions = array<i32: 1>} : vector<128x128xi32>
      %75 = arith.cmpi eq, %73, %74 : vector<128x128xi32>
      %cst_48 = arith.constant 0.000000e+00 : f32
      %76 = vector.broadcast %cst_48 : f32 to vector<128x128xf32>
      %77 = arith.select %75, %72, %76 : vector<128x128xi1>, vector<128x128xf32>
      %cst_49 = arith.constant dense<0.000000e+00> : vector<128xf32>
      %78 = vector.multi_reduction <add>, %77, %cst_49 [1] : vector<128x128xf32> to vector<128xf32>
      %79 = vector.shape_cast %78 : vector<128xf32> to vector<128x1xf32>
      %cst_50 = arith.constant dense<0.000000e+00> : vector<128xf32>
      %80 = vector.multi_reduction <add>, %77, %cst_50 [0] : vector<128x128xf32> to vector<128xf32>
      %81 = vector.shape_cast %80 : vector<128xf32> to vector<1x128xf32>
      %82 = vector.broadcast %79 : vector<128x1xf32> to vector<128x128xf32>
      %83 = vector.broadcast %81 : vector<1x128xf32> to vector<128x128xf32>
      %84 = arith.addf %82, %83 : vector<128x128xf32>
      %cst_51 = arith.constant 2.000000e+00 : f32
      %85 = vector.broadcast %cst_51 : f32 to vector<128x128xf32>
      %86 = arith.mulf %85, %72 : vector<128x128xf32>
      %87 = arith.subf %84, %86 : vector<128x128xf32>
      %cst_52 = arith.constant 0.000000e+00 : f32
      %88 = vector.broadcast %cst_52 : f32 to vector<128x128xf32>
      %89 = arith.maximumf %87, %88 : vector<128x128xf32>
      %90 = math.sqrt %89 : vector<128x128xf32>
      %cst_53 = arith.constant 0.000000e+00 : f32
      %91 = vector.broadcast %cst_53 : f32 to vector<128x128xf32>
      %92 = arith.subf %91, %90 : vector<128x128xf32>
      %cst_54 = arith.constant 1.000000e-01 : f32
      %93 = vector.broadcast %cst_54 : f32 to vector<128x128xf32>
      %94 = arith.mulf %92, %93 : vector<128x128xf32>
      %95 = math.exp %94 : vector<128x128xf32>
      %c0_55 = arith.constant 0 : index
      %c0_56 = arith.constant 0 : index
      %c0_57 = arith.constant 0 : index
      %96 = vector.load %arg8[%c0_55, %c0_56, %c0_57] : memref<1x128x128xf32, #tpu.memory_space<vmem>>, vector<1x128x128xf32>
      %97 = vector.shape_cast %96 : vector<1x128x128xf32> to vector<128x128xf32>
      %98 = vector.shape_cast %95 : vector<128x128xf32> to vector<1x128x128xf32>
      tpu.vector_store %arg8[%c0_55, %c0_56, %c0_57], %98 {strides = array<i32>} : memref<1x128x128xf32, #tpu.memory_space<vmem>>, vector<1x128x128xf32>,
    } else {
    }
    return
  }
  func.func @transform_0(%arg0: i32, %arg1: i32) -> (i32, i32, i32) {
    %c0_i32 = arith.constant 0 : i32
    %c0_i32_0 = arith.constant 0 : i32
    %c0_i32_1 = arith.constant 0 : i32
    return %arg0, %c0_i32, %c0_i32_0 : i32, i32, i32
  }
  func.func @transform_1(%arg0: i32, %arg1: i32) -> (i32, i32, i32) {
    %c0_i32 = arith.constant 0 : i32
    %c0_i32_0 = arith.constant 0 : i32
    %c0_i32_1 = arith.constant 0 : i32
    return %arg0, %c0_i32, %c0_i32_0 : i32, i32, i32
  }
  func.func @transform_2(%arg0: i32, %arg1: i32) -> (i32, i32, i32) {
    %c0_i32 = arith.constant 0 : i32
    %c0_i32_0 = arith.constant 0 : i32
    %c0_i32_1 = arith.constant 0 : i32
    return %arg0, %c0_i32, %c0_i32_0 : i32, i32, i32
  }
  func.func @transform_3(%arg0: i32, %arg1: i32) -> (i32, i32, i32) {
    %c0_i32 = arith.constant 0 : i32
    %c0_i32_0 = arith.constant 0 : i32
    %c0_i32_1 = arith.constant 0 : i32
    return %arg0, %c0_i32, %c0_i32_0 : i32, i32, i32
  }
  func.func @transform_4(%arg0: i32, %arg1: i32) -> (i32, i32, i32) {
    %c0_i32 = arith.constant 0 : i32
    %c0_i32_0 = arith.constant 0 : i32
    %c0_i32_1 = arith.constant 0 : i32
    return %arg0, %c0_i32, %c0_i32_0 : i32, i32, i32
  }
  func.func @transform_5(%arg0: i32, %arg1: i32) -> (i32, i32, i32) {
    %c0_i32 = arith.constant 0 : i32
    %c0_i32_0 = arith.constant 0 : i32
    %c0_i32_1 = arith.constant 0 : i32
    return %arg0, %c0_i32, %c0_i32_0 : i32, i32, i32
  }
  func.func @transform_6(%arg0: i32, %arg1: i32) -> (i32, i32, i32) {
    %c0_i32 = arith.constant 0 : i32
    %c0_i32_0 = arith.constant 0 : i32
    %c0_i32_1 = arith.constant 0 : i32
    return %arg0, %c0_i32, %c0_i32_0 : i32, i32, i32
  }
}

</mosaic_0001>

<bundles_post_ra>
// kernel: fn.2
= control target key start
LH: loop header
LB: loop body
LE: loop exit
PB: predicated region body
PF: predicated region fallthrough
CT: control target
= control target key end

     0   :  { %s1177_s9 = smov 0   ;;  %s1179_s10 = smov 0   ;;  %s1547_s0 = inlined_call_operand.vmem [shape: f32[2,256,32], index: 0, kind: input, shape index: {}]   ;;  %s1548_s1 = inlined_call_operand.vmem [shape: f32[2,256,1], index: 1, kind: input, shape index: {}]   ;;  %s1549_s2 = inlined_call_operand.vmem [shape: bf16[2,256,32], index: 2, kind: output, shape index: {}]  }
   0x1   :  { %s1181_s11 = smov 0  }
   0x2 LB: > { %s24_s12 = sadd.s32 1, %s1155_s10  ;;  %p970_p0 = scmp.ge.s32.totalorder %s1159_s11, 1  ;;  %s1159_s11 = sphi %s1181_s11, %s12_s11   ;;  %s1155_s10 = sphi %s1179_s10, %s1551_s10   ;;  %s1151_s9 = sphi %s1177_s9, %s1550_s9  }
   0x3   : > { %p26_p1 = scmp.ge.s32.totalorder %s24_s12, 2  ;;  %p150_p2 = scmp.lt.s32.totalorder %s1159_s11, 3 }
   0x5   : > { %s1553_s12 = smov (%p26_p1, %s24_s12), 0  ;;  %p151_p3 = pnand %p970_p0, %p150_p2 }
   0x6   : > { %p190_p4 = scmp.lt.s32.totalorder (!%p151_p3), %s1151_s9, 1 }
   0x7   : > { %154 = sbr.rel (%p151_p3) target bundleno = 381 (0x17d), region = 28 }
   0xc   : > { %s1555_s9 = smov (!%p190_p4, %s1151_s9), 1  ;;  %vm315_vm0 = vcmask 261120   ;;  %v1161_v58 = vmov 0   ;;  %vm828_vm1 = vcmask 257024  }
   0xd   : > { %s1011_s13 = sshll.u32 %s1555_s9, 8  ;;  %1071 = vset.pattern.permute.xlu0 %v1161_v58  ;;  %1072 = vset.pattern.permute.xlu1 %v1161_v58  ;;  %s1013_s20 = sshll.u32 %s1555_s9, 7 }
   0xe   : > { %s1203_s16 = scalar_lea.vmem %s1547_s0, %s1011_s13  ;;  %s1402_s19 = scalar_lea.vmem %s1548_s1, %s1011_s13 }
   0xf   : > { %v1206_v0 = vld [vmem:[%s1203_s16 + $0x10] sm:$0xff]  ;;  %v1209_v1 = vld [vmem:[%s1203_s16] sm:$0xff]  ;;  %v1212_v2 = vld [vmem:[%s1203_s16 + $0x18] sm:$0xff]  ;;  %s1441_s23 = scalar_lea.vmem %s1549_s2, %s1013_s20 }
  0x10   : > { %v285_v3 = vmul.f32 %v1206_v0, %v1206_v0  ;;  %v283_v4 = vmul.f32 %v1209_v1, %v1209_v1  ;;  %v286_v5 = vmul.f32 %v1212_v2, %v1212_v2  ;;  %v1221_v6 = vld [vmem:[%s1203_s16 + $0x8] sm:$0xff]  ;;  %v1229_v9 = vld [vmem:[%s1203_s16 + $0x20] sm:$0xff]  ;;  %v1240_v16 = vld [vmem:[%s1203_s16 + $0x38] sm:$0xff] }
  0x11   : > { %v284_v7 = vmul.f32 %v1221_v6, %v1221_v6  ;;  %v1226_v8 = vld [vmem:[%s1203_s16 + $0x28] sm:$0xff]  ;;  %v287_v15 = vmul.f32 %v1229_v9, %v1229_v9  ;;  %v1243_v17 = vld [vmem:[%s1203_s16 + $0x30] sm:$0xff]  ;;  %v290_v19 = vmul.f32 %v1240_v16, %v1240_v16  ;;  %v1255_v23 = vld [vmem:[%s1203_s16 + $0x40] sm:$0xff] }
  0x12   : > { %v322_v10 = vsel %vm315_vm0, %v285_v3, 0.0  ;;  %v316_v11 = vsel %vm315_vm0, %v283_v4, 0.0  ;;  %v325_v12 = vsel %vm315_vm0, %v286_v5, 0.0  ;;  %v288_v14 = vmul.f32 %v1226_v8, %v1226_v8  ;;  %v1252_v22 = vld [vmem:[%s1203_s16 + $0x48] sm:$0xff]  ;;  %v1264_v28 = vld [vmem:[%s1203_s16 + $0x58] sm:$0xff]  ;;  %v1267_v29 = vld [vmem:[%s1203_s16 + $0x50] sm:$0xff] }
  0x13   : > { %323 = vadd.xlane.f32.xlu1 %v322_v10  ;;  %317 = vadd.xlane.f32.xlu0 %v316_v11  ;;  %v319_v13 = vsel %vm315_vm0, %v284_v7, 0.0  ;;  %v328_v20 = vsel %vm315_vm0, %v287_v15, 0.0  ;;  %v289_v21 = vmul.f32 %v1243_v17, %v1243_v17  ;;  %v337_v24 = vsel %vm315_vm0, %v290_v19, 0.0  ;;  %v1276_v34 = vld [vmem:[%s1203_s16 + $0x68] sm:$0xff]  ;;  %v1279_v35 = vld [vmem:[%s1203_s16 + $0x60] sm:$0xff]  ;;  %v1288_v40 = vld [vmem:[%s1203_s16 + $0x78] sm:$0xff] }
  0x14   : > { %v331_v18 = vsel %vm315_vm0, %v288_v14, 0.0  ;;  %v292_v25 = vmul.f32 %v1252_v22, %v1252_v22  ;;  %v291_v27 = vmul.f32 %v1255_v23, %v1255_v23  ;;  %v294_v31 = vmul.f32 %v1264_v28, %v1264_v28  ;;  %v1291_v41 = vld [vmem:[%s1203_s16 + $0x70] sm:$0xff]  ;;  %v1300_v46 = vld [vmem:[%s1203_s16 + $0x88] sm:$0xff]  ;;  %v1303_v47 = vld [vmem:[%s1203_s16 + $0x80] sm:$0xff] }
  0x15   : > { %v334_v26 = vsel %vm315_vm0, %v289_v21, 0.0  ;;  %v293_v33 = vmul.f32 %v1267_v29, %v1267_v29  ;;  %v296_v37 = vmul.f32 %v1276_v34, %v1276_v34  ;;  %v295_v39 = vmul.f32 %v1279_v35, %v1279_v35  ;;  %v1312_v52 = vld [vmem:[%s1203_s16 + $0x98] sm:$0xff]  ;;  %v1315_v53 = vld [vmem:[%s1203_s16 + $0x90] sm:$0xff]  ;;  %v1324_v59 = vld [vmem:[%s1203_s16 + $0xa8] sm:$0xff] }
  0x16   : > { %v343_v30 = vsel %vm315_vm0, %v292_v25, 0.0  ;;  %v340_v32 = vsel %vm315_vm0, %v291_v27, 0.0  ;;  %v349_v36 = vsel %vm315_vm0, %v294_v31, 0.0  ;;  %v298_v43 = vmul.f32 %v1288_v40, %v1288_v40  ;;  %v1327_v60 = vld [vmem:[%s1203_s16 + $0xa0] sm:$0xff]  ;;  %v1336_v4 = vld [vmem:[%s1203_s16 + $0xb8] sm:$0xff]  ;;  %v1339_v5 = vld [vmem:[%s1203_s16 + $0xb0] sm:$0xff] }
  0x17   : > { %326 = vadd.xlane.f32.xlu1 %v325_v12  ;;  %320 = vadd.xlane.f32.xlu0 %v319_v13  ;;  %v346_v38 = vsel %vm315_vm0, %v293_v33, 0.0  ;;  %v355_v42 = vsel %vm315_vm0, %v296_v37, 0.0  ;;  %v352_v44 = vsel %vm315_vm0, %v295_v39, 0.0  ;;  %v297_v45 = vmul.f32 %v1291_v41, %v1291_v41  ;;  %v1348_v13 = vld [vmem:[%s1203_s16 + $0xc8] sm:$0xff]  ;;  %v1351_v14 = vld [vmem:[%s1203_s16 + $0xc0] sm:$0xff]  ;;  %v1360_v21 = vld [vmem:[%s1203_s16 + $0xd8] sm:$0xff] }
  0x18   : > { %v361_v48 = vsel %vm315_vm0, %v298_v43, 0.0  ;;  %v300_v49 = vmul.f32 %v1300_v46, %v1300_v46  ;;  %v299_v51 = vmul.f32 %v1303_v47, %v1303_v47  ;;  %v302_v55 = vmul.f32 %v1312_v52, %v1312_v52  ;;  %v1372_v31 = vld [vmem:[%s1203_s16 + $0xe8] sm:$0xff]  ;;  %v1384_v39 = vld [vmem:[%s1203_s16 + $0xf8] sm:$0xff] }
  0x19   : > { %v358_v50 = vsel %vm315_vm0, %v297_v45, 0.0  ;;  %v301_v57 = vmul.f32 %v1315_v53, %v1315_v53  ;;  %v304_v62 = vmul.f32 %v1324_v59, %v1324_v59  ;;  %v303_v3 = vmul.f32 %v1327_v60, %v1327_v60 }
  0x1a   : > { %v367_v54 = vsel %vm315_vm0, %v300_v49, 0.0  ;;  %v364_v56 = vsel %vm315_vm0, %v299_v51, 0.0  ;;  %v373_v61 = vsel %vm315_vm0, %v302_v55, 0.0  ;;  %v306_v10 = vmul.f32 %v1336_v4, %v1336_v4 }
  0x1b   : > { %332 = vadd.xlane.f32.xlu1 %v331_v18  ;;  %329 = vadd.xlane.f32.xlu0 %v328_v20  ;;  %v370_v63 = vsel %vm315_vm0, %v301_v57, 0.0  ;;  %v379_v7 = vsel %vm315_vm0, %v304_v62, 0.0  ;;  %v376_v11 = vsel %vm315_vm0, %v303_v3, 0.0  ;;  %v305_v12 = vmul.f32 %v1339_v5, %v1339_v5 }
  0x1c   : > { %v385_v15 = vsel %vm315_vm0, %v306_v10, 0.0  ;;  %v308_v18 = vmul.f32 %v1348_v13, %v1348_v13  ;;  %v307_v20 = vmul.f32 %v1351_v14, %v1351_v14 }
  0x1d   : > { %v382_v19 = vsel %vm315_vm0, %v305_v12, 0.0  ;;  %v251_v12 = vld [vmem:[%s1402_s19] sm:$0xff] }
  0x1e   : > { %v391_v25 = vsel %vm315_vm0, %v308_v18, 0.0  ;;  %v388_v27 = vsel %vm315_vm0, %v307_v20, 0.0 }
  0x1f   : > { %338 = vadd.xlane.f32.xlu1 %v337_v24  ;;  %335 = vadd.xlane.f32.xlu0 %v334_v26  ;;  %v1363_v24 = vld [vmem:[%s1203_s16 + $0xd0] sm:$0xff]  ;;  %v310_v26 = vmul.f32 %v1360_v21, %v1360_v21 }
  0x21   : > { %v397_v33 = vsel %vm315_vm0, %v310_v26, 0.0 }
  0x23   : > { %344 = vadd.xlane.f32.xlu1 %v343_v30  ;;  %341 = vadd.xlane.f32.xlu0 %v340_v32  ;;  %v309_v30 = vmul.f32 %v1363_v24, %v1363_v24  ;;  %v1375_v32 = vld [vmem:[%s1203_s16 + $0xe0] sm:$0xff] }
  0x25   : > { %v394_v37 = vsel %vm315_vm0, %v309_v30, 0.0 }
  0x27   : > { %350 = vadd.xlane.f32.xlu1 %v349_v36  ;;  %347 = vadd.xlane.f32.xlu0 %v346_v38  ;;  %v312_v36 = vmul.f32 %v1372_v31, %v1372_v31  ;;  %v311_v38 = vmul.f32 %v1375_v32, %v1375_v32 }
  0x29   : > { %v403_v43 = vsel %vm315_vm0, %v312_v36, 0.0  ;;  %v400_v45 = vsel %vm315_vm0, %v311_v38, 0.0 }
  0x2b   : > { %356 = vadd.xlane.f32.xlu1 %v355_v42  ;;  %353 = vadd.xlane.f32.xlu0 %v352_v44  ;;  %v1387_v42 = vld [vmem:[%s1203_s16 + $0xf0] sm:$0xff]  ;;  %v314_v44 = vmul.f32 %v1384_v39, %v1384_v39 }
  0x2d   : > { %v409_v49 = vsel %vm315_vm0, %v314_v44, 0.0  ;;  %v253_v44 = vld [vmem:[%s1402_s19 + $0x10] sm:$0xff] }
  0x2f   : > { %362 = vadd.xlane.f32.xlu1 %v361_v48  ;;  %359 = vadd.xlane.f32.xlu0 %v358_v50  ;;  %v313_v48 = vmul.f32 %v1387_v42, %v1387_v42 }
  0x31   : > { %v406_v50 = vsel %vm315_vm0, %v313_v48, 0.0 }
  0x33   : > { %368 = vadd.xlane.f32.xlu1 %v367_v54  ;;  %365 = vadd.xlane.f32.xlu0 %v364_v56 }
  0x37   : > { %374 = vadd.xlane.f32.xlu1 %v373_v61  ;;  %371 = vadd.xlane.f32.xlu0 %v370_v63 }
  0x3b   : > { %380 = vadd.xlane.f32.xlu1 %v379_v7  ;;  %377 = vadd.xlane.f32.xlu0 %v376_v11 }
  0x3f   : > { %386 = vadd.xlane.f32.xlu1 %v385_v15  ;;  %383 = vadd.xlane.f32.xlu0 %v382_v19 }
  0x43   : > { %392 = vadd.xlane.f32.xlu1 %v391_v25  ;;  %389 = vadd.xlane.f32.xlu0 %v388_v27  ;;  %v252_v27 = vld [vmem:[%s1402_s19 + $0x8] sm:$0xff] }
  0x47   : > { %398 = vadd.xlane.f32.xlu1 %v397_v33  ;;  %395 = vadd.xlane.f32.xlu0 %v394_v37 }
  0x4b   : > { %404 = vadd.xlane.f32.xlu1 %v403_v43  ;;  %401 = vadd.xlane.f32.xlu0 %v400_v45 }
  0x4f   : > { %410 = vadd.xlane.f32.xlu1 %v409_v49  ;;  %407 = vadd.xlane.f32.xlu0 %v406_v50 }
  0x9c   : > { %v324_v51 = vpop.xlane.xlu1 %323  ;;  %v318_v54 = vpop.xlane.xlu0 %317 }
  0x9d   : > { %v412_v55 = vmax.f32 %v318_v54, 1e-24  ;;  %v414_v56 = vmax.f32 %v324_v51, 1e-24 }
  0x9f   : > { %1073 = vrsqrt.f32 %v412_v55 }
  0xa0   : > { %v327_v57 = vpop.xlane.xlu1 %326  ;;  %v321_v58 = vpop.xlane.xlu0 %320  ;;  %1075 = vrsqrt.f32 %v414_v56  ;;  %v254_v56 = vld [vmem:[%s1402_s19 + $0x18] sm:$0xff] }
  0xa1   : > { %v413_v61 = vmax.f32 %v321_v58, 1e-24  ;;  %v415_v62 = vmax.f32 %v327_v57, 1e-24 }
  0xa3   : > { %1077 = vrsqrt.f32 %v413_v61 }
  0xa4   : > { %v333_v63 = vpop.xlane.xlu1 %332  ;;  %v330_v3 = vpop.xlane.xlu0 %329  ;;  %1079 = vrsqrt.f32 %v415_v62 }
  0xa5   : > { %v416_v10 = vmax.f32 %v330_v3, 1e-24  ;;  %v417_v15 = vmax.f32 %v333_v63, 1e-24 }
  0xa7   : > { %1081 = vrsqrt.f32 %v416_v10  ;;  %v260_v10 = vld [vmem:[%s1402_s19 + $0x48] sm:$0xff] }
  0xa8   : > { %v339_v7 = vpop.xlane.xlu1 %338  ;;  %v336_v11 = vpop.xlane.xlu0 %335 }
  0xa9   : > { %v418_v36 = vmax.f32 %v336_v11, 1e-24  ;;  %v419_v48 = vmax.f32 %v339_v7, 1e-24  ;;  %v255_v7 = vld [vmem:[%s1402_s19 + $0x20] sm:$0xff] }
  0xac   : > { %v345_v18 = vpop.xlane.xlu1 %344  ;;  %v342_v19 = vpop.xlane.xlu0 %341 }
  0xad   : > { %v1074_v20 = vpop.eup %1073  ;;  %v421_v25 = vmax.f32 %v345_v18, 1e-24  ;;  %v420_v61 = vmax.f32 %v342_v19, 1e-24  ;;  %v256_v19 = vld [vmem:[%s1402_s19 + $0x28] sm:$0xff] }
  0xae   : > { %v476_v26 = vmul.f32 %v1074_v20, %v251_v12  ;;  %v1076_v30 = vpop.eup %1075 }
  0xaf   : > { %1083 = vrsqrt.f32 %v421_v25  ;;  %v478_v50 = vmul.f32 %v1076_v30, %v253_v44  ;;  %v262_v30 = vld [vmem:[%s1402_s19 + $0x58] sm:$0xff] }
  0xb0   : > { %1085 = vrsqrt.f32 %v417_v15  ;;  %510 = vperm.xlu0 %1071, %v476_v26   ;;  %v351_v33 = vpop.xlane.xlu1 %350  ;;  %v348_v37 = vpop.xlane.xlu0 %347 }
  0xb1   : > { %v1078_v38 = vpop.eup %1077  ;;  %v423_v43 = vmax.f32 %v351_v33, 1e-24  ;;  %v422_v18 = vmax.f32 %v348_v37, 1e-24 }
  0xb2   : > { %v477_v45 = vmul.f32 %v1078_v38, %v252_v27  ;;  %v1080_v54 = vpop.eup %1079 }
  0xb3   : > { %1087 = vrsqrt.f32 %v423_v43  ;;  %v479_v58 = vmul.f32 %v1080_v54, %v254_v56 }
  0xb4   : > { %515 = vperm.xlu1 %1072, %v477_v45   ;;  %v357_v49 = vpop.xlane.xlu1 %356  ;;  %1089 = vrsqrt.f32 %v418_v36  ;;  %v354_v51 = vpop.xlane.xlu0 %353 }
  0xb5   : > { %v425_v55 = vmax.f32 %v357_v49, 1e-24  ;;  %v1082_v63 = vpop.eup %1081  ;;  %v424_v43 = vmax.f32 %v354_v51, 1e-24  ;;  %v257_v49 = vld [vmem:[%s1402_s19 + $0x30] sm:$0xff] }
  0xb6   : > { %v480_v15 = vmul.f32 %v1082_v63, %v255_v7  ;;  %v266_v7 = vld [vmem:[%s1402_s19 + $0x78] sm:$0xff] }
  0xb7   : > { %1091 = vrsqrt.f32 %v425_v55 }
  0xb8   : > { %1093 = vrsqrt.f32 %v419_v48  ;;  %520 = vperm.xlu1 %1072, %v478_v50   ;;  %v363_v57 = vpop.xlane.xlu1 %362  ;;  %v360_v62 = vpop.xlane.xlu0 %359  ;;  %v264_v50 = vld [vmem:[%s1402_s19 + $0x68] sm:$0xff] }
  0xb9   : > { %v427_v3 = vmax.f32 %v363_v57, 1e-24  ;;  %v426_v57 = vmax.f32 %v360_v62, 1e-24 }
  0xbb   : > { %1095 = vrsqrt.f32 %v427_v3  ;;  %v258_v3 = vld [vmem:[%s1402_s19 + $0x38] sm:$0xff] }
  0xbc   : > { %v1084_v11 = vpop.eup %1083  ;;  %525 = vperm.xlu1 %1072, %v479_v58   ;;  %v369_v12 = vpop.xlane.xlu1 %368  ;;  %1097 = vrsqrt.f32 %v420_v61 }
  0xbd   : > { %v366_v20 = vpop.xlane.xlu0 %365  ;;  %v1086_v25 = vpop.eup %1085  ;;  %v429_v26 = vmax.f32 %v369_v12, 1e-24  ;;  %v485_v27 = vmul.f32 %v1084_v11, %v260_v10 }
  0xbe   : > { %v481_v38 = vmul.f32 %v1086_v25, %v256_v19  ;;  %v268_v19 = vld [vmem:[%s1402_s19 + $0x88] sm:$0xff] }
  0xbf   : > { %1099 = vrsqrt.f32 %v429_v26  ;;  %555 = vperm.xlu0 %1071, %v485_v27   ;;  %v259_v26 = vld [vmem:[%s1402_s19 + $0x40] sm:$0xff] }
  0xc0   : > { %v1088_v33 = vpop.eup %1087  ;;  %530 = vperm.xlu1 %1072, %v480_v15   ;;  %v375_v36 = vpop.xlane.xlu1 %374  ;;  %1101 = vrsqrt.f32 %v422_v18  ;;  %v428_v15 = vmax.f32 %v366_v20, 1e-24 }
  0xc1   : > { %v372_v44 = vpop.xlane.xlu0 %371  ;;  %v1090_v45 = vpop.eup %1089  ;;  %v431_v48 = vmax.f32 %v375_v36, 1e-24  ;;  %v487_v37 = vmul.f32 %v1088_v33, %v262_v30 }
  0xc2   : > { %v482_v56 = vmul.f32 %v1090_v45, %v257_v49 }
  0xc3   : > { %1103 = vrsqrt.f32 %v431_v48  ;;  %565 = vperm.xlu0 %1071, %v487_v37   ;;  %v261_v48 = vld [vmem:[%s1402_s19 + $0x50] sm:$0xff]  ;;  %v270_v37 = vld [vmem:[%s1402_s19 + $0x98] sm:$0xff] }
  0xc4   : > { %v1092_v54 = vpop.eup %1091  ;;  %535 = vperm.xlu1 %1072, %v481_v38   ;;  %v381_v55 = vpop.xlane.xlu1 %380  ;;  %1105 = vrsqrt.f32 %v424_v43  ;;  %v430_v38 = vmax.f32 %v372_v44, 1e-24 }
  0xc5   : > { %v378_v58 = vpop.xlane.xlu0 %377  ;;  %v1094_v61 = vpop.eup %1093  ;;  %v433_v51 = vmax.f32 %v381_v55, 1e-24  ;;  %v489_v63 = vmul.f32 %v1092_v54, %v264_v50 }
  0xc6   : > { %v483_v12 = vmul.f32 %v1094_v61, %v258_v3 }
  0xc7   : > { %1107 = vrsqrt.f32 %v433_v51  ;;  %575 = vperm.xlu0 %1071, %v489_v63   ;;  %v263_v51 = vld [vmem:[%s1402_s19 + $0x60] sm:$0xff]  ;;  %v272_v63 = vld [vmem:[%s1402_s19 + $0xa8] sm:$0xff] }
  0xc8   : > { %v1096_v10 = vpop.eup %1095  ;;  %540 = vperm.xlu1 %1072, %v482_v56   ;;  %v387_v11 = vpop.xlane.xlu1 %386  ;;  %1109 = vrsqrt.f32 %v426_v57  ;;  %v432_v56 = vmax.f32 %v378_v58, 1e-24  ;;  %v265_v58 = vld [vmem:[%s1402_s19 + $0x70] sm:$0xff] }
  0xc9   : > { %v1098_v18 = vpop.eup %1097  ;;  %v435_v25 = vmax.f32 %v387_v11, 1e-24  ;;  %v491_v62 = vmul.f32 %v1096_v10, %v266_v7  ;;  %v384_v27 = vpop.xlane.xlu0 %383 }
  0xca   : > { %v484_v36 = vmul.f32 %v1098_v18, %v259_v26  ;;  %v434_v11 = vmax.f32 %v384_v27, 1e-24 }
  0xcb   : > { %1111 = vrsqrt.f32 %v435_v25  ;;  %585 = vperm.xlu0 %1071, %v491_v62   ;;  %v274_v62 = vld [vmem:[%s1402_s19 + $0xb8] sm:$0xff] }
  0xcc   : > { %v1100_v30 = vpop.eup %1099  ;;  %545 = vperm.xlu1 %1072, %v483_v12   ;;  %v393_v33 = vpop.xlane.xlu1 %392  ;;  %1113 = vrsqrt.f32 %v428_v15 }
  0xcd   : > { %v1102_v43 = vpop.eup %1101  ;;  %v437_v45 = vmax.f32 %v393_v33, 1e-24  ;;  %v493_v20 = vmul.f32 %v1100_v30, %v268_v19  ;;  %v390_v49 = vpop.xlane.xlu0 %389 }
  0xce   : > { %v486_v55 = vmul.f32 %v1102_v43, %v261_v48  ;;  %v436_v33 = vmax.f32 %v390_v49, 1e-24  ;;  %v267_v43 = vld [vmem:[%s1402_s19 + $0x80] sm:$0xff]  ;;  %v269_v49 = vld [vmem:[%s1402_s19 + $0x90] sm:$0xff] }
  0xcf   : > { %1115 = vrsqrt.f32 %v437_v45  ;;  %595 = vperm.xlu0 %1071, %v493_v20   ;;  %v276_v45 = vld [vmem:[%s1402_s19 + $0xc8] sm:$0xff] }
  0xd0   : > { %v1104_v50 = vpop.eup %1103  ;;  %550 = vperm.xlu1 %1072, %v484_v36   ;;  %v399_v54 = vpop.xlane.xlu1 %398  ;;  %1117 = vrsqrt.f32 %v430_v38 }
  0xd1   : > { %v1106_v57 = vpop.eup %1105  ;;  %v439_v61 = vmax.f32 %v399_v54, 1e-24  ;;  %v495_v44 = vmul.f32 %v1104_v50, %v270_v37  ;;  %v396_v25 = vpop.xlane.xlu0 %395 }
  0xd2   : > { %v488_v10 = vmul.f32 %v1106_v57, %v263_v51  ;;  %v438_v50 = vmax.f32 %v396_v25, 1e-24  ;;  %v273_v25 = vld [vmem:[%s1402_s19 + $0xb0] sm:$0xff] }
  0xd3   : > { %1119 = vrsqrt.f32 %v439_v61  ;;  %605 = vperm.xlu0 %1071, %v495_v44  }
  0xd4   : > { %v1108_v3 = vpop.eup %1107  ;;  %560 = vperm.xlu1 %1072, %v486_v55   ;;  %v405_v7 = vpop.xlane.xlu1 %404  ;;  %1121 = vrsqrt.f32 %v432_v56  ;;  %v278_v56 = vld [vmem:[%s1402_s19 + $0xd8] sm:$0xff] }
  0xd5   : > { %v1110_v12 = vpop.eup %1109  ;;  %v441_v15 = vmax.f32 %v405_v7, 1e-24  ;;  %v497_v18 = vmul.f32 %v1108_v3, %v272_v63  ;;  %v402_v20 = vpop.xlane.xlu0 %401  ;;  %v271_v3 = vld [vmem:[%s1402_s19 + $0xa0] sm:$0xff] }
  0xd6   : > { %v490_v30 = vmul.f32 %v1110_v12, %v265_v58  ;;  %v440_v44 = vmax.f32 %v402_v20, 1e-24 }
  0xd7   : > { %1123 = vrsqrt.f32 %v441_v15  ;;  %615 = vperm.xlu0 %1071, %v497_v18  }
  0xd8   : > { %v1112_v26 = vpop.eup %1111  ;;  %570 = vperm.xlu1 %1072, %v488_v10   ;;  %v411_v19 = vpop.xlane.xlu1 %410  ;;  %1125 = vrsqrt.f32 %v434_v11  ;;  %v280_v10 = vld [vmem:[%s1402_s19 + $0xe8] sm:$0xff] }
  0xd9   : > { %v1114_v36 = vpop.eup %1113  ;;  %v443_v27 = vmax.f32 %v411_v19, 1e-24  ;;  %v499_v38 = vmul.f32 %v1112_v26, %v274_v62  ;;  %v408_v7 = vpop.xlane.xlu0 %407  ;;  %v282_v62 = vld [vmem:[%s1402_s19 + $0xf8] sm:$0xff] }
  0xda   : > { %v492_v37 = vmul.f32 %v1114_v36, %v267_v43  ;;  %v442_v15 = vmax.f32 %v408_v7, 1e-24  ;;  %v275_v36 = vld [vmem:[%s1402_s19 + $0xc0] sm:$0xff]  ;;  %v277_v43 = vld [vmem:[%s1402_s19 + $0xd0] sm:$0xff] }
  0xdb   : > { %1127 = vrsqrt.f32 %v443_v27  ;;  %625 = vperm.xlu0 %1071, %v499_v38  }
  0xdc   : > { %v1116_v48 = vpop.eup %1115  ;;  %580 = vperm.xlu1 %1072, %v490_v30   ;;  %1129 = vrsqrt.f32 %v436_v33 }
  0xdd   : > { %v1118_v54 = vpop.eup %1117  ;;  %v501_v55 = vmul.f32 %v1116_v48, %v276_v45  ;;  %1131 = vrsqrt.f32 %v438_v50  ;;  %v279_v48 = vld [vmem:[%s1402_s19 + $0xe0] sm:$0xff] }
  0xde   : > { %v494_v61 = vmul.f32 %v1118_v54, %v269_v49  ;;  %1133 = vrsqrt.f32 %v440_v44  ;;  %v281_v54 = vld [vmem:[%s1402_s19 + $0xf0] sm:$0xff] }
  0xdf   : > { %635 = vperm.xlu0 %1071, %v501_v55   ;;  %1135 = vrsqrt.f32 %v442_v15 }
  0xe0   : > { %v1120_v57 = vpop.eup %1119  ;;  %590 = vperm.xlu1 %1072, %v492_v37  }
  0xe1   : > { %v1122_v51 = vpop.eup %1121  ;;  %v503_v63 = vmul.f32 %v1120_v57, %v278_v56 }
  0xe2   : > { %v496_v12 = vmul.f32 %v1122_v51, %v271_v3 }
  0xe3   : > { %645 = vperm.xlu0 %1071, %v503_v63  }
  0xe4   : > { %v1124_v11 = vpop.eup %1123  ;;  %600 = vperm.xlu1 %1072, %v494_v61  }
  0xe5   : > { %v1126_v18 = vpop.eup %1125  ;;  %v505_v58 = vmul.f32 %v1124_v11, %v280_v10 }
  0xe6   : > { %v498_v19 = vmul.f32 %v1126_v18, %v273_v25 }
  0xe7   : > { %655 = vperm.xlu0 %1071, %v505_v58  }
  0xe8   : > { %v1128_v26 = vpop.eup %1127  ;;  %610 = vperm.xlu1 %1072, %v496_v12  }
  0xe9   : > { %v1130_v30 = vpop.eup %1129  ;;  %v507_v33 = vmul.f32 %v1128_v26, %v282_v62 }
  0xea   : > { %v500_v27 = vmul.f32 %v1130_v30, %v275_v36  ;;  %v1132_v38 = vpop.eup %1131 }
  0xeb   : > { %665 = vperm.xlu0 %1071, %v507_v33   ;;  %v502_v45 = vmul.f32 %v1132_v38, %v277_v43  ;;  %v1134_v20 = vpop.eup %1133 }
  0xec   : > { %620 = vperm.xlu1 %1072, %v498_v19   ;;  %v504_v37 = vmul.f32 %v1134_v20, %v279_v48  ;;  %v1136_v50 = vpop.eup %1135 }
  0xed   : > { %v506_v55 = vmul.f32 %v1136_v50, %v281_v54 }
  0xf0   : > { %630 = vperm.xlu1 %1072, %v500_v27  }
  0xf4   : > { %640 = vperm.xlu1 %1072, %v502_v45  }
  0xf8   : > { %650 = vperm.xlu1 %1072, %v504_v37  }
  0xfc   : > { %660 = vperm.xlu1 %1072, %v506_v55  }
 0x12b   : > { %v511_v49 = vpop.permute.xlu0 %510 }
 0x12c   : > { %v668_v56 = vmul.f32 %v511_v49, %v1209_v1 }
 0x12e   : > { %v1014_v57 = vpack.c.bf16 %v668_v56, %v668_v56 }
 0x12f   : > { %v516_v61 = vpop.permute.xlu1 %515 }
 0x130   : > { %829 = vst.msk [vmem:[%s1441_s23] sm:$0xf] %vm828_vm1, %v1014_v57  ;;  %v669_v44 = vmul.f32 %v516_v61, %v1221_v6 }
 0x132   : > { %v1015_v51 = vpack.c.bf16 %v669_v44, %v669_v44 }
 0x133   : > { %v521_v63 = vpop.permute.xlu1 %520 }
 0x134   : > { %830 = vst.msk [vmem:[%s1441_s23 + $0x4] sm:$0xf] %vm828_vm1, %v1015_v51  ;;  %v670_v1 = vmul.f32 %v521_v63, %v1206_v0 }
 0x136   : > { %v1016_v3 = vpack.c.bf16 %v670_v1, %v670_v1 }
 0x137   : > { %v526_v7 = vpop.permute.xlu1 %525 }
 0x138   : > { %831 = vst.msk [vmem:[%s1441_s23 + $0x8] sm:$0xf] %vm828_vm1, %v1016_v3  ;;  %v671_v10 = vmul.f32 %v526_v7, %v1212_v2 }
 0x13a   : > { %v1017_v11 = vpack.c.bf16 %v671_v10, %v671_v10  ;;  %v556_v12 = vpop.permute.xlu0 %555 }
 0x13b   : > { %v531_v15 = vpop.permute.xlu1 %530  ;;  %v677_v6 = vmul.f32 %v556_v12, %v1252_v22 }
 0x13c   : > { %832 = vst.msk [vmem:[%s1441_s23 + $0xc] sm:$0xf] %vm828_vm1, %v1017_v11  ;;  %v672_v18 = vmul.f32 %v531_v15, %v1229_v9 }
 0x13d   : > { %v1023_v58 = vpack.c.bf16 %v677_v6, %v677_v6 }
 0x13e   : > { %v1018_v0 = vpack.c.bf16 %v672_v18, %v672_v18  ;;  %v566_v25 = vpop.permute.xlu0 %565 }
 0x13f   : > { %838 = vst.msk [vmem:[%s1441_s23 + $0x24] sm:$0xf] %vm828_vm1, %v1023_v58  ;;  %v536_v62 = vpop.permute.xlu1 %535  ;;  %v679_v2 = vmul.f32 %v566_v25, %v1264_v28 }
 0x140   : > { %833 = vst.msk [vmem:[%s1441_s23 + $0x10] sm:$0xf] %vm828_vm1, %v1018_v0  ;;  %v673_v26 = vmul.f32 %v536_v62, %v1226_v8 }
 0x141   : > { %v1025_v22 = vpack.c.bf16 %v679_v2, %v679_v2 }
 0x142   : > { %v1019_v19 = vpack.c.bf16 %v673_v26, %v673_v26  ;;  %v576_v30 = vpop.permute.xlu0 %575 }
 0x143   : > { %840 = vst.msk [vmem:[%s1441_s23 + $0x2c] sm:$0xf] %vm828_vm1, %v1025_v22  ;;  %v541_v9 = vpop.permute.xlu1 %540  ;;  %v681_v33 = vmul.f32 %v576_v30, %v1276_v34 }
 0x144   : > { %834 = vst.msk [vmem:[%s1441_s23 + $0x14] sm:$0xf] %vm828_vm1, %v1019_v19  ;;  %v674_v36 = vmul.f32 %v541_v9, %v1243_v17 }
 0x145   : > { %v1027_v28 = vpack.c.bf16 %v681_v33, %v681_v33 }
 0x146   : > { %v1020_v27 = vpack.c.bf16 %v674_v36, %v674_v36  ;;  %v586_v38 = vpop.permute.xlu0 %585 }
 0x147   : > { %842 = vst.msk [vmem:[%s1441_s23 + $0x34] sm:$0xf] %vm828_vm1, %v1027_v28  ;;  %v546_v8 = vpop.permute.xlu1 %545  ;;  %v683_v43 = vmul.f32 %v586_v38, %v1288_v40 }
 0x148   : > { %835 = vst.msk [vmem:[%s1441_s23 + $0x18] sm:$0xf] %vm828_vm1, %v1020_v27  ;;  %v675_v45 = vmul.f32 %v546_v8, %v1240_v16 }
 0x149   : > { %v1029_v34 = vpack.c.bf16 %v683_v43, %v683_v43 }
 0x14a   : > { %v1021_v20 = vpack.c.bf16 %v675_v45, %v675_v45  ;;  %v596_v48 = vpop.permute.xlu0 %595 }
 0x14b   : > { %844 = vst.msk [vmem:[%s1441_s23 + $0x3c] sm:$0xf] %vm828_vm1, %v1029_v34  ;;  %v551_v17 = vpop.permute.xlu1 %550  ;;  %v685_v37 = vmul.f32 %v596_v48, %v1300_v46 }
 0x14c   : > { %836 = vst.msk [vmem:[%s1441_s23 + $0x1c] sm:$0xf] %vm828_vm1, %v1021_v20  ;;  %v676_v50 = vmul.f32 %v551_v17, %v1255_v23 }
 0x14d   : > { %v1031_v40 = vpack.c.bf16 %v685_v37, %v685_v37 }
 0x14e   : > { %v1022_v54 = vpack.c.bf16 %v676_v50, %v676_v50  ;;  %v606_v55 = vpop.permute.xlu0 %605 }
 0x14f   : > { %846 = vst.msk [vmem:[%s1441_s23 + $0x44] sm:$0xf] %vm828_vm1, %v1031_v40  ;;  %v561_v16 = vpop.permute.xlu1 %560  ;;  %v687_v49 = vmul.f32 %v606_v55, %v1312_v52 }
 0x150   : > { %837 = vst.msk [vmem:[%s1441_s23 + $0x20] sm:$0xf] %vm828_vm1, %v1022_v54  ;;  %v678_v56 = vmul.f32 %v561_v16, %v1267_v29 }
 0x151   : > { %v1033_v46 = vpack.c.bf16 %v687_v49, %v687_v49 }
 0x152   : > { %v1024_v57 = vpack.c.bf16 %v678_v56, %v678_v56  ;;  %v616_v61 = vpop.permute.xlu0 %615 }
 0x153   : > { %848 = vst.msk [vmem:[%s1441_s23 + $0x4c] sm:$0xf] %vm828_vm1, %v1033_v46  ;;  %v571_v23 = vpop.permute.xlu1 %570  ;;  %v689_v44 = vmul.f32 %v616_v61, %v1324_v59 }
 0x154   : > { %839 = vst.msk [vmem:[%s1441_s23 + $0x28] sm:$0xf] %vm828_vm1, %v1024_v57  ;;  %v680_v51 = vmul.f32 %v571_v23, %v1279_v35 }
 0x155   : > { %v1035_v52 = vpack.c.bf16 %v689_v44, %v689_v44 }
 0x156   : > { %v1026_v63 = vpack.c.bf16 %v680_v51, %v680_v51  ;;  %v626_v1 = vpop.permute.xlu0 %625 }
 0x157   : > { %850 = vst.msk [vmem:[%s1441_s23 + $0x54] sm:$0xf] %vm828_vm1, %v1035_v52  ;;  %v581_v29 = vpop.permute.xlu1 %580  ;;  %v691_v3 = vmul.f32 %v626_v1, %v1336_v4 }
 0x158   : > { %841 = vst.msk [vmem:[%s1441_s23 + $0x30] sm:$0xf] %vm828_vm1, %v1026_v63  ;;  %v682_v7 = vmul.f32 %v581_v29, %v1291_v41 }
 0x159   : > { %v1037_v59 = vpack.c.bf16 %v691_v3, %v691_v3 }
 0x15a   : > { %v1028_v10 = vpack.c.bf16 %v682_v7, %v682_v7  ;;  %v636_v11 = vpop.permute.xlu0 %635 }
 0x15b   : > { %852 = vst.msk [vmem:[%s1441_s23 + $0x5c] sm:$0xf] %vm828_vm1, %v1037_v59  ;;  %v591_v35 = vpop.permute.xlu1 %590  ;;  %v693_v12 = vmul.f32 %v636_v11, %v1348_v13 }
 0x15c   : > { %843 = vst.msk [vmem:[%s1441_s23 + $0x38] sm:$0xf] %vm828_vm1, %v1028_v10  ;;  %v684_v15 = vmul.f32 %v591_v35, %v1303_v47 }
 0x15d   : > { %v1039_v4 = vpack.c.bf16 %v693_v12, %v693_v12 }
 0x15e   : > { %v1030_v6 = vpack.c.bf16 %v684_v15, %v684_v15  ;;  %v646_v18 = vpop.permute.xlu0 %645 }
 0x15f   : > { %854 = vst.msk [vmem:[%s1441_s23 + $0x64] sm:$0xf] %vm828_vm1, %v1039_v4  ;;  %v601_v41 = vpop.permute.xlu1 %600  ;;  %v695_v58 = vmul.f32 %v646_v18, %v1360_v21 }
 0x160   : > { %845 = vst.msk [vmem:[%s1441_s23 + $0x40] sm:$0xf] %vm828_vm1, %v1030_v6  ;;  %v686_v0 = vmul.f32 %v601_v41, %v1315_v53 }
 0x161   : > { %v1041_v13 = vpack.c.bf16 %v695_v58, %v695_v58 }
 0x162   : > { %v1032_v25 = vpack.c.bf16 %v686_v0, %v686_v0  ;;  %v656_v62 = vpop.permute.xlu0 %655 }
 0x163   : > { %856 = vst.msk [vmem:[%s1441_s23 + $0x6c] sm:$0xf] %vm828_vm1, %v1041_v13  ;;  %v611_v47 = vpop.permute.xlu1 %610  ;;  %v697_v2 = vmul.f32 %v656_v62, %v1372_v31 }
 0x164   : > { %847 = vst.msk [vmem:[%s1441_s23 + $0x48] sm:$0xf] %vm828_vm1, %v1032_v25  ;;  %v688_v26 = vmul.f32 %v611_v47, %v1327_v60 }
 0x165   : > { %v1043_v21 = vpack.c.bf16 %v697_v2, %v697_v2 }
 0x166   : > { %v1034_v22 = vpack.c.bf16 %v688_v26, %v688_v26  ;;  %v666_v19 = vpop.permute.xlu0 %665 }
 0x167   : > { %858 = vst.msk [vmem:[%s1441_s23 + $0x74] sm:$0xf] %vm828_vm1, %v1043_v21  ;;  %v621_v53 = vpop.permute.xlu1 %620  ;;  %v699_v30 = vmul.f32 %v666_v19, %v1384_v39 }
 0x168   : > { %849 = vst.msk [vmem:[%s1441_s23 + $0x50] sm:$0xf] %vm828_vm1, %v1034_v22  ;;  %v690_v9 = vmul.f32 %v621_v53, %v1339_v5 }
 0x169   : > { %v1045_v33 = vpack.c.bf16 %v699_v30, %v699_v30 }
 0x16a   : > { %v1036_v31 = vpack.c.bf16 %v690_v9, %v690_v9 }
 0x16b   : > { %860 = vst.msk [vmem:[%s1441_s23 + $0x7c] sm:$0xf] %vm828_vm1, %v1045_v33  ;;  %v631_v60 = vpop.permute.xlu1 %630 }
 0x16c   : > { %851 = vst.msk [vmem:[%s1441_s23 + $0x58] sm:$0xf] %vm828_vm1, %v1036_v31  ;;  %v692_v36 = vmul.f32 %v631_v60, %v1351_v14 }
 0x16e   : > { %v1038_v28 = vpack.c.bf16 %v692_v36, %v692_v36 }
 0x16f   : > { %v641_v27 = vpop.permute.xlu1 %640 }
 0x170   : > { %853 = vst.msk [vmem:[%s1441_s23 + $0x60] sm:$0xf] %vm828_vm1, %v1038_v28  ;;  %v694_v39 = vmul.f32 %v641_v27, %v1363_v24 }
 0x172   : > { %v1040_v38 = vpack.c.bf16 %v694_v39, %v694_v39 }
 0x173   : > { %v651_v8 = vpop.permute.xlu1 %650 }
 0x174   : > { %855 = vst.msk [vmem:[%s1441_s23 + $0x68] sm:$0xf] %vm828_vm1, %v1040_v38  ;;  %v696_v5 = vmul.f32 %v651_v8, %v1375_v32 }
 0x176   : > { %v1042_v43 = vpack.c.bf16 %v696_v5, %v696_v5 }
 0x177   : > { %v661_v45 = vpop.permute.xlu1 %660 }
 0x178   : > { %857 = vst.msk [vmem:[%s1441_s23 + $0x70] sm:$0xf] %vm828_vm1, %v1042_v43  ;;  %v698_v34 = vmul.f32 %v661_v45, %v1387_v42 }
 0x17a   : > { %v1044_v20 = vpack.c.bf16 %v698_v34, %v698_v34 }
 0x17c   : > { %859 = vst.msk [vmem:[%s1441_s23 + $0x78] sm:$0xf] %vm828_vm1, %v1044_v20 }
 0x17d PF: > { %s12_s11 = sadd.s32 1, %s1159_s11   ;;  %s1550_s9 = smov %s1155_s10 }
 0x17e   : > { %p9_p5 = scmp.ge.s32.totalorder %s12_s11, 4   ;;  %s1551_s10 = smov %s1553_s12 }
 0x180   :  { %11 = sbr.rel (!%p9_p5) target bundleno = 2 (0x2), region = 61 }

// kernel: fn.3
= control target key start
LH: loop header
LB: loop body
LE: loop exit
PB: predicated region body
PF: predicated region fallthrough
CT: control target
= control target key end

     0   :  { %12 = vsyncpa [#allocation8], 0  ;;  %s7597_s0 = inlined_call_operand.vmem [shape: bf16[2,256,32], index: 0, kind: input, shape index: {}]   ;;  %s7598_s1 = inlined_call_operand.vmem [shape: f32[2,256,1], index: 1, kind: input, shape index: {}]   ;;  %s7599_s2 = inlined_call_operand.vmem [shape: f32[2,32,128], index: 2, kind: input, shape index: {}]   ;;  %s7600_s3 = inlined_call_operand.vmem [shape: f32[2,1,128], index: 3, kind: input, shape index: {}]   ;;  %s7601_s4 = inlined_call_operand.vmem [shape: s32[2,256,1], index: 4, kind: output, shape index: {0}]   ;;  %s7602_s5 = inlined_call_operand.hbm [shape: f32[2,1,128], index: 5, kind: output, shape index: {1}]   ;;  %s7603_s6 = inlined_call_operand.hbm [shape: f32[2,128,128], index: 6, kind: output, shape index: {2}]  }
   0x1   :  { %14 = vsyncpa [#allocation8 + $0x1], 0 }
   0x2   :  { %15 = vsyncpa [#allocation10], 0 }
   0x3   :  { %17 = vsyncpa [#allocation10 + $0x1], 0  ;;  %s4859_s21 = smov 0   ;;  %s4861_s22 = smov 0  }
   0x4   :  { %s4863_s23 = smov 0   ;;  %s4865_s24 = smov 0  }
   0x5   :  { %s4867_s25 = smov 0   ;;  %s4869_s26 = smov 0  }
   0x6   :  { %s4871_s27 = smov 0   ;;  %s4873_s28 = smov 0  }
   0x7 LB: > { %7708 = sst [smem:[#allocation13_spill]] %s4786_s21  ;;  %s3966_s29 = sadd.s32 4294967295, %s4814_s28   ;;  %s4814_s28 = sphi %s4873_s28, %s23_s28   ;;  %s4810_s27 = sphi %s4871_s27, %s7963_s27   ;;  %s4806_s26 = sphi %s4869_s26, %s7962_s26   ;;  %s4802_s25 = sphi %s4867_s25, %s7961_s25   ;;  %s4798_s24 = sphi %s4865_s24, %s7960_s24   ;;  %s4794_s23 = sphi %s4863_s23, %s7959_s23   ;;  %s4790_s22 = sphi %s4861_s22, %s7958_s22   ;;  %s4786_s21 = sphi %s4859_s21, %s7957_s21  }
   0x8   : > { %7709 = sst [smem:[#allocation14_spill]] %s4790_s22  ;;  %s3967_s30 = sadd.s32 4294967294, %s4814_s28  }
   0x9   : > { %7710 = sst [smem:[#allocation15_spill]] %s4794_s23  ;;  %s32_s7 = sadd.s32 1, %s4806_s26 }
   0xa   : > { %7711 = sst [smem:[#allocation16_spill]] %s4806_s26  ;;  %p33_p0 = scmp.ge.s32.totalorder %s32_s7, 21 }
   0xb   : > { %7712 = sst [smem:[#allocation17_spill]] %s4810_s27  ;;  %s35_s8 = sadd.s32 1, %s4810_s27 }
   0xc   : > { %p182_p1 = scmp.ne.s32.totalorder %s4794_s23, %s4790_s22  ;;  %p183_p2 = scmp.eq.s32.totalorder %s3966_s29, 41 }
   0xd   : > { %s7965_s7 = smov (%p33_p0, %s32_s7), 0  ;;  %s7967_s8 = smov (!%p33_p0, %s35_s8), %s4810_s27 }
   0xe   : > { %7713 = sst [smem:[#allocation18_spill]] %s7965_s7  ;;  %p4908_p3 = por %p183_p2, %p182_p1 }
   0xf   : > { %p188_p4 = scmp.ne.s32.totalorder %s4790_s22, %s4786_s21  ;;  %p37_p5 = scmp.ge.s32.totalorder %s7967_s8, 2 }
  0x10   : > { %p189_p6 = scmp.eq.s32.totalorder %s3967_s30, 41  ;;  %p3970_p7 = scmp.ge.s32.totalorder %s4814_s28, 1 }
  0x11   : > { %p263_p8 = scmp.lt.s32.totalorder %s4814_s28, 43  ;;  %s7969_s8 = smov (%p37_p5, %s7967_s8), 0 }
  0x12   : > { %7715 = sst [smem:[#allocation19_spill]] %s7969_s8  ;;  %p4918_p9 = por %p189_p6, %p188_p4 }
  0x13   : > { %p264_p10 = pnand %p3970_p7, %p263_p8  ;;  %s169_s11 = ssub.s32 %s4810_s27, %s7969_s8 }
  0x14   : > { %s7716_s10 = scalar_select %p4918_p9, 1, 0 }
  0x15   : > { %s172_s12 = sadd.s32 1, %s4794_s23  ;;  %p170_p11 = scmp.eq.s32.totalorder %s169_s11, 0 }
  0x16   : > { %7717 = sst [smem:[#allocation20_spill]] %s7716_s10  ;;  %267 = sbr.rel (%p264_p10) target bundleno = 1676 (0x68c), region = 36 }
  0x17   : > { %s4926_s13 = scalar_select %p170_p11, %s4794_s23, %s172_s12  }
  0x18   : > { %s4929_s14 = sand.u32 (!%p264_p10), 1, %s4790_s22   ;;  %p315_p12 = scmp.lt.s32.totalorder (!%p264_p10), %s4802_s25, 1 }
  0x19   : > { %7718 = sst [smem:[#allocation21_spill]] %s4926_s13  ;;  %s3971_s15 = sshll.u32 (!%p264_p10), %s4929_s14, 7 }
  0x1a   : > { %s4964_s20 = scalar_lea.vmem (!%p264_p10), [#allocation9], %s3971_s15  ;;  %p3980_p13 = scmp.ne.s32.totalorder (!%p264_p10), %s4798_s24, 0 }
  0x1b   : > { %s4934_s16 = scalar_select %p315_p12, %s4802_s25, 1 }
  0x1d   : > { %s4131_s17 = sshll.u32 %s4934_s16, 7  ;;  %s4132_s18 = sshll.u32 %s4934_s16, 8 }
  0x1e   : > { %s4941_s29 = scalar_lea.vmem %s7597_s0, %s4131_s17  ;;  %s4946_s12 = scalar_lea.vmem %s7598_s1, %s4132_s18 }
  0x1f   : > { %s4133_s8 = sshll.u32 %s4934_s16, 5  ;;  %s332_s26 = scalar_lea.vmem %s7600_s3, %s4934_s16 }
  0x20   : > { %s329_s22 = scalar_lea.vmem %s7599_s2, %s4133_s8  ;;  %s4959_s19 = scalar_lea.vmem %s7601_s4, %s4132_s18 }
  0x21   : > { %s4962_s17 = scalar_lea.vmem [#allocation7], %s4929_s14  ;;  %342 = sbr.rel (%p3980_p13) target bundleno = 41 (0x29), region = 40 }
  0x26   : > { %v343_v0 = vld [vmem:[%s329_s22] sm:$0xff]  ;;  %v344_v1 = vld [vmem:[%s329_s22 + $0x8] sm:$0xff]  ;;  %v345_v2 = vld [vmem:[%s329_s22 + $0x10] sm:$0xff] }
  0x27   : > { %347 = vst [vmem:[#allocation2 + $0x10] sm:$0xff] %v343_v0  ;;  %348 = vst [vmem:[#allocation2] sm:$0xff] %v344_v1  ;;  %v346_v3 = vld [vmem:[%s329_s22 + $0x18] sm:$0xff] }
  0x28   : > { %349 = vst [vmem:[#allocation2 + $0x18] sm:$0xff] %v345_v2  ;;  %350 = vst [vmem:[#allocation2 + $0x8] sm:$0xff] %v346_v3 }
  0x29 PF: > { %p3981_p0 = scmp.ge.s32.totalorder %s4798_s24, 20 }
  0x2b   : > { %354 = sbr.rel (%p3981_p0) target bundleno = 1042 (0x412), region = 44 }
  0x30   : > { %v4968_v4 = vld [vmem:[#allocation2 + $0x18] sm:$0xff]  ;;  %v4970_v5 = vld [vmem:[#allocation2 + $0x8] sm:$0xff]  ;;  %v4972_v6 = vld [vmem:[#allocation2 + $0x10] sm:$0xff]  ;;  %vm565_vm0 = vcmask 261120   ;;  %v7611_v9 = vmov 0   ;;  %p4069_p1 = scmp.ne.s32.totalorder %s4798_s24, 19 }
  0x31   : > { %v4152_v7 = vpack.c.bf16 %v4970_v5, %v4968_v4  ;;  %v4976_v8 = vld [vmem:[#allocation2] sm:$0xff]  ;;  %4440 = vset.pattern.permute.xlu0 %v7611_v9  ;;  %4441 = vset.pattern.permute.xlu1 %v7611_v9  ;;  %v4445_v14 = vld [vmem:[%s4941_s29 + $0x8] sm:$0xff]   ;;  %v467_v15 = vld [vmem:[%s4946_s12 + $0xf0] sm:$0xff]  ;;  %v383_v48 = vmul.f32 %v4972_v6, %v4972_v6  ;;  %v385_v51 = vmul.f32 %v4968_v4, %v4968_v4 }
  0x32   : > { %v4147_v10 = vpack.c.bf16 %v4976_v8, %v4972_v6  ;;  %v4444_v11 = vld [vmem:[%s4941_s29] sm:$0xff]   ;;  %v4446_v16 = vld [vmem:[%s4941_s29 + $0x10] sm:$0xff]   ;;  %1608 = vperm.xlu0 %4440, %v467_v15   ;;  %v468_v18 = vld [vmem:[%s4946_s12 + $0xf8] sm:$0xff]  ;;  %v384_v49 = vmul.f32 %v4976_v8, %v4976_v8  ;;  %v386_v54 = vmul.f32 %v4970_v5, %v4970_v5 }
  0x33   : > { %4164 = vst [vmem:[#allocation3 + $0x8] sm:$0xff] %v4152_v7   ;;  %4254 = vmatprep.mubr.msk.bf16.mxu0 %vm565_vm0, %v4444_v11  ;;  %v465_v17 = vld [vmem:[%s4946_s12 + $0xe0] sm:$0xff]  ;;  %v466_v19 = vld [vmem:[%s4946_s12 + $0xe8] sm:$0xff]  ;;  %1613 = vperm.xlu1 %4441, %v468_v18   ;;  %v451_v20 = vld [vmem:[%s4946_s12 + $0x70] sm:$0xff] }
  0x34   : > { %4148 = vst [vmem:[#allocation3] sm:$0xff] %v4147_v10   ;;  %v4447_v21 = vld [vmem:[%s4941_s29 + $0x18] sm:$0xff]   ;;  %v4448_v22 = vld [vmem:[%s4941_s29 + $0x20] sm:$0xff]   ;;  %v463_v23 = vld [vmem:[%s4946_s12 + $0xd0] sm:$0xff]  ;;  %v387_v52 = vadd.f32 %v384_v49, %v383_v48 }
  0x35   : > { %v452_v24 = vld [vmem:[%s4946_s12 + $0x78] sm:$0xff]  ;;  %v449_v26 = vld [vmem:[%s4946_s12 + $0x60] sm:$0xff]  ;;  %v4449_v27 = vld [vmem:[%s4941_s29 + $0x28] sm:$0xff]  }
  0x36   : > { %1598 = vperm.xlu0 %4440, %v465_v17   ;;  %v464_v25 = vld [vmem:[%s4946_s12 + $0xd8] sm:$0xff]  ;;  %v4450_v28 = vld [vmem:[%s4941_s29 + $0x30] sm:$0xff]   ;;  %v461_v29 = vld [vmem:[%s4946_s12 + $0xc0] sm:$0xff]  ;;  %v388_v55 = vadd.f32 %v387_v52, %v385_v51 }
  0x37   : > { %1528 = vperm.xlu1 %4441, %v451_v20   ;;  %v450_v30 = vld [vmem:[%s4946_s12 + $0x68] sm:$0xff]  ;;  %v447_v32 = vld [vmem:[%s4946_s12 + $0x50] sm:$0xff]  ;;  %v4451_v33 = vld [vmem:[%s4941_s29 + $0x38] sm:$0xff]  }
  0x38   : > { %v462_v31 = vld [vmem:[%s4946_s12 + $0xc8] sm:$0xff]  ;;  %v4452_v34 = vld [vmem:[%s4941_s29 + $0x40] sm:$0xff]   ;;  %v459_v35 = vld [vmem:[%s4946_s12 + $0xb0] sm:$0xff]  ;;  %v389_v57 = vadd.f32 %v388_v55, %v386_v54 }
  0x39   : > { %v448_v36 = vld [vmem:[%s4946_s12 + $0x58] sm:$0xff]  ;;  %v445_v38 = vld [vmem:[%s4946_s12 + $0x40] sm:$0xff]  ;;  %v4453_v39 = vld [vmem:[%s4941_s29 + $0x48] sm:$0xff]  }
  0x3a   : > { %v4442_v12 = vld [vmem:[#allocation3 + $0x8] sm:$0xff]   ;;  %1603 = vperm.xlu0 %4440, %v466_v19   ;;  %v460_v37 = vld [vmem:[%s4946_s12 + $0xb8] sm:$0xff]  ;;  %v4454_v40 = vld [vmem:[%s4941_s29 + $0x50] sm:$0xff]   ;;  %v390_v61 = vrot.slane %v389_v57, 4 }
  0x3b   : > { %v4443_v13 = vld [vmem:[#allocation3] sm:$0xff]   ;;  %4250 = vmatprep.subr.bf16.mxu0 %v4442_v12  ;;  %1533 = vperm.xlu1 %4441, %v452_v24   ;;  %v446_v42 = vld [vmem:[%s4946_s12 + $0x48] sm:$0xff]  ;;  %v443_v44 = vld [vmem:[%s4946_s12 + $0x30] sm:$0xff] }
  0x3c   : > { %4251 = vmatpush3.bf16.msra.mxu0 %v4442_v12  ;;  %v457_v41 = vld [vmem:[%s4946_s12 + $0xa0] sm:$0xff]  ;;  %v458_v43 = vld [vmem:[%s4946_s12 + $0xa8] sm:$0xff]  ;;  %v4455_v45 = vld [vmem:[%s4941_s29 + $0x58] sm:$0xff]   ;;  %v391_v63 = vadd.f32 %v390_v61, %v389_v57 }
  0x3d   : > { %4252 = vmatprep.subr.bf16.mxu0 %v4443_v13  ;;  %v4456_v46 = vld [vmem:[%s4941_s29 + $0x60] sm:$0xff]   ;;  %v444_v50 = vld [vmem:[%s4946_s12 + $0x38] sm:$0xff]  ;;  %v442_v53 = vld [vmem:[%s4946_s12 + $0x28] sm:$0xff] }
  0x3e   : > { %1588 = vperm.xlu0 %4440, %v463_v23   ;;  %v441_v47 = vld [vmem:[%s4946_s12 + $0x20] sm:$0xff]  ;;  %v455_v56 = vld [vmem:[%s4946_s12 + $0x90] sm:$0xff]  ;;  %v4457_v58 = vld [vmem:[%s4941_s29 + $0x68] sm:$0xff]   ;;  %v392_v1 = vrot.slane %v391_v63, 2 }
  0x3f   : > { %1518 = vperm.xlu1 %4441, %v449_v26   ;;  %v4458_v59 = vld [vmem:[%s4941_s29 + $0x70] sm:$0xff]   ;;  %v456_v60 = vld [vmem:[%s4946_s12 + $0x98] sm:$0xff]  ;;  %v454_v62 = vld [vmem:[%s4946_s12 + $0x88] sm:$0xff] }
  0x40   : > { %4253 = vmatpush3.bf16.msra.mxu0 %v4443_v13  ;;  %v439_v0 = vld [vmem:[%s4946_s12 + $0x10] sm:$0xff]  ;;  %v393_v2 = vadd.f32 %v392_v1, %v391_v63  ;;  %v4459_v3 = vld [vmem:[%s4941_s29 + $0x78] sm:$0xff]   ;;  %v396_v7 = vld [vmem:[%s332_s26] sm:$0x1] }
  0x41   : > { %v440_v4 = vld [vmem:[%s4946_s12 + $0x18] sm:$0xff]  ;;  %v453_v8 = vld [vmem:[%s4946_s12 + $0x80] sm:$0xff] }
  0x42   : > { %1593 = vperm.xlu0 %4440, %v464_v25   ;;  %v394_v5 = vrot.slane %v393_v2, 1 }
  0x43   : > { %4255 = vmatmul.mubr.msk.bf16.vlgmr.msra.gmra.mxu0 %vm565_vm0, %v4445_v14  ;;  %1523 = vperm.xlu1 %4441, %v450_v30  }
  0x44   : > { %4258 = vmatprep.mubr.msk.bf16.mxu0 %vm565_vm0, %v4446_v16  ;;  %v395_v6 = vadd.f32 %v394_v5, %v393_v2 }
  0x46   : > { %1578 = vperm.xlu0 %4440, %v461_v29   ;;  %v397_v10 = vadd.f32 %v396_v7, %v395_v6 }
  0x47   : > { %1508 = vperm.xlu1 %4441, %v447_v32  }
  0x48   : > { %398 = vst [vmem:[#allocation4] sm:$0x1] %v397_v10 }
  0x4a   : > { %1583 = vperm.xlu0 %4440, %v462_v31  }
  0x4b   : > { %4259 = vmatmul.mubr.msk.bf16.gmra.mxu0 %vm565_vm0, %v4447_v21  ;;  %1513 = vperm.xlu1 %4441, %v448_v36  }
  0x4c   : > { %4262 = vmatprep.mubr.msk.bf16.mxu0 %vm565_vm0, %v4448_v22 }
  0x4e   : > { %1568 = vperm.xlu0 %4440, %v459_v35  }
  0x4f   : > { %1498 = vperm.xlu1 %4441, %v445_v38   ;;  %v5057_v12 = vld [vmem:[#allocation4] ss:$0 sm:$0xff] }
  0x52   : > { %1573 = vperm.xlu0 %4440, %v460_v37  }
  0x53   : > { %4263 = vmatmul.mubr.msk.bf16.gmra.mxu0 %vm565_vm0, %v4449_v27  ;;  %1503 = vperm.xlu1 %4441, %v446_v42  }
  0x54   : > { %4266 = vmatprep.mubr.msk.bf16.mxu0 %vm565_vm0, %v4450_v28 }
  0x56   : > { %1558 = vperm.xlu0 %4440, %v457_v41  }
  0x57   : > { %1488 = vperm.xlu1 %4441, %v443_v44  }
  0x5a   : > { %1563 = vperm.xlu0 %4440, %v458_v43  }
  0x5b   : > { %4267 = vmatmul.mubr.msk.bf16.gmra.mxu0 %vm565_vm0, %v4451_v33  ;;  %1493 = vperm.xlu1 %4441, %v444_v50  }
  0x5c   : > { %4270 = vmatprep.mubr.msk.bf16.mxu0 %vm565_vm0, %v4452_v34 }
  0x5e   : > { %1478 = vperm.xlu0 %4440, %v441_v47  }
  0x5f   : > { %1548 = vperm.xlu1 %4441, %v455_v56  }
  0x62   : > { %1483 = vperm.xlu0 %4440, %v442_v53  }
  0x63   : > { %4271 = vmatmul.mubr.msk.bf16.gmra.mxu0 %vm565_vm0, %v4453_v39  ;;  %1543 = vperm.xlu1 %4441, %v454_v62  }
  0x64   : > { %4274 = vmatprep.mubr.msk.bf16.mxu0 %vm565_vm0, %v4454_v40 }
  0x66   : > { %1553 = vperm.xlu0 %4440, %v456_v60  }
  0x6a   : > { %1468 = vperm.xlu0 %4440, %v439_v0  }
  0x6b   : > { %4275 = vmatmul.mubr.msk.bf16.gmra.mxu0 %vm565_vm0, %v4455_v45 }
  0x6c   : > { %4278 = vmatprep.mubr.msk.bf16.mxu0 %vm565_vm0, %v4456_v46 }
  0x6e   : > { %1473 = vperm.xlu0 %4440, %v440_v4  }
  0x72   : > { %1538 = vperm.xlu0 %4440, %v453_v8  }
  0x73   : > { %4279 = vmatmul.mubr.msk.bf16.gmra.mxu0 %vm565_vm0, %v4457_v58 }
  0x74   : > { %4282 = vmatprep.mubr.msk.bf16.mxu0 %vm565_vm0, %v4458_v59 }
  0x7b   : > { %4283 = vmatmul.mubr.msk.bf16.gmra.mxu0 %vm565_vm0, %v4459_v3 }
  0xad   : > { %v5131_v7 = vpop.permute.xlu0 %1608 }
  0xae   : > { %7719 = vst [vmem:[#allocation22_spill] sm:$0xff] %v5131_v7 }
 0x103   : > { %v4256_v11 = vpop.f32.mrf.mxu0 }
 0x104   : > { %v778_v13 = vmul.f32 2.0, %v4256_v11 }
 0x105   : > { %v648_v14 = vpop.f32.mrf.mxu0 }
 0x106   : > { %v776_v15 = vmul.f32 2.0, %v648_v14  ;;  %v5060_v16 = vsub.f32 %v5057_v12, %v778_v13 }
 0x107   : > { %v4257_v17 = vpop.f32.mrf.mxu0 }
 0x108   : > { %v779_v18 = vmul.f32 2.0, %v4257_v17  ;;  %852 = vmin.xlane.f32.xlu0 %v5060_v16  ;;  %v5064_v21 = vsub.f32 %v5057_v12, %v776_v15 }
 0x109   : > { %v651_v19 = vpop.f32.mrf.mxu0 }
 0x10a   : > { %v777_v20 = vmul.f32 2.0, %v651_v19  ;;  %v5067_v22 = vsub.f32 %v5057_v12, %v779_v18 }
 0x10b   : > { %v4260_v23 = vpop.f32.mrf.mxu0 }
 0x10c   : > { %v782_v24 = vmul.f32 2.0, %v4260_v23  ;;  %848 = vmin.xlane.f32.xlu0 %v5064_v21  ;;  %854 = vmin.xlane.f32.xlu1 %v5067_v22  ;;  %v5072_v27 = vsub.f32 %v5057_v12, %v777_v20  ;;  %v5147_v23 = vpop.permute.xlu0 %1598 }
 0x10d   : > { %v664_v25 = vpop.f32.mrf.mxu0  ;;  %7720 = vst [vmem:[#allocation23_spill] sm:$0xff] %v5147_v23 }
 0x10e   : > { %v780_v26 = vmul.f32 2.0, %v664_v25  ;;  %v5075_v28 = vsub.f32 %v5057_v12, %v782_v24 }
 0x10f   : > { %v4261_v29 = vpop.f32.mrf.mxu0 }
 0x110   : > { %v783_v30 = vmul.f32 2.0, %v4261_v29  ;;  %850 = vmin.xlane.f32.xlu1 %v5072_v27  ;;  %860 = vmin.xlane.f32.xlu0 %v5075_v28  ;;  %v5080_v33 = vsub.f32 %v5057_v12, %v780_v26 }
 0x111   : > { %v667_v31 = vpop.f32.mrf.mxu0 }
 0x112   : > { %v781_v32 = vmul.f32 2.0, %v667_v31  ;;  %v5083_v34 = vsub.f32 %v5057_v12, %v783_v30 }
 0x113   : > { %v4264_v35 = vpop.f32.mrf.mxu0 }
 0x114   : > { %v786_v36 = vmul.f32 2.0, %v4264_v35  ;;  %856 = vmin.xlane.f32.xlu0 %v5080_v33  ;;  %862 = vmin.xlane.f32.xlu1 %v5083_v34  ;;  %v5088_v39 = vsub.f32 %v5057_v12, %v781_v32 }
 0x115   : > { %v680_v37 = vpop.f32.mrf.mxu0 }
 0x116   : > { %v784_v38 = vmul.f32 2.0, %v680_v37  ;;  %v5091_v40 = vsub.f32 %v5057_v12, %v786_v36  ;;  %v5159_v36 = vpop.permute.xlu0 %1603 }
 0x117   : > { %v4265_v41 = vpop.f32.mrf.mxu0  ;;  %7721 = vst [vmem:[#allocation24_spill] sm:$0xff] %v5159_v36 }
 0x118   : > { %v787_v42 = vmul.f32 2.0, %v4265_v41  ;;  %858 = vmin.xlane.f32.xlu1 %v5088_v39  ;;  %868 = vmin.xlane.f32.xlu0 %v5091_v40  ;;  %v5096_v45 = vsub.f32 %v5057_v12, %v784_v38 }
 0x119   : > { %v683_v43 = vpop.f32.mrf.mxu0 }
 0x11a   : > { %v785_v44 = vmul.f32 2.0, %v683_v43  ;;  %v5099_v46 = vsub.f32 %v5057_v12, %v787_v42 }
 0x11b   : > { %v4268_v47 = vpop.f32.mrf.mxu0 }
 0x11c   : > { %864 = vmin.xlane.f32.xlu0 %v5096_v45  ;;  %870 = vmin.xlane.f32.xlu1 %v5099_v46  ;;  %v790_v49 = vmul.f32 2.0, %v4268_v47  ;;  %v5104_v51 = vsub.f32 %v5057_v12, %v785_v44 }
 0x11d   : > { %v696_v48 = vpop.f32.mrf.mxu0 }
 0x11e   : > { %v788_v50 = vmul.f32 2.0, %v696_v48  ;;  %v5112_v56 = vsub.f32 %v5057_v12, %v790_v49 }
 0x11f   : > { %v4269_v52 = vpop.f32.mrf.mxu0 }
 0x120   : > { %866 = vmin.xlane.f32.xlu1 %v5104_v51  ;;  %v5108_v53 = vsub.f32 %v5057_v12, %v788_v50  ;;  %v791_v55 = vmul.f32 2.0, %v4269_v52 }
 0x121   : > { %v699_v54 = vpop.f32.mrf.mxu0 }
 0x122   : > { %872 = vmin.xlane.f32.xlu0 %v5108_v53  ;;  %v789_v60 = vmul.f32 2.0, %v699_v54  ;;  %v5116_v62 = vsub.f32 %v5057_v12, %v791_v55  ;;  %v5175_v54 = vpop.permute.xlu0 %1588 }
 0x123   : > { %v4272_v57 = vpop.f32.mrf.mxu0  ;;  %7722 = vst [vmem:[#allocation25_spill] sm:$0xff] %v5175_v54 }
 0x124   : > { %v794_v58 = vmul.f32 2.0, %v4272_v57  ;;  %876 = vmin.xlane.f32.xlu1 %v5112_v56  ;;  %v5124_v3 = vsub.f32 %v5057_v12, %v789_v60 }
 0x125   : > { %v712_v59 = vpop.f32.mrf.mxu0 }
 0x126   : > { %v792_v61 = vmul.f32 2.0, %v712_v59  ;;  %v5119_v63 = vsub.f32 %v5057_v12, %v794_v58 }
 0x127   : > { %v4273_v0 = vpop.f32.mrf.mxu0 }
 0x128   : > { %878 = vmin.xlane.f32.xlu1 %v5116_v62  ;;  %884 = vmin.xlane.f32.xlu0 %v5119_v63  ;;  %v795_v2 = vmul.f32 2.0, %v4273_v0  ;;  %v5127_v4 = vsub.f32 %v5057_v12, %v792_v61  ;;  %v5187_v0 = vpop.permute.xlu0 %1593 }
 0x129   : > { %v715_v1 = vpop.f32.mrf.mxu0  ;;  %7723 = vst [vmem:[#allocation26_spill] sm:$0xff] %v5187_v0 }
 0x12a   : > { %v793_v10 = vmul.f32 2.0, %v715_v1  ;;  %v5134_v13 = vsub.f32 %v5057_v12, %v795_v2 }
 0x12b   : > { %v4276_v5 = vpop.f32.mrf.mxu0 }
 0x12c   : > { %v798_v6 = vmul.f32 2.0, %v4276_v5  ;;  %874 = vmin.xlane.f32.xlu1 %v5124_v3  ;;  %880 = vmin.xlane.f32.xlu0 %v5127_v4  ;;  %v5142_v19 = vsub.f32 %v5057_v12, %v793_v10  ;;  %v5197_v5 = vpop.permute.xlu1 %1613 }
 0x12d   : > { %v728_v8 = vpop.f32.mrf.mxu0  ;;  %7724 = vst [vmem:[#allocation27_spill] sm:$0xff] %v5197_v5 }
 0x12e   : > { %v796_v11 = vmul.f32 2.0, %v728_v8  ;;  %v5137_v14 = vsub.f32 %v5057_v12, %v798_v6  ;;  %v5199_v6 = vpop.permute.xlu0 %1578 }
 0x12f   : > { %v4277_v15 = vpop.f32.mrf.mxu0  ;;  %7725 = vst [vmem:[#allocation28_spill] sm:$0xff] %v5199_v6 }
 0x130   : > { %886 = vmin.xlane.f32.xlu1 %v5134_v13  ;;  %892 = vmin.xlane.f32.xlu0 %v5137_v14  ;;  %v799_v18 = vmul.f32 2.0, %v4277_v15  ;;  %v5145_v20 = vsub.f32 %v5057_v12, %v796_v11  ;;  %v5201_v8 = vpop.permute.xlu1 %1528 }
 0x131   : > { %v731_v17 = vpop.f32.mrf.mxu0  ;;  %7726 = vst [vmem:[#allocation29_spill] sm:$0xff] %v5201_v8 }
 0x132   : > { %v797_v29 = vmul.f32 2.0, %v731_v17  ;;  %v5152_v31 = vsub.f32 %v5057_v12, %v799_v18  ;;  %v5203_v10 = vpop.permute.xlu0 %1583 }
 0x133   : > { %v4280_v24 = vpop.f32.mrf.mxu0  ;;  %7727 = vst [vmem:[#allocation30_spill] sm:$0xff] %v5203_v10 }
 0x134   : > { %v802_v25 = vmul.f32 2.0, %v4280_v24  ;;  %882 = vmin.xlane.f32.xlu1 %v5142_v19  ;;  %888 = vmin.xlane.f32.xlu0 %v5145_v20  ;;  %v5162_v41 = vsub.f32 %v5057_v12, %v797_v29  ;;  %v5205_v11 = vpop.permute.xlu1 %1533 }
 0x135   : > { %v744_v26 = vpop.f32.mrf.mxu0  ;;  %7728 = vst [vmem:[#allocation31_spill] sm:$0xff] %v5205_v11 }
 0x136   : > { %v800_v30 = vmul.f32 2.0, %v744_v26  ;;  %v5155_v32 = vsub.f32 %v5057_v12, %v802_v25  ;;  %v5207_v15 = vpop.permute.xlu0 %1568 }
 0x137   : > { %v4281_v35 = vpop.f32.mrf.mxu0  ;;  %7729 = vst [vmem:[#allocation32_spill] sm:$0xff] %v5207_v15 }
 0x138   : > { %894 = vmin.xlane.f32.xlu1 %v5152_v31  ;;  %900 = vmin.xlane.f32.xlu0 %v5155_v32  ;;  %v803_v38 = vmul.f32 2.0, %v4281_v35  ;;  %v5165_v42 = vsub.f32 %v5057_v12, %v800_v30  ;;  %v5209_v17 = vpop.permute.xlu1 %1518 }
 0x139   : > { %v747_v37 = vpop.f32.mrf.mxu0  ;;  %7730 = vst [vmem:[#allocation33_spill] sm:$0xff] %v5209_v17 }
 0x13a   : > { %v801_v48 = vmul.f32 2.0, %v747_v37  ;;  %v5170_v50 = vsub.f32 %v5057_v12, %v803_v38 }
 0x13b   : > { %v4284_v43 = vpop.f32.mrf.mxu0 }
 0x13c   : > { %v806_v44 = vmul.f32 2.0, %v4284_v43  ;;  %890 = vmin.xlane.f32.xlu1 %v5162_v41  ;;  %896 = vmin.xlane.f32.xlu0 %v5165_v42  ;;  %v5180_v60 = vsub.f32 %v5057_v12, %v801_v48  ;;  %v5213_v18 = vpop.permute.xlu1 %1523 }
 0x13d   : > { %v760_v47 = vpop.f32.mrf.mxu0  ;;  %7732 = vst [vmem:[#allocation35_spill] sm:$0xff] %v5213_v18 }
 0x13e   : > { %v804_v49 = vmul.f32 2.0, %v760_v47  ;;  %v5173_v52 = vsub.f32 %v5057_v12, %v806_v44 }
 0x13f   : > { %v4285_v55 = vpop.f32.mrf.mxu0 }
 0x140   : > { %902 = vmin.xlane.f32.xlu1 %v5170_v50  ;;  %908 = vmin.xlane.f32.xlu0 %v5173_v52  ;;  %v807_v58 = vmul.f32 2.0, %v4285_v55  ;;  %v5183_v61 = vsub.f32 %v5057_v12, %v804_v49  ;;  %v5217_v25 = vpop.permute.xlu1 %1508 }
 0x141   : > { %v763_v57 = vpop.f32.mrf.mxu0  ;;  %7734 = vst [vmem:[#allocation37_spill] sm:$0xff] %v5217_v25 }
 0x142   : > { %v805_v59 = vmul.f32 2.0, %v763_v57  ;;  %v5190_v1 = vsub.f32 %v5057_v12, %v807_v58  ;;  %v7618_v57 = vlaneseq }
 0x144   : > { %898 = vmin.xlane.f32.xlu1 %v5180_v60  ;;  %904 = vmin.xlane.f32.xlu0 %v5183_v61  ;;  %v5193_v2 = vsub.f32 %v5057_v12, %v805_v59  ;;  %v5211_v12 = vpop.permute.xlu0 %1573  ;;  %v5221_v29 = vpop.permute.xlu1 %1513  ;;  %v5246_v59 = vand.u32 127, %v7618_v57 }
 0x145   : > { %7731 = vst [vmem:[#allocation34_spill] sm:$0xff] %v5211_v12  ;;  %7736 = vst [vmem:[#allocation39_spill] sm:$0xff] %v5221_v29 }
 0x146   : > { %7748 = vst [vmem:[#allocation51_spill] sm:$0xff] %v5246_v59 }
 0x148   : > { %910 = vmin.xlane.f32.xlu0 %v5190_v1  ;;  %906 = vmin.xlane.f32.xlu1 %v5193_v2  ;;  %v5215_v24 = vpop.permute.xlu0 %1558  ;;  %v5225_v35 = vpop.permute.xlu1 %1498 }
 0x149   : > { %7733 = vst [vmem:[#allocation36_spill] sm:$0xff] %v5215_v24  ;;  %7738 = vst [vmem:[#allocation41_spill] sm:$0xff] %v5225_v35 }
 0x14c   : > { %v5219_v26 = vpop.permute.xlu0 %1563  ;;  %v5229_v38 = vpop.permute.xlu1 %1503 }
 0x14d   : > { %7735 = vst [vmem:[#allocation38_spill] sm:$0xff] %v5219_v26  ;;  %7740 = vst [vmem:[#allocation43_spill] sm:$0xff] %v5229_v38 }
 0x150   : > { %v5223_v30 = vpop.permute.xlu0 %1478  ;;  %v5233_v44 = vpop.permute.xlu1 %1488 }
 0x151   : > { %7737 = vst [vmem:[#allocation40_spill] sm:$0xff] %v5223_v30  ;;  %7742 = vst [vmem:[#allocation45_spill] sm:$0xff] %v5233_v44 }
 0x154   : > { %v5227_v37 = vpop.permute.xlu0 %1483  ;;  %v5237_v48 = vpop.permute.xlu1 %1493 }
 0x155   : > { %7739 = vst [vmem:[#allocation42_spill] sm:$0xff] %v5227_v37  ;;  %7744 = vst [vmem:[#allocation47_spill] sm:$0xff] %v5237_v48 }
 0x158   : > { %v5231_v43 = vpop.permute.xlu0 %1553  ;;  %v5241_v55 = vpop.permute.xlu1 %1548 }
 0x159   : > { %7741 = vst [vmem:[#allocation44_spill] sm:$0xff] %v5231_v43  ;;  %7746 = vst [vmem:[#allocation49_spill] sm:$0xff] %v5241_v55 }
 0x15c   : > { %v5235_v47 = vpop.permute.xlu0 %1468  ;;  %v5248_v9 = vpop.permute.xlu1 %1543 }
 0x15d   : > { %7743 = vst [vmem:[#allocation46_spill] sm:$0xff] %v5235_v47  ;;  %7749 = vst [vmem:[#allocation52_spill] sm:$0xff] %v5248_v9 }
 0x160   : > { %v5239_v49 = vpop.permute.xlu0 %1473 }
 0x161   : > { %7745 = vst [vmem:[#allocation48_spill] sm:$0xff] %v5239_v49 }
 0x164   : > { %v5243_v58 = vpop.permute.xlu0 %1538 }
 0x165   : > { %7747 = vst [vmem:[#allocation50_spill] sm:$0xff] %v5243_v58 }
 0x191   : > { %v853_v36 = vpop.xlane.xlu0 %852 }
 0x192   : > { %vm914_vm1 = vcmp.le.f32.partialorder %v5060_v16, %v853_v36 }
 0x193   : > { %v5252_v23 = vsel %vm914_vm1, %v5246_v59, 128 }
 0x194   : > { %v1005_v0 = vshra.s32 %v5252_v23, 16 }
 0x195   : > { %v849_v54 = vpop.xlane.xlu0 %848  ;;  %v855_v5 = vpop.xlane.xlu1 %854 }
 0x196   : > { %vm912_vm2 = vcmp.le.f32.partialorder %v5064_v21, %v849_v54  ;;  %vm915_vm3 = vcmp.le.f32.partialorder %v5067_v22, %v855_v5  ;;  %v5257_v7 = vcvt.s32.f32 %v1005_v0 }
 0x197   : > { %v5260_v57 = vsel %vm912_vm2, %v5246_v59, 128  ;;  %v5263_v10 = vsel %vm915_vm3, %v5246_v59, 128 }
 0x198   : > { %1008 = vmin.xlane.f32.xlu0 %v5257_v7  ;;  %v977_v16 = vshra.s32 %v5260_v57, 16  ;;  %v1019_v36 = vshra.s32 %v5263_v10, 16 }
 0x199   : > { %v851_v6 = vpop.xlane.xlu1 %850  ;;  %v861_v12 = vpop.xlane.xlu0 %860 }
 0x19a   : > { %vm913_vm4 = vcmp.le.f32.partialorder %v5072_v27, %v851_v6  ;;  %vm918_vm5 = vcmp.le.f32.partialorder %v5075_v28, %v861_v12  ;;  %v5270_v21 = vcvt.s32.f32 %v977_v16  ;;  %v5278_v0 = vcvt.s32.f32 %v1019_v36 }
 0x19b   : > { %v5273_v22 = vsel %vm913_vm4, %v5246_v59, 128  ;;  %v5276_v54 = vsel %vm918_vm5, %v5246_v59, 128 }
 0x19c   : > { %980 = vmin.xlane.f32.xlu0 %v5270_v21  ;;  %v1061_v5 = vshra.s32 %v5276_v54, 16  ;;  %v991_v15 = vshra.s32 %v5273_v22, 16  ;;  %1022 = vmin.xlane.f32.xlu1 %v5278_v0 }
 0x19d   : > { %v857_v27 = vpop.xlane.xlu0 %856  ;;  %v863_v28 = vpop.xlane.xlu1 %862 }
 0x19e   : > { %vm916_vm6 = vcmp.le.f32.partialorder %v5080_v33, %v857_v27  ;;  %vm919_vm7 = vcmp.le.f32.partialorder %v5083_v34, %v863_v28  ;;  %v5286_v6 = vcvt.s32.f32 %v1061_v5  ;;  %v5288_v12 = vcvt.s32.f32 %v991_v15 }
 0x19f   : > { %v5291_v16 = vsel %vm916_vm6, %v5246_v59, 128  ;;  %v5294_v36 = vsel %vm919_vm7, %v5246_v59, 128 }
 0x1a0   : > { %1064 = vmin.xlane.f32.xlu0 %v5286_v6  ;;  %v1033_v26 = vshra.s32 %v5291_v16, 16  ;;  %v1075_v24 = vshra.s32 %v5294_v36, 16  ;;  %994 = vmin.xlane.f32.xlu1 %v5288_v12 }
 0x1a1   : > { %v859_v33 = vpop.xlane.xlu1 %858  ;;  %v869_v34 = vpop.xlane.xlu0 %868 }
 0x1a2   : > { %vm917_vm8 = vcmp.le.f32.partialorder %v5088_v39, %v859_v33  ;;  %vm922_vm9 = vcmp.le.f32.partialorder %v5091_v40, %v869_v34  ;;  %v5308_v27 = vcvt.s32.f32 %v1033_v26  ;;  %v5310_v28 = vcvt.s32.f32 %v1075_v24 }
 0x1a3   : > { %v5303_v15 = vsel %vm917_vm8, %v5246_v59, 128  ;;  %v5306_v5 = vsel %vm922_vm9, %v5246_v59, 128 }
 0x1a4   : > { %v1117_v43 = vshra.s32 %v5306_v5, 16  ;;  %v1047_v55 = vshra.s32 %v5303_v15, 16  ;;  %1036 = vmin.xlane.f32.xlu0 %v5308_v27  ;;  %1078 = vmin.xlane.f32.xlu1 %v5310_v28 }
 0x1a5   : > { %v865_v39 = vpop.xlane.xlu0 %864  ;;  %v871_v40 = vpop.xlane.xlu1 %870 }
 0x1a6   : > { %vm920_vm10 = vcmp.le.f32.partialorder %v5096_v45, %v865_v39  ;;  %vm923_vm11 = vcmp.le.f32.partialorder %v5099_v46, %v871_v40  ;;  %v5324_v26 = vcvt.s32.f32 %v1117_v43  ;;  %v5326_v34 = vcvt.s32.f32 %v1047_v55 }
 0x1a7   : > { %v5319_v33 = vsel %vm920_vm10, %v5246_v59, 128  ;;  %v5322_v24 = vsel %vm923_vm11, %v5246_v59, 128 }
 0x1a8   : > { %v1089_v9 = vshra.s32 %v5319_v33, 16  ;;  %v1131_v58 = vshra.s32 %v5322_v24, 16  ;;  %1120 = vmin.xlane.f32.xlu0 %v5324_v26  ;;  %1050 = vmin.xlane.f32.xlu1 %v5326_v34 }
 0x1a9   : > { %v867_v45 = vpop.xlane.xlu1 %866 }
 0x1aa   : > { %vm921_vm12 = vcmp.le.f32.partialorder %v5104_v51, %v867_v45  ;;  %v5333_v46 = vcvt.s32.f32 %v1089_v9  ;;  %v5338_v40 = vcvt.s32.f32 %v1131_v58 }
 0x1ab   : > { %v5336_v39 = vsel %vm921_vm12, %v5246_v59, 128  ;;  %v873_v43 = vpop.xlane.xlu0 %872 }
 0x1ac   : > { %vm924_vm13 = vcmp.le.f32.partialorder %v5108_v53, %v873_v43  ;;  %v1103_v55 = vshra.s32 %v5336_v39, 16  ;;  %1092 = vmin.xlane.f32.xlu0 %v5333_v46  ;;  %1134 = vmin.xlane.f32.xlu1 %v5338_v40 }
 0x1ad   : > { %v877_v11 = vpop.xlane.xlu1 %876  ;;  %v5348_v9 = vsel %vm924_vm13, %v5246_v59, 128 }
 0x1ae   : > { %vm926_vm14 = vcmp.le.f32.partialorder %v5112_v56, %v877_v11  ;;  %v5345_v51 = vcvt.s32.f32 %v1103_v55  ;;  %v1145_v56 = vshra.s32 %v5348_v9, 16 }
 0x1af   : > { %v5351_v45 = vsel %vm926_vm14, %v5246_v59, 128 }
 0x1b0   : > { %v1173_v58 = vshra.s32 %v5351_v45, 16  ;;  %1106 = vmin.xlane.f32.xlu1 %v5345_v51 }
 0x1b1   : > { %v879_v53 = vpop.xlane.xlu1 %878  ;;  %v885_v43 = vpop.xlane.xlu0 %884 }
 0x1b2   : > { %vm927_vm15 = vcmp.le.f32.partialorder %v5116_v62, %v879_v53  ;;  %vm930_vm0 = vcmp.le.f32.partialorder %v5119_v63, %v885_v43  ;;  %v5357_v8 = vcvt.s32.f32 %v1173_v58  ;;  %v5370_v62 = vcvt.s32.f32 %v1145_v56 }
 0x1b3   : > { %v5361_v11 = vsel %vm927_vm15, %v5246_v59, 128  ;;  %v5364_v55 = vsel %vm930_vm0, %v5246_v59, 128 }
 0x1b4   : > { %1176 = vmin.xlane.f32.xlu0 %v5357_v8  ;;  %v1187_v18 = vshra.s32 %v5361_v11, 16  ;;  %v1229_v63 = vshra.s32 %v5364_v55, 16 }
 0x1b5   : > { %v875_v17 = vpop.xlane.xlu1 %874  ;;  %v881_v29 = vpop.xlane.xlu0 %880 }
 0x1b6   : > { %vm925_vm1 = vcmp.le.f32.partialorder %v5124_v3, %v875_v17  ;;  %vm928_vm2 = vcmp.le.f32.partialorder %v5127_v4, %v881_v29  ;;  %v5379_v43 = vcvt.s32.f32 %v1187_v18  ;;  %v5386_v17 = vcvt.s32.f32 %v1229_v63 }
 0x1b7   : > { %v5374_v58 = vsel %vm925_vm1, %v5246_v59, 128  ;;  %v5377_v53 = vsel %vm928_vm2, %v5246_v59, 128 }
 0x1b8   : > { %1148 = vmin.xlane.f32.xlu0 %v5370_v62  ;;  %v1159_v25 = vshra.s32 %v5374_v58, 16  ;;  %1190 = vmin.xlane.f32.xlu1 %v5379_v43  ;;  %v1201_v29 = vshra.s32 %v5377_v53, 16 }
 0x1b9   : > { %v887_v3 = vpop.xlane.xlu1 %886  ;;  %v893_v4 = vpop.xlane.xlu0 %892 }
 0x1ba   : > { %vm931_vm3 = vcmp.le.f32.partialorder %v5134_v13, %v887_v3  ;;  %vm934_vm4 = vcmp.le.f32.partialorder %v5137_v14, %v893_v4  ;;  %v5395_v38 = vcvt.s32.f32 %v1159_v25  ;;  %v5402_v63 = vcvt.s32.f32 %v1201_v29 }
 0x1bb   : > { %v5390_v56 = vsel %vm931_vm3, %v5246_v59, 128  ;;  %v5393_v18 = vsel %vm934_vm4, %v5246_v59, 128 }
 0x1bc   : > { %1232 = vmin.xlane.f32.xlu0 %v5386_v17  ;;  %v1243_v35 = vshra.s32 %v5390_v56, 16  ;;  %1162 = vmin.xlane.f32.xlu1 %v5395_v38  ;;  %v1285_v3 = vshra.s32 %v5393_v18, 16 }
 0x1bd   : > { %v883_v13 = vpop.xlane.xlu1 %882  ;;  %v889_v14 = vpop.xlane.xlu0 %888 }
 0x1be   : > { %vm929_vm5 = vcmp.le.f32.partialorder %v5142_v19, %v883_v13  ;;  %vm932_vm6 = vcmp.le.f32.partialorder %v5145_v20, %v889_v14  ;;  %v5411_v48 = vcvt.s32.f32 %v1243_v35  ;;  %v5418_v29 = vcvt.s32.f32 %v1285_v3 }
 0x1bf   : > { %v5406_v4 = vsel %vm929_vm5, %v5246_v59, 128  ;;  %v5409_v25 = vsel %vm932_vm6, %v5246_v59, 128 }
 0x1c0   : > { %1204 = vmin.xlane.f32.xlu0 %v5402_v63  ;;  %v1215_v44 = vshra.s32 %v5406_v4, 16  ;;  %1246 = vmin.xlane.f32.xlu1 %v5411_v48  ;;  %v1257_v13 = vshra.s32 %v5409_v25, 16 }
 0x1c1   : > { %v895_v19 = vpop.xlane.xlu1 %894  ;;  %v901_v20 = vpop.xlane.xlu0 %900 }
 0x1c2   : > { %vm935_vm7 = vcmp.le.f32.partialorder %v5152_v31, %v895_v19  ;;  %vm938_vm8 = vcmp.le.f32.partialorder %v5155_v32, %v901_v20  ;;  %v5427_v37 = vcvt.s32.f32 %v1215_v44  ;;  %v5434_v3 = vcvt.s32.f32 %v1257_v13 }
 0x1c3   : > { %v5422_v14 = vsel %vm935_vm7, %v5246_v59, 128  ;;  %v5425_v35 = vsel %vm938_vm8, %v5246_v59, 128 }
 0x1c4   : > { %1288 = vmin.xlane.f32.xlu0 %v5418_v29  ;;  %v1299_v30 = vshra.s32 %v5422_v14, 16  ;;  %1218 = vmin.xlane.f32.xlu1 %v5427_v37  ;;  %7750 = vst [vmem:[#allocation53_spill] sm:$0xff] %v5434_v3  ;;  %v1341_v19 = vshra.s32 %v5425_v35, 16 }
 0x1c5   : > { %v891_v31 = vpop.xlane.xlu1 %890  ;;  %v897_v32 = vpop.xlane.xlu0 %896 }
 0x1c6   : > { %vm933_vm9 = vcmp.le.f32.partialorder %v5162_v41, %v891_v31  ;;  %vm936_vm10 = vcmp.le.f32.partialorder %v5165_v42, %v897_v32  ;;  %v5443_v49 = vcvt.s32.f32 %v1299_v30  ;;  %v5450_v13 = vcvt.s32.f32 %v1341_v19 }
 0x1c7   : > { %v5438_v20 = vsel %vm933_vm9, %v5246_v59, 128  ;;  %v5441_v44 = vsel %vm936_vm10, %v5246_v59, 128 }
 0x1c8   : > { %7751 = vst [vmem:[#allocation54_spill] sm:$0xff] %v5443_v49  ;;  %1260 = vmin.xlane.f32.xlu0 %v5434_v3  ;;  %v1271_v47 = vshra.s32 %v5438_v20, 16  ;;  %1302 = vmin.xlane.f32.xlu1 %v5443_v49  ;;  %7752 = vst [vmem:[#allocation55_spill] sm:$0xff] %v5450_v13  ;;  %v1313_v31 = vshra.s32 %v5441_v44, 16 }
 0x1c9   : > { %v903_v41 = vpop.xlane.xlu1 %902  ;;  %v909_v42 = vpop.xlane.xlu0 %908 }
 0x1ca   : > { %vm939_vm11 = vcmp.le.f32.partialorder %v5170_v50, %v903_v41  ;;  %vm942_vm12 = vcmp.le.f32.partialorder %v5173_v52, %v909_v42  ;;  %v5459_v3 = vcvt.s32.f32 %v1271_v47  ;;  %v5466_v19 = vcvt.s32.f32 %v1313_v31 }
 0x1cb   : > { %v5454_v32 = vsel %vm939_vm11, %v5246_v59, 128  ;;  %v5457_v30 = vsel %vm942_vm12, %v5246_v59, 128 }
 0x1cc   : > { %7753 = vst [vmem:[#allocation56_spill] sm:$0xff] %v5454_v32  ;;  %7754 = vst [vmem:[#allocation57_spill] sm:$0xff] %v5457_v30  ;;  %1344 = vmin.xlane.f32.xlu0 %v5450_v13  ;;  %v1355_v49 = vshra.s32 %v5454_v32, 16  ;;  %1274 = vmin.xlane.f32.xlu1 %v5459_v3  ;;  %v1397_v41 = vshra.s32 %v5457_v30, 16 }
 0x1cd   : > { %v899_v50 = vpop.xlane.xlu1 %898  ;;  %v905_v52 = vpop.xlane.xlu0 %904 }
 0x1ce   : > { %vm937_vm13 = vcmp.le.f32.partialorder %v5180_v60, %v899_v50  ;;  %vm940_vm14 = vcmp.le.f32.partialorder %v5183_v61, %v905_v52  ;;  %v5475_v13 = vcvt.s32.f32 %v1355_v49  ;;  %v5482_v31 = vcvt.s32.f32 %v1397_v41 }
 0x1cf   : > { %v5470_v42 = vsel %vm937_vm13, %v5246_v59, 128  ;;  %v5473_v47 = vsel %vm940_vm14, %v5246_v59, 128 }
 0x1d0   : > { %7755 = vst [vmem:[#allocation58_spill] sm:$0xff] %v5473_v47  ;;  %1316 = vmin.xlane.f32.xlu0 %v5466_v19  ;;  %v1327_v32 = vshra.s32 %v5470_v42, 16  ;;  %1358 = vmin.xlane.f32.xlu1 %v5475_v13  ;;  %7756 = vst [vmem:[#allocation59_spill] sm:$0xff] %v5482_v31  ;;  %v1369_v50 = vshra.s32 %v5473_v47, 16  ;;  %v1004_v47 = vand.u32 65535, %v5252_v23  ;;  %v990_v23 = vand.u32 65535, %v5273_v22 }
 0x1d1   : > { %v911_v60 = vpop.xlane.xlu0 %910  ;;  %v907_v61 = vpop.xlane.xlu1 %906 }
 0x1d2   : > { %vm943_vm15 = vcmp.le.f32.partialorder %v5190_v1, %v911_v60  ;;  %vm941_vm0 = vcmp.le.f32.partialorder %v5193_v2, %v907_v61  ;;  %v5488_v52 = vcvt.s32.f32 %v1327_v32  ;;  %v5496_v2 = vcvt.s32.f32 %v1369_v50  ;;  %v438_v61 = vld [vmem:[%s4946_s12 + $0x8] sm:$0xff] }
 0x1d3   : > { %v5486_v49 = vsel %vm943_vm15, %v5246_v59, 128  ;;  %v5491_v30 = vsel %vm941_vm0, %v5246_v59, 128  ;;  %v437_v59 = vld [vmem:[%s4946_s12] sm:$0xff] }
 0x1d4   : > { %7757 = vst [vmem:[#allocation60_spill] sm:$0xff] %v5491_v30  ;;  %1400 = vmin.xlane.f32.xlu0 %v5482_v31  ;;  %v1411_v1 = vshra.s32 %v5486_v49, 16  ;;  %1330 = vmin.xlane.f32.xlu1 %v5488_v52  ;;  %7758 = vst [vmem:[#allocation61_spill] sm:$0xff] %v5496_v2  ;;  %v1383_v60 = vshra.s32 %v5491_v30, 16  ;;  %v976_v31 = vand.u32 65535, %v5260_v57  ;;  %v1018_v30 = vand.u32 65535, %v5263_v10 }
 0x1d6   : > { %v5498_v41 = vcvt.s32.f32 %v1411_v1  ;;  %v5503_v32 = vcvt.s32.f32 %v1383_v60  ;;  %v1006_v1 = vcvt.s32.f32 %v1004_v47  ;;  %v1032_v47 = vand.u32 65535, %v5291_v16 }
 0x1d8   : > { %7759 = vst [vmem:[#allocation62_spill] sm:$0xff] %v5498_v41  ;;  %1372 = vmin.xlane.f32.xlu0 %v5496_v2  ;;  %1414 = vmin.xlane.f32.xlu1 %v5498_v41  ;;  %7760 = vst [vmem:[#allocation63_spill] sm:$0xff] %v5503_v32 }
 0x1dc   : > { %1386 = vmin.xlane.f32.xlu1 %v5503_v32  ;;  %v1060_v32 = vand.u32 65535, %v5276_v54 }
 0x1de   : > { %v1062_v54 = vcvt.s32.f32 %v1060_v32  ;;  %v1046_v32 = vand.u32 65535, %v5303_v15 }
 0x1ed   : > { %1463 = vperm.xlu1 %4441, %v438_v61   ;;  %v978_v61 = vcvt.s32.f32 %v976_v31 }
 0x1ee   : > { %1458 = vperm.xlu0 %4440, %v437_v59   ;;  %v1020_v59 = vcvt.s32.f32 %v1018_v30  ;;  %v1074_v30 = vand.u32 65535, %v5294_v36 }
 0x221   : > { %v5509_v50 = vpop.xlane.xlu0 %1008 }
 0x222   : > { %vm1010_vm1 = vcmp.eq.f32.partialorder %v5257_v7, %v5509_v50 }
 0x223   : > { %v1011_v60 = vsel %vm1010_vm1, %v1006_v1, inf  ;;  %v1034_v1 = vcvt.s32.f32 %v1032_v47 }
 0x224   : > { %1012 = vmin.xlane.f32.xlu1 %v1011_v60  ;;  %v1076_v60 = vcvt.s32.f32 %v1074_v30 }
 0x225   : > { %v5516_v2 = vpop.xlane.xlu0 %980  ;;  %v5519_v41 = vpop.xlane.xlu1 %1022 }
 0x226   : > { %vm982_vm2 = vcmp.eq.f32.partialorder %v5270_v21, %v5516_v2  ;;  %vm1024_vm3 = vcmp.eq.f32.partialorder %v5278_v0, %v5519_v41  ;;  %v992_v21 = vcvt.s32.f32 %v990_v23  ;;  %v1088_v23 = vand.u32 65535, %v5319_v33 }
 0x227   : > { %v983_v10 = vsel %vm982_vm2, %v978_v61, inf  ;;  %v1025_v7 = vsel %vm1024_vm3, %v1020_v59, inf  ;;  %v1048_v61 = vcvt.s32.f32 %v1046_v32  ;;  %v1116_v59 = vand.u32 65535, %v5306_v5 }
 0x228   : > { %984 = vmin.xlane.f32.xlu1 %v983_v10  ;;  %1026 = vmin.xlane.f32.xlu0 %v1025_v7  ;;  %v1090_v7 = vcvt.s32.f32 %v1088_v23  ;;  %v1102_v5 = vand.u32 65535, %v5336_v39  ;;  %v1200_v23 = vand.u32 65535, %v5377_v53  ;;  %v1284_v53 = vand.u32 65535, %v5393_v18 }
 0x229   : > { %v5525_v57 = vpop.xlane.xlu0 %1064  ;;  %v5529_v22 = vpop.xlane.xlu1 %994  ;;  %v1256_v18 = vand.u32 65535, %v5409_v25  ;;  %v1340_v25 = vand.u32 65535, %v5425_v35  ;;  %v1312_v35 = vand.u32 65535, %v5441_v44  ;;  %v7764_v44 = vld [vmem:[#allocation56_spill] sm:$0xff] }
 0x22a   : > { %vm1066_vm4 = vcmp.eq.f32.partialorder %v5286_v6, %v5525_v57  ;;  %vm996_vm5 = vcmp.eq.f32.partialorder %v5288_v12, %v5529_v22 }
 0x22b   : > { %v1067_v0 = vsel %vm1066_vm4, %v1062_v54, inf  ;;  %v997_v31 = vsel %vm996_vm5, %v992_v21, inf  ;;  %v1130_v54 = vand.u32 65535, %v5322_v24  ;;  %v1172_v21 = vand.u32 65535, %v5351_v45 }
 0x22c   : > { %1068 = vmin.xlane.f32.xlu1 %v1067_v0  ;;  %998 = vmin.xlane.f32.xlu0 %v997_v31  ;;  %v1104_v24 = vcvt.s32.f32 %v1102_v5 }
 0x22d   : > { %v5536_v16 = vpop.xlane.xlu0 %1036  ;;  %v5538_v36 = vpop.xlane.xlu1 %1078 }
 0x22e   : > { %vm1038_vm6 = vcmp.eq.f32.partialorder %v5308_v27, %v5536_v16  ;;  %vm1080_vm7 = vcmp.eq.f32.partialorder %v5310_v28, %v5538_v36  ;;  %v1118_v28 = vcvt.s32.f32 %v1116_v59 }
 0x22f   : > { %v1039_v6 = vsel %vm1038_vm6, %v1034_v1, inf  ;;  %v1081_v12 = vsel %vm1080_vm7, %v1076_v60, inf  ;;  %v1174_v1 = vcvt.s32.f32 %v1172_v21 }
 0x230   : > { %1040 = vmin.xlane.f32.xlu1 %v1039_v6  ;;  %1082 = vmin.xlane.f32.xlu0 %v1081_v12  ;;  %v1228_v6 = vand.u32 65535, %v5364_v55 }
 0x231   : > { %v5546_v15 = vpop.xlane.xlu0 %1120  ;;  %v5548_v10 = vpop.xlane.xlu1 %1050 }
 0x232   : > { %vm1052_vm8 = vcmp.eq.f32.partialorder %v5326_v34, %v5548_v10  ;;  %vm1122_vm9 = vcmp.eq.f32.partialorder %v5324_v26, %v5546_v15  ;;  %v1132_v26 = vcvt.s32.f32 %v1130_v54  ;;  %v1230_v59 = vcvt.s32.f32 %v1228_v6 }
 0x233   : > { %v1053_v27 = vsel %vm1052_vm8, %v1048_v61, inf  ;;  %v1123_v34 = vsel %vm1122_vm9, %v1118_v28, inf }
 0x234   : > { %1054 = vmin.xlane.f32.xlu0 %v1053_v27 }
 0x235   : > { %v5556_v47 = vpop.xlane.xlu0 %1092  ;;  %v5558_v33 = vpop.xlane.xlu1 %1134 }
 0x236   : > { %vm1094_vm10 = vcmp.eq.f32.partialorder %v5333_v46, %v5556_v47  ;;  %vm1136_vm11 = vcmp.eq.f32.partialorder %v5338_v40, %v5558_v33  ;;  %v1144_v46 = vand.u32 65535, %v5348_v9  ;;  %v1186_v40 = vand.u32 65535, %v5361_v11 }
 0x237   : > { %v1095_v30 = vsel %vm1094_vm10, %v1090_v7, inf  ;;  %v1137_v39 = vsel %vm1136_vm11, %v1132_v26, inf  ;;  %v1158_v9 = vand.u32 65535, %v5374_v58  ;;  %v1242_v58 = vand.u32 65535, %v5390_v56 }
 0x238   : > { %1096 = vmin.xlane.f32.xlu1 %v1095_v30  ;;  %1124 = vmin.xlane.f32.xlu0 %v1123_v34  ;;  %v1146_v32 = vcvt.s32.f32 %v1144_v46  ;;  %v1188_v12 = vcvt.s32.f32 %v1186_v40  ;;  %v1202_v7 = vcvt.s32.f32 %v1200_v23  ;;  %v1214_v56 = vand.u32 65535, %v5406_v4  ;;  %v7762_v40 = vld [vmem:[#allocation54_spill] sm:$0xff] }
 0x239   : > { %v5565_v0 = vpop.xlane.xlu1 %1106  ;;  %v1160_v27 = vcvt.s32.f32 %v1158_v9  ;;  %v1244_v5 = vcvt.s32.f32 %v1242_v58  ;;  %v1286_v34 = vcvt.s32.f32 %v1284_v53  ;;  %v1298_v4 = vand.u32 65535, %v5422_v14  ;;  %v7765_v53 = vld [vmem:[#allocation57_spill] sm:$0xff] }
 0x23a   : > { %vm1108_vm12 = vcmp.eq.f32.partialorder %v5345_v51, %v5565_v0  ;;  %v1216_v26 = vcvt.s32.f32 %v1214_v56  ;;  %v1270_v14 = vand.u32 65535, %v5438_v20  ;;  %v7763_v20 = vld [vmem:[#allocation55_spill] sm:$0xff]  ;;  %v1326_v58 = vand.u32 65535, %v5470_v42 }
 0x23b   : > { %v1109_v31 = vsel %vm1108_vm12, %v1104_v24, inf  ;;  %v1300_v46 = vcvt.s32.f32 %v1298_v4 }
 0x23c   : > { %1138 = vmin.xlane.f32.xlu1 %v1137_v39  ;;  %1110 = vmin.xlane.f32.xlu0 %v1109_v31  ;;  %v1258_v39 = vcvt.s32.f32 %v1256_v18  ;;  %v1328_v56 = vcvt.s32.f32 %v1326_v58  ;;  %v7767_v18 = vld [vmem:[#allocation58_spill] sm:$0xff] }
 0x23d   : > { %v5570_v45 = vpop.xlane.xlu0 %1176  ;;  %v4466_v58 = vld [vmem:[%s4941_s29 + $0x58] sm:$0xff]  }
 0x23e   : > { %vm1178_vm13 = vcmp.eq.f32.partialorder %v5357_v8, %v5570_v45 }
 0x23f   : > { %v1179_v60 = vsel %vm1178_vm13, %v1174_v1, inf  ;;  %v7761_v1 = vld [vmem:[#allocation53_spill] sm:$0xff] }
 0x240   : > { %1180 = vmin.xlane.f32.xlu0 %v1179_v60 }
 0x241   : > { %v5576_v51 = vpop.xlane.xlu0 %1148  ;;  %v5581_v61 = vpop.xlane.xlu1 %1190 }
 0x242   : > { %vm1150_vm14 = vcmp.eq.f32.partialorder %v5370_v62, %v5576_v51  ;;  %vm1192_vm15 = vcmp.eq.f32.partialorder %v5379_v43, %v5581_v61 }
 0x243   : > { %v1151_v11 = vsel %vm1150_vm14, %v1146_v32, inf  ;;  %v1193_v8 = vsel %vm1192_vm15, %v1188_v12, inf  ;;  %v1342_v32 = vcvt.s32.f32 %v1340_v25  ;;  %v1272_v12 = vcvt.s32.f32 %v1270_v14  ;;  %v7769_v25 = vld [vmem:[#allocation62_spill] sm:$0xff]  ;;  %v7770_v14 = vld [vmem:[#allocation61_spill] sm:$0xff] }
 0x244   : > { %1152 = vmin.xlane.f32.xlu0 %v1151_v11  ;;  %1194 = vmin.xlane.f32.xlu1 %v1193_v8 }
 0x245   : > { %v5586_v55 = vpop.xlane.xlu0 %1232  ;;  %v5591_v62 = vpop.xlane.xlu1 %1162 }
 0x246   : > { %vm1234_vm0 = vcmp.eq.f32.partialorder %v5386_v17, %v5586_v55  ;;  %vm1164_vm1 = vcmp.eq.f32.partialorder %v5395_v38, %v5591_v62 }
 0x247   : > { %v1235_v43 = vsel %vm1234_vm0, %v1230_v59, inf  ;;  %v1165_v28 = vsel %vm1164_vm1, %v1160_v27, inf  ;;  %v1314_v59 = vcvt.s32.f32 %v1312_v35  ;;  %v1354_v27 = vand.u32 65535, %v7764_v44  ;;  %v4464_v44 = vld [vmem:[%s4941_s29 + $0x50] sm:$0xff]  }
 0x248   : > { %1236 = vmin.xlane.f32.xlu0 %v1235_v43  ;;  %1166 = vmin.xlane.f32.xlu1 %v1165_v28 }
 0x249   : > { %v5596_v54 = vpop.xlane.xlu0 %1204  ;;  %v5601_v17 = vpop.xlane.xlu1 %1246 }
 0x24a   : > { %vm1206_vm2 = vcmp.eq.f32.partialorder %v5402_v63, %v5596_v54  ;;  %vm1248_vm3 = vcmp.eq.f32.partialorder %v5411_v48, %v5601_v17 }
 0x24b   : > { %v1207_v38 = vsel %vm1206_vm2, %v1202_v7, inf  ;;  %v1249_v30 = vsel %vm1248_vm3, %v1244_v5, inf  ;;  %v1356_v7 = vcvt.s32.f32 %v1354_v27  ;;  %v1396_v5 = vand.u32 65535, %v7765_v53  ;;  %v4465_v27 = vld [vmem:[%s4941_s29 + $0x10] sm:$0xff]   ;;  %v4469_v53 = vld [vmem:[%s4941_s29 + $0x20] sm:$0xff]  }
 0x24c   : > { %1208 = vmin.xlane.f32.xlu0 %v1207_v38  ;;  %1250 = vmin.xlane.f32.xlu1 %v1249_v30  ;;  %v1410_v38 = vand.u32 65535, %v5486_v49 }
 0x24d   : > { %v5606_v21 = vpop.xlane.xlu0 %1288  ;;  %v5611_v63 = vpop.xlane.xlu1 %1218 }
 0x24e   : > { %vm1290_vm4 = vcmp.eq.f32.partialorder %v5418_v29, %v5606_v21  ;;  %vm1220_vm5 = vcmp.eq.f32.partialorder %v5427_v37, %v5611_v63  ;;  %v1412_v4 = vcvt.s32.f32 %v1410_v38  ;;  %v4471_v38 = vld [vmem:[%s4941_s29 + $0x28] sm:$0xff]  }
 0x24f   : > { %v1291_v48 = vsel %vm1290_vm4, %v1286_v34, inf  ;;  %v1221_v24 = vsel %vm1220_vm5, %v1216_v26, inf  ;;  %v7766_v34 = vld [vmem:[#allocation59_spill] sm:$0xff]  ;;  %v1368_v26 = vand.u32 65535, %v7767_v18  ;;  %v4473_v18 = vld [vmem:[%s4941_s29 + $0x30] sm:$0xff]  }
 0x250   : > { %1292 = vmin.xlane.f32.xlu0 %v1291_v48  ;;  %1222 = vmin.xlane.f32.xlu1 %v1221_v24  ;;  %v7768_v48 = vld [vmem:[#allocation60_spill] sm:$0xff] }
 0x251   : > { %v5616_v31 = vpop.xlane.xlu0 %1260  ;;  %v5621_v29 = vpop.xlane.xlu1 %1302  ;;  %v1382_v24 = vand.u32 65535, %v7768_v48 }
 0x252   : > { %vm1262_vm6 = vcmp.eq.f32.partialorder %v7761_v1, %v5616_v31  ;;  %vm1304_vm7 = vcmp.eq.f32.partialorder %v7762_v40, %v5621_v29  ;;  %v1370_v1 = vcvt.s32.f32 %v1368_v26  ;;  %v987_v26 = vcvt.f32.s32 %v5516_v2 }
 0x253   : > { %v1263_v37 = vsel %vm1262_vm6, %v1258_v39, inf  ;;  %v1305_v60 = vsel %vm1304_vm7, %v1300_v46, inf  ;;  %v1384_v40 = vcvt.s32.f32 %v1382_v24  ;;  %v1071_v2 = vcvt.f32.s32 %v5525_v57 }
 0x254   : > { %1264 = vmin.xlane.f32.xlu0 %v1263_v37  ;;  %1306 = vmin.xlane.f32.xlu1 %v1305_v60  ;;  %v7771_v60 = vld [vmem:[#allocation63_spill] sm:$0xff] }
 0x255   : > { %v5626_v6 = vpop.xlane.xlu0 %1344  ;;  %v5630_v9 = vpop.xlane.xlu1 %1274  ;;  %v1072_v57 = vshll.u32 %v1071_v2, 16  ;;  %v1127_v2 = vcvt.f32.s32 %v5546_v15  ;;  %v1141_v15 = vcvt.f32.s32 %v5558_v33 }
 0x256   : > { %vm1346_vm8 = vcmp.eq.f32.partialorder %v7763_v20, %v5626_v6  ;;  %vm1276_vm9 = vcmp.eq.f32.partialorder %v5459_v3, %v5630_v9  ;;  %v4460_v20 = vld [vmem:[%s4941_s29 + $0x40] sm:$0xff]  }
 0x257   : > { %v1347_v11 = vsel %vm1346_vm8, %v1342_v32, inf  ;;  %v1277_v8 = vsel %vm1276_vm9, %v1272_v12, inf  ;;  %v4817_v12 = vmov 0.0  }
 0x258   : > { %1348 = vmin.xlane.f32.xlu0 %v1347_v11  ;;  %1278 = vmin.xlane.f32.xlu1 %v1277_v8  ;;  %403 = vst [vmem:[#allocation6] sm:$0x1] %v4817_v12  ;;  %v4461_v11 = vld [vmem:[%s4941_s29] sm:$0xff]   ;;  %v4462_v8 = vld [vmem:[%s4941_s29 + $0x48] sm:$0xff]  }
 0x259   : > { %v5634_v23 = vpop.xlane.xlu0 %1316  ;;  %v5640_v43 = vpop.xlane.xlu1 %1358 }
 0x25a   : > { %vm1318_vm10 = vcmp.eq.f32.partialorder %v5466_v19, %v5634_v23  ;;  %vm1360_vm11 = vcmp.eq.f32.partialorder %v5475_v13, %v5640_v43  ;;  %v1398_v13 = vcvt.s32.f32 %v1396_v5 }
 0x25b   : > { %v1319_v28 = vsel %vm1318_vm10, %v1314_v59, inf  ;;  %v1361_v19 = vsel %vm1360_vm11, %v1356_v7, inf  ;;  %v4463_v59 = vld [vmem:[%s4941_s29 + $0x8] sm:$0xff]   ;;  %v4468_v7 = vld [vmem:[%s4941_s29 + $0x60] sm:$0xff]  }
 0x25c   : > { %1320 = vmin.xlane.f32.xlu1 %v1319_v28  ;;  %v4467_v28 = vld [vmem:[%s4941_s29 + $0x18] sm:$0xff]  }
 0x25d   : > { %v5644_v3 = vpop.xlane.xlu0 %1400  ;;  %v5648_v30 = vpop.xlane.xlu1 %1330 }
 0x25e   : > { %vm1332_vm12 = vcmp.eq.f32.partialorder %v5488_v52, %v5648_v30  ;;  %vm1402_vm13 = vcmp.eq.f32.partialorder %v7766_v34, %v5644_v3 }
 0x25f   : > { %v1333_v42 = vsel %vm1332_vm12, %v1328_v56, inf  ;;  %v1403_v52 = vsel %vm1402_vm13, %v1398_v13, inf  ;;  %v4470_v56 = vld [vmem:[%s4941_s29 + $0x68] sm:$0xff]   ;;  %v4472_v13 = vld [vmem:[%s4941_s29 + $0x70] sm:$0xff]  }
 0x260   : > { %1362 = vmin.xlane.f32.xlu1 %v1361_v19  ;;  %1334 = vmin.xlane.f32.xlu0 %v1333_v42  ;;  %v1015_v19 = vcvt.f32.s32 %v5509_v50  ;;  %v4474_v50 = vld [vmem:[%s4941_s29 + $0x78] sm:$0xff]  }
 0x261   : > { %v5656_v39 = vpop.xlane.xlu0 %1372  ;;  %v5658_v49 = vpop.xlane.xlu1 %1414 }
 0x262   : > { %vm1416_vm14 = vcmp.eq.f32.partialorder %v7769_v25, %v5658_v49  ;;  %vm1374_vm15 = vcmp.eq.f32.partialorder %v7770_v14, %v5656_v39  ;;  %v1016_v24 = vshll.u32 %v1015_v19, 16 }
 0x263   : > { %v1417_v46 = vsel %vm1416_vm14, %v1412_v4, inf  ;;  %v1375_v32 = vsel %vm1374_vm15, %v1370_v1, inf  ;;  %v1029_v4 = vcvt.f32.s32 %v5519_v41  ;;  %v4475_v1 = vld [vmem:[%s4941_s29 + $0x38] sm:$0xff]  }
 0x264   : > { %1404 = vmin.xlane.f32.xlu0 %v1403_v52  ;;  %1418 = vmin.xlane.f32.xlu1 %v1417_v46  ;;  %v1001_v52 = vcvt.f32.s32 %v5529_v22  ;;  %v1043_v22 = vcvt.f32.s32 %v5536_v16 }
 0x265   : > { %v5664_v37 = vpop.xlane.xlu1 %1386 }
 0x266   : > { %vm1388_vm0 = vcmp.eq.f32.partialorder %v7771_v60, %v5664_v37  ;;  %v1030_v60 = vshll.u32 %v1029_v4, 16  ;;  %v7778_v4 = vmov 0 }
 0x267   : > { %v1389_v35 = vsel %vm1388_vm0, %v1384_v40, inf  ;;  %v988_v40 = vshll.u32 %v987_v26, 16 }
 0x268   : > { %1376 = vmin.xlane.f32.xlu0 %v1375_v32  ;;  %1390 = vmin.xlane.f32.xlu1 %v1389_v35 }
 0x269   : > { %v5678_v5 = vpop.permute.xlu1 %1463  ;;  %v5683_v34 = vpop.permute.xlu0 %1458 }
 0x295   : > { %1700 = vxpose.xlu0.c.b16.start [1/8] (narrow) %v4460_v20, 32  ;;  %1684 = vxpose.xlu1.c.b16.start [1/8] (narrow) %v4461_v11, 32  ;;  %v1002_v11 = vshll.u32 %v1001_v52, 16  ;;  %v1099_v52 = vcvt.f32.s32 %v5556_v47 }
 0x299   : > { %1701 = vxpose.xlu0.c.b16.cont [2/8] (narrow) %v4462_v8, 32  ;;  %1685 = vxpose.xlu1.c.b16.cont [2/8] (narrow) %v4463_v59, 32 }
 0x29d   : > { %1702 = vxpose.xlu0.c.b16.cont [3/8] (narrow) %v4464_v44, 32  ;;  %1686 = vxpose.xlu1.c.b16.cont [3/8] (narrow) %v4465_v27, 32  ;;  %v1085_v44 = vcvt.f32.s32 %v5538_v36  ;;  %v7774_v27 = vld [vmem:[#allocation51_spill] sm:$0xff] }
 0x29f   : > { %v1086_v19 = vshll.u32 %v1085_v44, 16 }
 0x2a1   : > { %1703 = vxpose.xlu0.c.b16.cont [4/8] (narrow) %v4466_v58, 32  ;;  %1687 = vxpose.xlu1.c.b16.cont [4/8] (narrow) %v4467_v28, 32  ;;  %v1044_v28 = vshll.u32 %v1043_v22, 16  ;;  %v1100_v22 = vshll.u32 %v1099_v52, 16 }
 0x2a5   : > { %1704 = vxpose.xlu0.c.b16.cont [5/8] (narrow) %v4468_v7, 32  ;;  %1688 = vxpose.xlu1.c.b16.cont [5/8] (narrow) %v4469_v53, 32  ;;  %v1057_v7 = vcvt.f32.s32 %v5548_v10 }
 0x2a9   : > { %1705 = vxpose.xlu0.c.b16.cont [6/8] (narrow) %v4470_v56, 32  ;;  %1689 = vxpose.xlu1.c.b16.cont [6/8] (narrow) %v4471_v38, 32 }
 0x2ad   : > { %v1013_v42 = vpop.xlane.xlu1 %1012  ;;  %1706 = vxpose.xlu0.c.b16.cont [7/8] (narrow) %v4472_v13, 32  ;;  %1690 = vxpose.xlu1.c.b16.cont [7/8] (narrow) %v4473_v18, 32 }
 0x2ae   : > { %v1014_v48 = vcvt.f32.s32 %v1013_v42 }
 0x2b0   : > { %v5692_v32 = vadd.s32 %v1016_v24, %v1014_v48 }
 0x2b1   : > { %v985_v25 = vpop.xlane.xlu1 %984  ;;  %v1027_v46 = vpop.xlane.xlu0 %1026  ;;  %1707 = vxpose.xlu0.c.b16.end [8/8] (narrow) %v4474_v50, 32  ;;  %1691 = vxpose.xlu1.c.b16.end [8/8] (narrow) %v4475_v1, 32 }
 0x2b2   : > { %v986_v14 = vcvt.f32.s32 %v985_v25  ;;  %7772 = vst [vmem:[#allocation53_spill] sm:$0xff] %v5692_v32  ;;  %v1028_v35 = vcvt.f32.s32 %v1027_v46  ;;  %vm1426_vm1 = vcmp.eq.s32.totalorder %v7774_v27, %v5692_v32  ;;  %v1058_v25 = vshll.u32 %v1057_v7, 16  ;;  %v7782_v46 = vld [vmem:[#allocation46_spill] sm:$0xff] }
 0x2b4   : > { %v5695_v12 = vadd.s32 %v1030_v60, %v1028_v35  ;;  %v5697_v41 = vadd.s32 %v988_v40, %v986_v14  ;;  %v1618_v14 = vsel %vm1426_vm1, %v7782_v46, 0.0  ;;  %v7783_v60 = vld [vmem:[#allocation48_spill] sm:$0xff] }
 0x2b5   : > { %v1069_v20 = vpop.xlane.xlu1 %1068  ;;  %v999_v8 = vpop.xlane.xlu0 %998  ;;  %v4040_v35 = vpack.c.bf16 %v7783_v60, %v7782_v46 }
 0x2b6   : > { %7773 = vst [vmem:[#allocation54_spill] sm:$0xff] %v5695_v12  ;;  %v1070_v59 = vcvt.f32.s32 %v1069_v20  ;;  %vm1427_vm2 = vcmp.eq.s32.totalorder %v7774_v27, %v5695_v12  ;;  %v1000_v58 = vcvt.f32.s32 %v999_v8  ;;  %vm1424_vm4 = vcmp.eq.s32.totalorder %v7774_v27, %v5697_v41  ;;  %v7841_v12 = vld [vmem:[#allocation32_spill] sm:$0xff] }
 0x2b7   : > { %vm5711_vm3 = vmpackc.low %vm1427_vm2, %vm1426_vm1  ;;  %v1616_v18 = vsel %vm1424_vm4, %v5683_v34, 0.0  ;;  %v1619_v47 = vsel %vm1427_vm2, %v7783_v60, 0.0  ;;  %v1113_v8 = vcvt.f32.s32 %v5565_v0 }
 0x2b8   : > { %v5717_v36 = vadd.s32 %v1002_v11, %v1000_v58  ;;  %v5720_v53 = vadd.s32 %v1072_v57, %v1070_v59  ;;  %v7787_v59 = vld [vmem:[#allocation40_spill] sm:$0xff] }
 0x2b9   : > { %v1083_v56 = vpop.xlane.xlu0 %1082  ;;  %v1041_v38 = vpop.xlane.xlu1 %1040 }
 0x2ba   : > { %7777 = vst [vmem:[#allocation55_spill] sm:$0xff] %v5720_v53  ;;  %vm1425_vm5 = vcmp.eq.s32.totalorder %v7774_v27, %v5717_v36  ;;  %v1084_v42 = vcvt.f32.s32 %v1083_v56  ;;  %v1042_v13 = vcvt.f32.s32 %v1041_v38  ;;  %vm1430_vm7 = vcmp.eq.s32.totalorder %v7774_v27, %v5720_v53  ;;  %v7788_v38 = vld [vmem:[#allocation42_spill] sm:$0xff] }
 0x2bb   : > { %v1617_v26 = vsel %vm1425_vm5, %v5678_v5, 0.0  ;;  %vm5726_vm6 = vmpackc.low %vm1425_vm5, %vm1424_vm4 }
 0x2bc   : > { %v7779_v4 = vsel %vm5726_vm6, 4294967295, %v7778_v4  ;;  %v1774_v48 = vadd.f32 %v1617_v26, %v1616_v18  ;;  %v5730_v10 = vadd.s32 %v1086_v19, %v1084_v42  ;;  %v5732_v24 = vadd.s32 %v1044_v28, %v1042_v13 }
 0x2bd   : > { %v1055_v50 = vpop.xlane.xlu0 %1054  ;;  %v1128_v42 = vshll.u32 %v1127_v2, 16  ;;  %v1114_v26 = vshll.u32 %v1113_v8, 16  ;;  %v7794_v2 = vld [vmem:[#allocation47_spill] sm:$0xff] }
 0x2be   : > { %7780 = vst [vmem:[#allocation56_spill] sm:$0xff] %v5730_v10  ;;  %7781 = vst [vmem:[#allocation57_spill] sm:$0xff] %v5732_v24  ;;  %v1775_v1 = vadd.f32 %v1774_v48, %v1618_v14  ;;  %vm1431_vm8 = vcmp.eq.s32.totalorder %v7774_v27, %v5730_v10  ;;  %vm1428_vm9 = vcmp.eq.s32.totalorder %v7774_v27, %v5732_v24  ;;  %v1056_v40 = vcvt.f32.s32 %v1055_v50  ;;  %v7792_v48 = vld [vmem:[#allocation45_spill] sm:$0xff] }
 0x2bf   : > { %vm5755_vm10 = vmpackc.low %vm1431_vm8, %vm1430_vm7  ;;  %v1620_v44 = vsel %vm1428_vm9, %v7787_v59, 0.0 }
 0x2c0   : > { %v1776_v20 = vadd.f32 %v1775_v1, %v1619_v47  ;;  %v5760_v11 = vadd.s32 %v1058_v25, %v1056_v40  ;;  %v1622_v25 = vsel %vm1430_vm7, %v7792_v48, 0.0  ;;  %v1142_v40 = vshll.u32 %v1141_v15, 16 }
 0x2c1   : > { %v1125_v58 = vpop.xlane.xlu0 %1124  ;;  %v1097_v57 = vpop.xlane.xlu1 %1096  ;;  %v1183_v47 = vcvt.f32.s32 %v5570_v45 }
 0x2c2   : > { %7786 = vst [vmem:[#allocation59_spill] sm:$0xff] %v5760_v11  ;;  %v1777_v28 = vadd.f32 %v1776_v20, %v1620_v44  ;;  %vm1429_vm11 = vcmp.eq.s32.totalorder %v7774_v27, %v5760_v11  ;;  %v1126_v7 = vcvt.f32.s32 %v1125_v58  ;;  %v1098_v56 = vcvt.f32.s32 %v1097_v57 }
 0x2c3   : > { %v1621_v19 = vsel %vm1429_vm11, %v7788_v38, 0.0  ;;  %vm5774_vm12 = vmpackc.low %vm1429_vm11, %vm1428_vm9  ;;  %v1623_v20 = vsel %vm1431_vm8, %v7794_v2, 0.0  ;;  %v1155_v58 = vcvt.f32.s32 %v5576_v51  ;;  %v1197_v57 = vcvt.f32.s32 %v5581_v61  ;;  %v7798_v51 = vld [vmem:[#allocation43_spill] sm:$0xff] }
 0x2c4   : > { %v1778_v13 = vadd.f32 %v1777_v28, %v1621_v19  ;;  %v5778_v18 = vadd.s32 %v1100_v22, %v1098_v56  ;;  %v5784_v50 = vadd.s32 %v1128_v42, %v1126_v7  ;;  %v7796_v28 = vld [vmem:[#allocation41_spill] sm:$0xff]  ;;  %v1184_v42 = vshll.u32 %v1183_v47, 16 }
 0x2c5   : > { %v1111_v33 = vpop.xlane.xlu0 %1110  ;;  %v1139_v52 = vpop.xlane.xlu1 %1138 }
 0x2c6   : > { %7791 = vst [vmem:[#allocation58_spill] sm:$0xff] %v5778_v18  ;;  %v1779_v14 = vadd.f32 %v1778_v13, %v1622_v25  ;;  %7793 = vst [vmem:[#allocation60_spill] sm:$0xff] %v5784_v50  ;;  %vm1432_vm13 = vcmp.eq.s32.totalorder %v7774_v27, %v5778_v18  ;;  %v1112_v1 = vcvt.f32.s32 %v1111_v33  ;;  %v1140_v22 = vcvt.f32.s32 %v1139_v52 }
 0x2c7   : > { %v1624_v7 = vsel %vm1432_vm13, %v7796_v28, 0.0  ;;  %vm1434_vm14 = vcmp.eq.s32.totalorder %v7774_v27, %v5784_v50  ;;  %v1156_v33 = vshll.u32 %v1155_v58, 16  ;;  %v1169_v52 = vcvt.f32.s32 %v5591_v62 }
 0x2c8   : > { %v1780_v8 = vadd.f32 %v1779_v14, %v1623_v20  ;;  %v5793_v44 = vadd.s32 %v1114_v26, %v1112_v1  ;;  %v5801_v56 = vadd.s32 %v1142_v40, %v1140_v22  ;;  %v7803_v14 = vld [vmem:[#allocation37_spill] sm:$0xff]  ;;  %v1198_v22 = vshll.u32 %v1197_v57, 16 }
 0x2c9   : > { %v1181_v45 = vpop.xlane.xlu0 %1180  ;;  %v1626_v1 = vsel %vm1434_vm14, %v7803_v14, 0.0  ;;  %v1170_v62 = vshll.u32 %v1169_v52, 16  ;;  %v1211_v18 = vcvt.f32.s32 %v5596_v54 }
 0x2ca   : > { %7795 = vst [vmem:[#allocation62_spill] sm:$0xff] %v5793_v44  ;;  %7797 = vst [vmem:[#allocation61_spill] sm:$0xff] %v5801_v56  ;;  %v1781_v15 = vadd.f32 %v1780_v8, %v1624_v7  ;;  %vm1433_vm15 = vcmp.eq.s32.totalorder %v7774_v27, %v5793_v44  ;;  %v1182_v19 = vcvt.f32.s32 %v1181_v45  ;;  %vm1435_vm0 = vcmp.eq.s32.totalorder %v7774_v27, %v5801_v56 }
 0x2cb   : > { %v1625_v13 = vsel %vm1433_vm15, %v7798_v51, 0.0  ;;  %vm5813_vm1 = vmpackc.low %vm1433_vm15, %vm1432_vm13  ;;  %v1239_v56 = vcvt.f32.s32 %v5586_v55 }
 0x2cc   : > { %v1782_v26 = vadd.f32 %v1781_v15, %v1625_v13  ;;  %vm5817_vm2 = vmpackc.low %vm1435_vm0, %vm1434_vm14  ;;  %v5823_v40 = vadd.s32 %v1184_v42, %v1182_v19  ;;  %v7805_v15 = vld [vmem:[#allocation39_spill] sm:$0xff]  ;;  %v1253_v19 = vcvt.f32.s32 %v5601_v17 }
 0x2cd   : > { %v1153_v47 = vpop.xlane.xlu0 %1152  ;;  %v1195_v20 = vpop.xlane.xlu1 %1194  ;;  %v1627_v13 = vsel %vm1435_vm0, %v7805_v15, 0.0 }
 0x2ce   : > { %7804 = vst [vmem:[#allocation63_spill] sm:$0xff] %v5823_v40  ;;  %v1783_v8 = vadd.f32 %v1782_v26, %v1626_v1  ;;  %v1154_v7 = vcvt.f32.s32 %v1153_v47  ;;  %v1196_v45 = vcvt.f32.s32 %v1195_v20  ;;  %vm1438_vm4 = vcmp.eq.s32.totalorder %v7774_v27, %v5823_v40 }
 0x2cf   : > { %v1240_v26 = vshll.u32 %v1239_v56, 16  ;;  %v1212_v1 = vshll.u32 %v1211_v18, 16  ;;  %v1225_v56 = vcvt.f32.s32 %v5611_v63  ;;  %v1267_v63 = vcvt.f32.s32 %v5616_v31 }
 0x2d0   : > { %v1784_v50 = vadd.f32 %v1783_v8, %v1627_v13  ;;  %v5827_v44 = vadd.s32 %v1156_v33, %v1154_v7  ;;  %v5829_v58 = vadd.s32 %v1198_v22, %v1196_v45  ;;  %v7808_v33 = vld [vmem:[#allocation33_spill] sm:$0xff]  ;;  %v1254_v8 = vshll.u32 %v1253_v19, 16 }
 0x2d1   : > { %v1237_v42 = vpop.xlane.xlu0 %1236  ;;  %v1167_v10 = vpop.xlane.xlu1 %1166  ;;  %v1295_v13 = vcvt.f32.s32 %v5606_v21 }
 0x2d2   : > { %7806 = vst [vmem:[#allocation51_spill] sm:$0xff] %v5827_v44  ;;  %7807 = vst [vmem:[#allocation46_spill] sm:$0xff] %v5829_v58  ;;  %vm1436_vm5 = vcmp.eq.s32.totalorder %v7774_v27, %v5827_v44  ;;  %v1238_v55 = vcvt.f32.s32 %v1237_v42  ;;  %v1168_v57 = vcvt.f32.s32 %v1167_v10  ;;  %vm1439_vm7 = vcmp.eq.s32.totalorder %v7774_v27, %v5829_v58  ;;  %v7813_v42 = vld [vmem:[#allocation35_spill] sm:$0xff] }
 0x2d3   : > { %v1628_v54 = vsel %vm1436_vm5, %v7808_v33, 0.0  ;;  %vm5849_vm8 = vmpackc.low %vm1439_vm7, %vm1438_vm4 }
 0x2d4   : > { %v1785_v10 = vadd.f32 %v1784_v50, %v1628_v54  ;;  %v5853_v52 = vadd.s32 %v1170_v62, %v1168_v57  ;;  %v5856_v47 = vadd.s32 %v1240_v26, %v1238_v55  ;;  %v1226_v55 = vshll.u32 %v1225_v56, 16  ;;  %v7818_v54 = vld [vmem:[#allocation29_spill] sm:$0xff] }
 0x2d5   : > { %v1209_v20 = vpop.xlane.xlu0 %1208  ;;  %v1251_v22 = vpop.xlane.xlu1 %1250  ;;  %v1309_v57 = vcvt.f32.s32 %v5621_v29  ;;  %v1268_v56 = vshll.u32 %v1267_v63, 16 }
 0x2d6   : > { %7811 = vst [vmem:[#allocation48_spill] sm:$0xff] %v5853_v52  ;;  %7812 = vst [vmem:[#allocation40_spill] sm:$0xff] %v5856_v47  ;;  %vm1437_vm9 = vcmp.eq.s32.totalorder %v7774_v27, %v5853_v52  ;;  %v1210_v7 = vcvt.f32.s32 %v1209_v20  ;;  %v1252_v45 = vcvt.f32.s32 %v1251_v22  ;;  %vm1442_vm13 = vcmp.eq.s32.totalorder %v7774_v27, %v5856_v47 }
 0x2d7   : > { %v1629_v53 = vsel %vm1437_vm9, %v7813_v42, 0.0  ;;  %vm5865_vm11 = vmpackc.low %vm1437_vm9, %vm1436_vm5  ;;  %v1630_v20 = vsel %vm1438_vm4, %v7818_v54, 0.0 }
 0x2d8   : > { %v1786_v50 = vadd.f32 %v1785_v10, %v1629_v53  ;;  %v5870_v62 = vadd.s32 %v1212_v1, %v1210_v7  ;;  %v5872_v19 = vadd.s32 %v1254_v8, %v1252_v45  ;;  %v1296_v1 = vshll.u32 %v1295_v13, 16  ;;  %v7822_v8 = vld [vmem:[#allocation31_spill] sm:$0xff] }
 0x2d9   : > { %v1293_v21 = vpop.xlane.xlu0 %1292  ;;  %v1223_v26 = vpop.xlane.xlu1 %1222  ;;  %v1631_v7 = vsel %vm1439_vm7, %v7822_v8, 0.0  ;;  %v1310_v45 = vshll.u32 %v1309_v57, 16 }
 0x2da   : > { %7816 = vst [vmem:[#allocation42_spill] sm:$0xff] %v5870_v62  ;;  %7817 = vst [vmem:[#allocation45_spill] sm:$0xff] %v5872_v19  ;;  %vm1440_vm14 = vcmp.eq.s32.totalorder %v7774_v27, %v5870_v62  ;;  %vm1443_vm15 = vcmp.eq.s32.totalorder %v7774_v27, %v5872_v19  ;;  %v1294_v31 = vcvt.f32.s32 %v1293_v21  ;;  %v1224_v53 = vcvt.f32.s32 %v1223_v26  ;;  %v7823_v21 = vld [vmem:[#allocation50_spill] sm:$0xff] }
 0x2db   : > { %v1787_v10 = vadd.f32 %v1786_v50, %v1630_v20  ;;  %vm5891_vm0 = vmpackc.low %vm1443_vm15, %vm1442_vm13  ;;  %v1281_v50 = vcvt.f32.s32 %v5630_v9  ;;  %v1632_v26 = vsel %vm1440_vm14, %v7823_v21, 0.0  ;;  %v7826_v9 = vmov 0 }
 0x2dc   : > { %v5895_v22 = vadd.s32 %v1226_v55, %v1224_v53  ;;  %v5906_v13 = vadd.s32 %v1296_v1, %v1294_v31  ;;  %v7825_v53 = vld [vmem:[#allocation52_spill] sm:$0xff]  ;;  %v1323_v1 = vcvt.f32.s32 %v5634_v23 }
 0x2dd   : > { %v1265_v20 = vpop.xlane.xlu0 %1264  ;;  %v1307_v40 = vpop.xlane.xlu1 %1306  ;;  %v1788_v52 = vadd.f32 %v1787_v10, %v1631_v7  ;;  %v1282_v31 = vshll.u32 %v1281_v50, 16  ;;  %v7833_v50 = vld [vmem:[#allocation44_spill] sm:$0xff] }
 0x2de   : > { %7821 = vst [vmem:[#allocation47_spill] sm:$0xff] %v5895_v22  ;;  %7824 = vst [vmem:[#allocation41_spill] sm:$0xff] %v5906_v13  ;;  %vm1441_vm4 = vcmp.eq.s32.totalorder %v7774_v27, %v5895_v22  ;;  %v1266_v63 = vcvt.f32.s32 %v1265_v20  ;;  %v1308_v55 = vcvt.f32.s32 %v1307_v40  ;;  %v7830_v40 = vld [vmem:[#allocation49_spill] sm:$0xff]  ;;  %vm1446_vm7 = vcmp.eq.s32.totalorder %v7774_v27, %v5906_v13  ;;  %v7835_v22 = vld [vmem:[#allocation36_spill] sm:$0xff] }
 0x2df   : > { %v1633_v58 = vsel %vm1441_vm4, %v7825_v53, 0.0  ;;  %v1789_v57 = vadd.f32 %v1788_v52, %v1632_v26  ;;  %vm5914_vm5 = vmpackc.low %vm1441_vm4, %vm1440_vm14  ;;  %v1634_v52 = vsel %vm1442_vm13, %v7830_v40, 0.0  ;;  %v1324_v47 = vshll.u32 %v1323_v1, 16 }
 0x2e0   : > { %v7827_v9 = vsel %vm5914_vm5, 4294967295, %v7826_v9  ;;  %v5918_v44 = vadd.s32 %v1268_v56, %v1266_v63  ;;  %v5920_v10 = vadd.s32 %v1310_v45, %v1308_v55  ;;  %v1351_v45 = vcvt.f32.s32 %v5626_v6 }
 0x2e1   : > { %v1279_v7 = vpop.xlane.xlu1 %1278  ;;  %v1790_v20 = vadd.f32 %v1789_v57, %v1633_v58  ;;  %v1349_v56 = vpop.xlane.xlu0 %1348  ;;  %v1635_v63 = vsel %vm1443_vm15, %v7833_v50, 0.0  ;;  %v1365_v55 = vcvt.f32.s32 %v5640_v43  ;;  %v1337_v57 = vcvt.f32.s32 %v5648_v30  ;;  %v1773_v58 = vld [vmem:[#allocation6] sm:$0x1] }
 0x2e2   : > { %7828 = vst [vmem:[#allocation43_spill] sm:$0xff] %v5918_v44  ;;  %7829 = vst [vmem:[#allocation37_spill] sm:$0xff] %v5920_v10  ;;  %vm1447_vm9 = vcmp.eq.s32.totalorder %v7774_v27, %v5920_v10  ;;  %v1280_v26 = vcvt.f32.s32 %v1279_v7  ;;  %vm1444_vm14 = vcmp.eq.s32.totalorder %v7774_v27, %v5918_v44  ;;  %v1350_v7 = vcvt.f32.s32 %v1349_v56  ;;  %v7853_v10 = vld [vmem:[#allocation25_spill] sm:$0xff] }
 0x2e3   : > { %v1791_v23 = vadd.f32 %v1790_v20, %v1634_v52  ;;  %vm5940_vm13 = vmpackc.low %vm1447_vm9, %vm1446_vm7  ;;  %v1636_v62 = vsel %vm1444_vm14, %v7835_v22, 0.0  ;;  %v1352_v11 = vshll.u32 %v1351_v45, 16  ;;  %v1421_v1 = vcvt.f32.s32 %v5658_v49 }
 0x2e4   : > { %v5948_v6 = vadd.s32 %v1282_v31, %v1280_v26  ;;  %v1407_v31 = vcvt.f32.s32 %v5644_v3  ;;  %v7836_v26 = vld [vmem:[#allocation38_spill] sm:$0xff] }
 0x2e5   : > { %v1321_v20 = vpop.xlane.xlu1 %1320  ;;  %v1792_v52 = vadd.f32 %v1791_v23, %v1635_v63  ;;  %v1366_v23 = vshll.u32 %v1365_v55, 16  ;;  %v1338_v63 = vshll.u32 %v1337_v57, 16  ;;  %v1422_v55 = vshll.u32 %v1421_v1, 16 }
 0x2e6   : > { %7834 = vst [vmem:[#allocation39_spill] sm:$0xff] %v5948_v6  ;;  %vm1445_vm4 = vcmp.eq.s32.totalorder %v7774_v27, %v5948_v6  ;;  %v1322_v19 = vcvt.f32.s32 %v1321_v20  ;;  %v5970_v20 = vadd.s32 %v1352_v11, %v1350_v7  ;;  %v1408_v49 = vshll.u32 %v1407_v31, 16  ;;  %v7842_v11 = vld [vmem:[#allocation34_spill] sm:$0xff] }
 0x2e7   : > { %v1637_v43 = vsel %vm1445_vm4, %v7836_v26, 0.0  ;;  %v1793_v24 = vadd.f32 %v1792_v52, %v1636_v62  ;;  %vm5963_vm15 = vmpackc.low %vm1445_vm4, %vm1444_vm14  ;;  %v1638_v62 = vsel %vm1446_vm7, %v7841_v12, 0.0  ;;  %v4061_v25 = vpack.c.bf16 %v7836_v26, %v7835_v22 }
 0x2e8   : > { %v5968_v56 = vadd.s32 %v1324_v47, %v1322_v19  ;;  %7840 = vst [vmem:[#allocation35_spill] sm:$0xff] %v5970_v20  ;;  %v1379_v47 = vcvt.f32.s32 %v5656_v39  ;;  %vm1450_vm7 = vcmp.eq.s32.totalorder %v7774_v27, %v5970_v20  ;;  %v7857_v20 = vld [vmem:[#allocation24_spill] sm:$0xff] }
 0x2e9   : > { %v1335_v45 = vpop.xlane.xlu0 %1334  ;;  %v1363_v3 = vpop.xlane.xlu1 %1362  ;;  %v1794_v6 = vadd.f32 %v1793_v24, %v1637_v43  ;;  %v1639_v24 = vsel %vm1447_vm9, %v7842_v11, 0.0  ;;  %v1393_v43 = vcvt.f32.s32 %v5664_v37  ;;  %v7845_v37 = vld [vmem:[#allocation30_spill] sm:$0xff] }
 0x2ea   : > { %7839 = vst [vmem:[#allocation33_spill] sm:$0xff] %v5968_v56  ;;  %vm7675_vm14 = vcmp.eq.s32.totalorder %v7774_v27, %v5968_v56  ;;  %v1336_v52 = vcvt.f32.s32 %v1335_v45  ;;  %v1364_v44 = vcvt.f32.s32 %v1363_v3  ;;  %v7844_v45 = vld [vmem:[#allocation28_spill] sm:$0xff]  ;;  %vm7850_vm6 = vcmp.eq.s32.totalorder %v7774_v27, %v5968_v56 }
 0x2eb   : > { %v1795_v19 = vadd.f32 %v1794_v6, %v1638_v62  ;;  %v1640_v39 = vsel %vm7675_vm14, %v7844_v45, 0.0 }
 0x2ec   : > { %v5983_v57 = vadd.s32 %v1338_v63, %v1336_v52  ;;  %v5985_v7 = vadd.s32 %v1366_v23, %v1364_v44 }
 0x2ed   : > { %v1405_v6 = vpop.xlane.xlu0 %1404  ;;  %v1419_v31 = vpop.xlane.xlu1 %1418  ;;  %v1796_v1 = vadd.f32 %v1795_v19, %v1639_v24  ;;  %v7848_v24 = vld [vmem:[#allocation22_spill] sm:$0xff] }
 0x2ee   : > { %7843 = vst [vmem:[#allocation29_spill] sm:$0xff] %v5983_v57  ;;  %vm1449_vm9 = vcmp.eq.s32.totalorder %v7774_v27, %v5983_v57  ;;  %vm7680_vm4 = vcmp.eq.s32.totalorder %v7774_v27, %v5985_v7  ;;  %v1406_v44 = vcvt.f32.s32 %v1405_v6  ;;  %v1420_v23 = vcvt.f32.s32 %v1419_v31  ;;  %v7849_v6 = vld [vmem:[#allocation27_spill] sm:$0xff] }
 0x2ef   : > { %v1641_v63 = vsel %vm1449_vm9, %v7845_v37, 0.0  ;;  %v1797_v3 = vadd.f32 %v1796_v1, %v1640_v39  ;;  %vm6005_vm14 = vmpackc.low %vm7680_vm4, %vm1450_vm7  ;;  %v4046_v31 = vpack.c.bf16 %v7849_v6, %v7848_v24  ;;  %v1380_v1 = vshll.u32 %v1379_v47, 16 }
 0x2f0   : > { %v6009_v52 = vadd.s32 %v1408_v49, %v1406_v44  ;;  %v6011_v19 = vadd.s32 %v1422_v55, %v1420_v23  ;;  %vm6018_vm5 = vmpackc.low %vm1449_vm9, %vm7850_vm6  ;;  %v1394_v57 = vshll.u32 %v1393_v43, 16  ;;  %v1642_v49 = vsel %vm1450_vm7, %v7853_v10, 0.0 }
 0x2f1   : > { %v1377_v44 = vpop.xlane.xlu0 %1376  ;;  %v1391_v55 = vpop.xlane.xlu1 %1390  ;;  %v1798_v23 = vadd.f32 %v1797_v3, %v1641_v63  ;;  %v4022_v47 = vpack.c.bf16 %v7822_v8, %v7818_v54  ;;  %v7854_v63 = vld [vmem:[#allocation26_spill] sm:$0xff]  ;;  %vm7855_vm9 = vcmp.eq.s32.totalorder %v7774_v27, %v5985_v7  ;;  %v7856_v8 = vld [vmem:[#allocation23_spill] sm:$0xff] }
 0x2f2   : > { %v1378_v13 = vcvt.f32.s32 %v1377_v44  ;;  %v1392_v32 = vcvt.f32.s32 %v1391_v55  ;;  %vm7684_vm4 = vcmp.eq.s32.totalorder %v7774_v27, %v6009_v52  ;;  %vm7683_vm6 = vcmp.eq.s32.totalorder %v7774_v27, %v6011_v19 }
 0x2f3   : > { %vm4045_vm7 = vmpackc.low %vm7683_vm6, %vm7684_vm4  ;;  %v1799_v43 = vadd.f32 %v1798_v23, %v1642_v49  ;;  %v1643_v3 = vsel %vm7855_vm9, %v7854_v63, 0.0  ;;  %v4049_v56 = vpack.c.bf16 %v7857_v20, %v7856_v8  ;;  %v4052_v17 = vpack.c.bf16 %v7854_v63, %v7853_v10 }
 0x2f4   : > { %v6042_v44 = vadd.s32 %v1380_v1, %v1378_v13  ;;  %v6044_v55 = vadd.s32 %v1394_v57, %v1392_v32  ;;  %4184 = vmatprep.subr.msk.bf16.mxu1 %vm4045_vm7, %v4046_v31  ;;  %v4025_v13 = vpack.c.bf16 %v7813_v42, %v7808_v33  ;;  %v4028_v33 = vpack.c.bf16 %v7805_v15, %v7803_v14 }
 0x2f5   : > { %4185 = vmatpush3.bf16.msk.msra.mxu1 %vm5849_vm8, %v4022_v47  ;;  %v1800_v54 = vadd.f32 %v1799_v43, %v1643_v3  ;;  %vm7858_vm8 = vcmp.eq.s32.totalorder %v7774_v27, %v6009_v52  ;;  %v4055_v10 = vpack.c.bf16 %v7845_v37, %v7844_v45  ;;  %v4031_v14 = vpack.c.bf16 %v7798_v51, %v7796_v28 }
 0x2f6   : > { %vm1452_vm6 = vcmp.eq.s32.totalorder %v7774_v27, %v6042_v44  ;;  %vm1453_vm4 = vcmp.eq.s32.totalorder %v7774_v27, %v6044_v55  ;;  %v1646_v42 = vsel %vm7858_vm8, %v7848_v24, 0.0  ;;  %v4058_v15 = vpack.c.bf16 %v7842_v11, %v7841_v12 }
 0x2f7   : > { %v1644_v32 = vsel %vm1452_vm6, %v7856_v8, 0.0  ;;  %vm4048_vm9 = vmpackc.low %vm1453_vm4, %vm1452_vm6  ;;  %v1708_v57 = vpop.trf.xlu0  ;;  %v1645_v1 = vsel %vm1453_vm4, %v7857_v20, 0.0  ;;  %v4037_v12 = vpack.c.bf16 %v7788_v38, %v7787_v59  ;;  %v4064_v51 = vpack.c.bf16 %v7833_v50, %v7830_v40  ;;  %v1692_v38 = vpop.trf.xlu1 }
 0x2f8   : > { %v1801_v31 = vadd.f32 %v1800_v54, %v1644_v32  ;;  %4186 = vmatprep.subr.msk.bf16.mxu1 %vm4048_vm9, %v4049_v56  ;;  %1748 = vmatprep.mubr.bf16.mxu1 %v1708_v57  ;;  %v4043_v59 = vpack.c.bf16 %v5678_v5, %v5683_v34 }
 0x2f9   : > { %4187 = vmatpush3.bf16.msk.msra.mxu1 %vm5865_vm11, %v4025_v13  ;;  %vm7859_vm11 = vcmp.eq.s32.totalorder %v7774_v27, %v6011_v19  ;;  %v4034_v27 = vpack.c.bf16 %v7794_v2, %v7792_v48  ;;  %v4067_v2 = vpack.c.bf16 %v7825_v53, %v7823_v21 }
 0x2fa   : > { %v1802_v49 = vadd.f32 %v1801_v31, %v1645_v1  ;;  %4188 = vmatprep.subr.msk.bf16.mxu1 %vm6005_vm14, %v4052_v17  ;;  %v1647_v18 = vsel %vm7859_vm11, %v7849_v6, 0.0 }
 0x2fb   : > { %v1709_v0 = vpop.trf.xlu0  ;;  %v1693_v46 = vpop.trf.xlu1 }
 0x2fc   : > { %v1803_v56 = vadd.f32 %v1802_v49, %v1646_v42 }
 0x2fd   : > { %4189 = vmatpush3.bf16.msk.msra.mxu1 %vm5817_vm2, %v4028_v33 }
 0x2fe   : > { %v1804_v20 = vadd.f32 %v1803_v56, %v1647_v18  ;;  %4190 = vmatprep.subr.msk.bf16.mxu1 %vm6018_vm5, %v4055_v10 }
 0x300   : > { %v1805_v45 = vrot.slane %v1804_v20, 4 }
 0x301   : > { %4191 = vmatpush3.bf16.msk.msra.mxu1 %vm5813_vm1, %v4031_v14 }
 0x302   : > { %v1806_v37 = vadd.f32 %v1805_v45, %v1804_v20  ;;  %4192 = vmatprep.subr.msk.bf16.mxu1 %vm5940_vm13, %v4058_v15 }
 0x304   : > { %v1807_v62 = vrot.slane %v1806_v37, 2 }
 0x305   : > { %4193 = vmatpush3.bf16.msk.msra.mxu1 %vm5755_vm10, %v4034_v27  ;;  %vm7860_vm10 = vnez %v7827_v9 }
 0x306   : > { %v1808_v28 = vadd.f32 %v1807_v62, %v1806_v37  ;;  %4194 = vmatprep.subr.msk.bf16.mxu1 %vm5963_vm15, %v4061_v25 }
 0x308   : > { %v1809_v61 = vrot.slane %v1808_v28, 1 }
 0x309   : > { %4195 = vmatpush3.bf16.msk.msra.mxu1 %vm5774_vm12, %v4037_v12  ;;  %vm7861_vm12 = vnez %v7779_v4 }
 0x30a   : > { %v1810_v48 = vadd.f32 %v1809_v61, %v1808_v28  ;;  %4196 = vmatprep.subr.msk.bf16.mxu1 %vm5891_vm0, %v4064_v51 }
 0x30c   : > { %v1811_v22 = vadd.f32 %v1810_v48, %v1773_v58 }
 0x30d   : > { %4197 = vmatpush3.bf16.msk.msra.mxu1 %vm5711_vm3, %v4040_v35 }
 0x30e   : > { %1812 = vst [vmem:[#allocation6] sm:$0x1] %v1811_v22  ;;  %4198 = vmatprep.subr.msk.bf16.mxu1 %vm7860_vm10, %v4067_v2 }
 0x311   : > { %4199 = vmatpush3.bf16.msk.msra.mxu1 %vm7861_vm12, %v4043_v59 }
 0x314   : > { %1749 = vmatmul.mubr.bf16.vlgmr.msra.gmra.mxu1 %v1692_v38 }
 0x315   : > { %1756 = vmatprep.mubr.bf16.mxu1 %v1709_v0 }
 0x31c   : > { %1757 = vmatmul.mubr.bf16.gmra.mxu1 %v1693_v46 }
 0x3d4   : > { %v4200_v60 = vpop.f32.mrf.mxu1 }
 0x3d6   : > { %v4201_v29 = vpop.f32.mrf.mxu1 }
 0x3d7   : > { %v4202_v16 = vadd.f32 %v4201_v29, %v4200_v60 }
 0x3d8   : > { %v4203_v21 = vpop.f32.mrf.mxu1 }
 0x3d9   : > { %1769 = vst [vmem:[#allocation5] sm:$0xff] %v4202_v16 }
 0x3da   : > { %v4204_v53 = vpop.f32.mrf.mxu1 }
 0x3db   : > { %v4205_v9 = vadd.f32 %v4204_v53, %v4203_v21 }
 0x3dc   : > { %v4206_v40 = vpop.f32.mrf.mxu1 }
 0x3dd   : > { %1770 = vst [vmem:[#allocation5 + $0x18] sm:$0xff] %v4205_v9 }
 0x3de   : > { %v4207_v50 = vpop.f32.mrf.mxu1 }
 0x3df   : > { %v4208_v5 = vadd.f32 %v4207_v50, %v4206_v40 }
 0x3e0   : > { %v4209_v34 = vpop.f32.mrf.mxu1 }
 0x3e1   : > { %1771 = vst [vmem:[#allocation5 + $0x8] sm:$0xff] %v4208_v5  ;;  %1815 = sbr.rel (%p4069_p1) target bundleno = 1015 (0x3f7), region = 48 }
 0x3e2   : > { %v4210_v4 = vpop.f32.mrf.mxu1 }
 0x3e3   : > { %v4211_v26 = vadd.f32 %v4210_v4, %v4209_v34 }
 0x3e5   : > { %1772 = vst [vmem:[#allocation5 + $0x10] sm:$0xff] %v4211_v26 }
 0x3e6   : > { %vm1816_vm3 = vcmask 7168   ;;  %v7862_v30 = vld [vmem:[#allocation53_spill] sm:$0xff]  ;;  %v7863_v11 = vld [vmem:[#allocation54_spill] sm:$0xff]  ;;  %v7865_v6 = vld [vmem:[#allocation59_spill] sm:$0xff] }
 0x3e7   : > { %1817 = vst.msk [vmem:[%s4959_s19] sm:$0xff] %vm1816_vm3, %v5697_v41  ;;  %1818 = vst.msk [vmem:[%s4959_s19 + $0x8] sm:$0xff] %vm1816_vm3, %v5717_v36  ;;  %v7864_v24 = vld [vmem:[#allocation57_spill] sm:$0xff]  ;;  %v7866_v41 = vld [vmem:[#allocation55_spill] sm:$0xff] }
 0x3e8   : > { %1819 = vst.msk [vmem:[%s4959_s19 + $0x10] sm:$0xff] %vm1816_vm3, %v7862_v30  ;;  %1820 = vst.msk [vmem:[%s4959_s19 + $0x18] sm:$0xff] %vm1816_vm3, %v7863_v11  ;;  %v7867_v36 = vld [vmem:[#allocation56_spill] sm:$0xff]  ;;  %v7868_v39 = vld [vmem:[#allocation58_spill] sm:$0xff] }
 0x3e9   : > { %1821 = vst.msk [vmem:[%s4959_s19 + $0x20] sm:$0xff] %vm1816_vm3, %v7864_v24  ;;  %1822 = vst.msk [vmem:[%s4959_s19 + $0x28] sm:$0xff] %vm1816_vm3, %v7865_v6  ;;  %v7869_v23 = vld [vmem:[#allocation62_spill] sm:$0xff]  ;;  %v7870_v47 = vld [vmem:[#allocation60_spill] sm:$0xff] }
 0x3ea   : > { %1823 = vst.msk [vmem:[%s4959_s19 + $0x30] sm:$0xff] %vm1816_vm3, %v7866_v41  ;;  %1824 = vst.msk [vmem:[%s4959_s19 + $0x38] sm:$0xff] %vm1816_vm3, %v7867_v36  ;;  %v7871_v43 = vld [vmem:[#allocation61_spill] sm:$0xff]  ;;  %v7872_v63 = vld [vmem:[#allocation51_spill] sm:$0xff] }
 0x3eb   : > { %1825 = vst.msk [vmem:[%s4959_s19 + $0x40] sm:$0xff] %vm1816_vm3, %v7868_v39  ;;  %1826 = vst.msk [vmem:[%s4959_s19 + $0x48] sm:$0xff] %vm1816_vm3, %v7869_v23  ;;  %v7873_v3 = vld [vmem:[#allocation48_spill] sm:$0xff]  ;;  %v7874_v54 = vld [vmem:[#allocation63_spill] sm:$0xff] }
 0x3ec   : > { %1827 = vst.msk [vmem:[%s4959_s19 + $0x50] sm:$0xff] %vm1816_vm3, %v7870_v47  ;;  %1828 = vst.msk [vmem:[%s4959_s19 + $0x58] sm:$0xff] %vm1816_vm3, %v7871_v43  ;;  %v7875_v8 = vld [vmem:[#allocation46_spill] sm:$0xff]  ;;  %v7877_v32 = vld [vmem:[#allocation47_spill] sm:$0xff] }
 0x3ed   : > { %1829 = vst.msk [vmem:[%s4959_s19 + $0x60] sm:$0xff] %vm1816_vm3, %v7872_v63  ;;  %1830 = vst.msk [vmem:[%s4959_s19 + $0x68] sm:$0xff] %vm1816_vm3, %v7873_v3  ;;  %v7876_v13 = vld [vmem:[#allocation42_spill] sm:$0xff]  ;;  %v7878_v57 = vld [vmem:[#allocation40_spill] sm:$0xff] }
 0x3ee   : > { %1831 = vst.msk [vmem:[%s4959_s19 + $0x70] sm:$0xff] %vm1816_vm3, %v7874_v54  ;;  %1832 = vst.msk [vmem:[%s4959_s19 + $0x78] sm:$0xff] %vm1816_vm3, %v7875_v8  ;;  %v7879_v17 = vld [vmem:[#allocation45_spill] sm:$0xff]  ;;  %v7880_v31 = vld [vmem:[#allocation43_spill] sm:$0xff] }
 0x3ef   : > { %1833 = vst.msk [vmem:[%s4959_s19 + $0x80] sm:$0xff] %vm1816_vm3, %v7876_v13  ;;  %1834 = vst.msk [vmem:[%s4959_s19 + $0x88] sm:$0xff] %vm1816_vm3, %v7877_v32  ;;  %v7881_v1 = vld [vmem:[#allocation39_spill] sm:$0xff]  ;;  %v7882_v49 = vld [vmem:[#allocation41_spill] sm:$0xff] }
 0x3f0   : > { %1835 = vst.msk [vmem:[%s4959_s19 + $0x90] sm:$0xff] %vm1816_vm3, %v7878_v57  ;;  %1836 = vst.msk [vmem:[%s4959_s19 + $0x98] sm:$0xff] %vm1816_vm3, %v7879_v17  ;;  %v7883_v33 = vld [vmem:[#allocation37_spill] sm:$0xff]  ;;  %v7886_v56 = vld [vmem:[#allocation35_spill] sm:$0xff] }
 0x3f1   : > { %1837 = vst.msk [vmem:[%s4959_s19 + $0xa0] sm:$0xff] %vm1816_vm3, %v7880_v31  ;;  %1838 = vst.msk [vmem:[%s4959_s19 + $0xa8] sm:$0xff] %vm1816_vm3, %v7881_v1  ;;  %v7884_v42 = vld [vmem:[#allocation33_spill] sm:$0xff] }
 0x3f2   : > { %1839 = vst.msk [vmem:[%s4959_s19 + $0xb0] sm:$0xff] %vm1816_vm3, %v7882_v49  ;;  %1840 = vst.msk [vmem:[%s4959_s19 + $0xb8] sm:$0xff] %vm1816_vm3, %v7883_v33  ;;  %v7885_v10 = vld [vmem:[#allocation29_spill] sm:$0xff] }
 0x3f3   : > { %1841 = vst.msk [vmem:[%s4959_s19 + $0xc0] sm:$0xff] %vm1816_vm3, %v7884_v42  ;;  %1842 = vst.msk [vmem:[%s4959_s19 + $0xc8] sm:$0xff] %vm1816_vm3, %v7885_v10 }
 0x3f4   : > { %1843 = vst.msk [vmem:[%s4959_s19 + $0xd0] sm:$0xff] %vm1816_vm3, %v7886_v56  ;;  %1844 = vst.msk [vmem:[%s4959_s19 + $0xd8] sm:$0xff] %vm1816_vm3, %v5985_v7 }
 0x3f5   : > { %1845 = vst.msk [vmem:[%s4959_s19 + $0xe0] sm:$0xff] %vm1816_vm3, %v6042_v44  ;;  %1846 = vst.msk [vmem:[%s4959_s19 + $0xe8] sm:$0xff] %vm1816_vm3, %v6044_v55 }
 0x3f6   : > { %1847 = vst.msk [vmem:[%s4959_s19 + $0xf0] sm:$0xff] %vm1816_vm3, %v6009_v52  ;;  %1848 = vst.msk [vmem:[%s4959_s19 + $0xf8] sm:$0xff] %vm1816_vm3, %v6011_v19 }
 0x3f7 PF: > { %v1849_v18 = vld [vmem:[#allocation6] sm:$0x1]  ;;  %v7887_v20 = vlaneseq  ;;  %v7888_v7 = vmov 0   ;;  %v1852_v55 = vld [vmem:[#allocation5 + $0x18] sm:$0xff]  ;;  %v1868_v19 = vld [vmem:[#allocation2] sm:$0xff] }
 0x3f8   : > { %v1855_v15 = vmax.f32 %v1849_v18, 1.0  ;;  %vm1850_vm1 = vcmp.gt.f32.partialorder %v1849_v18, 0.0  ;;  %v1851_v25 = vld [vmem:[#allocation5] sm:$0xff]  ;;  %v1870_v61 = vld [vmem:[#allocation2 + $0x8] sm:$0xff] }
 0x3f9   : > { %v1858_v14 = vshrl.u32 %v7887_v20, 7  ;;  %v1871_v44 = vsel %vm1850_vm1, 1, %v7888_v7  ;;  %v1853_v62 = vld [vmem:[#allocation5 + $0x8] sm:$0xff]  ;;  %v1867_v52 = vld [vmem:[#allocation2 + $0x10] sm:$0xff] }
 0x3fa   : > { %v1869_v51 = vld [vmem:[#allocation2 + $0x18] sm:$0xff] }
 0x3fb   : > { %v1859_v45 = vsub.s32 0, %v1858_v14 }
 0x3fd   : > { %v1860_v37 = vrot.slane %v1855_v15, %v1859_v45  ;;  %v1875_v27 = vrot.slane %v1871_v44, %v1859_v45  ;;  %v1854_v28 = vld [vmem:[#allocation5 + $0x10] sm:$0xff] }
 0x3ff   : > { %4476 = vrcp.f32 %v1860_v37  ;;  %vm1876_vm2 = vcmp.eq.s32.totalorder %v1875_v27, 1 }
 0x40c   : > { %v4477_v12 = vpop.eup %4476 }
 0x40d   : > { %v1863_v58 = vmul.f32 %v4477_v12, %v1851_v25  ;;  %v1864_v48 = vmul.f32 %v4477_v12, %v1852_v55  ;;  %v1865_v35 = vmul.f32 %v4477_v12, %v1853_v62  ;;  %v1866_v2 = vmul.f32 %v4477_v12, %v1854_v28 }
 0x40f   : > { %v1877_v22 = vsel %vm1876_vm2, %v1863_v58, %v1867_v52  ;;  %v1878_v59 = vsel %vm1876_vm2, %v1864_v48, %v1868_v19  ;;  %v1879_v38 = vsel %vm1876_vm2, %v1865_v35, %v1869_v51  ;;  %v1880_v0 = vsel %vm1876_vm2, %v1866_v2, %v1870_v61 }
 0x410   : > { %1881 = vst [vmem:[#allocation2 + $0x10] sm:$0xff] %v1877_v22  ;;  %1882 = vst [vmem:[#allocation2] sm:$0xff] %v1878_v59 }
 0x411   : > { %1883 = vst [vmem:[#allocation2 + $0x18] sm:$0xff] %v1879_v38  ;;  %1884 = vst [vmem:[#allocation2 + $0x8] sm:$0xff] %v1880_v0 }
 0x412 PF: > { %p4070_p2 = scmp.ne.s32.totalorder %s4798_s24, 20 }
 0x414   : > { %1888 = sbr.rel (%p4070_p2) target bundleno = 1629 (0x65d), region = 52 }
 0x419   : > { %v6216_v46 = vld [vmem:[#allocation2 + $0x10] sm:$0xff]  ;;  %v1963_v60 = vld [vmem:[%s4946_s12] sm:$0xff]  ;;  %v4818_v16 = vmov 0   ;;  %v3183_v21 = vld [vmem:[#allocation2 + $0x18] sm:$0xff]  ;;  %vm2123_vm0 = vcmask 261120  }
 0x41a   : > { %v6219_v29 = vld [vmem:[#allocation2] sm:$0xff]  ;;  %3185 = vxpose.xlu0.b32.start [1/4] (short) %v6216_v46, 128  ;;  %4478 = vset.pattern.permute.xlu1 %v4818_v16  ;;  %v1917_v9 = vmul.f32 %v6216_v46, %v6216_v46  ;;  %v1964_v50 = vld [vmem:[%s4946_s12 + $0x8] sm:$0xff]  ;;  %v1919_v34 = vmul.f32 %v3183_v21, %v3183_v21  ;;  %v1965_v6 = vld [vmem:[%s4946_s12 + $0x10] sm:$0xff] }
 0x41b   : > { %v4157_v53 = vpack.c.bf16 %v6219_v29, %v6216_v46  ;;  %v1918_v40 = vmul.f32 %v6219_v29, %v6219_v29  ;;  %2335 = vperm.xlu1 %4478, %v1963_v60   ;;  %v3184_v5 = vld [vmem:[#allocation2 + $0x8] sm:$0xff]  ;;  %v4482_v26 = vld [vmem:[%s4941_s29] sm:$0xff]   ;;  %v1966_v36 = vld [vmem:[%s4946_s12 + $0x18] sm:$0xff] }
 0x41c   : > { %v4162_v4 = vpack.c.bf16 %v3184_v5, %v3183_v21  ;;  %v1920_v30 = vmul.f32 %v3184_v5, %v3184_v5  ;;  %4290 = vmatprep.mubr.msk.bf16.mxu0 %vm2123_vm0, %v4482_v26  ;;  %v1968_v47 = vld [vmem:[%s4946_s12 + $0x28] sm:$0xff]  ;;  %v4490_v43 = vld [vmem:[%s4941_s29 + $0x60] sm:$0xff]   ;;  %v1969_v3 = vld [vmem:[%s4946_s12 + $0x30] sm:$0xff] }
 0x41d   : > { %4158 = vst [vmem:[#allocation3] sm:$0xff] %v4157_v53   ;;  %v1921_v11 = vadd.f32 %v1918_v40, %v1917_v9  ;;  %v4483_v63 = vld [vmem:[%s4941_s29 + $0x8] sm:$0xff]   ;;  %4314 = vmatprep.mubr.msk.bf16.mxu1 %vm2123_vm0, %v4490_v43  ;;  %v4484_v54 = vld [vmem:[%s4941_s29 + $0x10] sm:$0xff]   ;;  %v1970_v32 = vld [vmem:[%s4946_s12 + $0x38] sm:$0xff] }
 0x41e   : > { %3186 = vxpose.xlu0.b32.cont [2/4] (short) %v6219_v29, 128  ;;  %4165 = vst [vmem:[#allocation3 + $0x8] sm:$0xff] %v4162_v4   ;;  %v4491_v8 = vld [vmem:[%s4941_s29 + $0x68] sm:$0xff]   ;;  %v4494_v13 = vld [vmem:[%s4941_s29 + $0x70] sm:$0xff]   ;;  %v4485_v57 = vld [vmem:[%s4941_s29 + $0x18] sm:$0xff]  }
 0x41f   : > { %v1922_v24 = vadd.f32 %v1921_v11, %v1919_v34  ;;  %2340 = vperm.xlu1 %4478, %v1964_v50   ;;  %v1971_v17 = vld [vmem:[%s4946_s12 + $0x40] sm:$0xff]  ;;  %v4495_v1 = vld [vmem:[%s4941_s29 + $0x78] sm:$0xff]   ;;  %v1972_v49 = vld [vmem:[%s4946_s12 + $0x48] sm:$0xff] }
 0x420   : > { %v4486_v31 = vld [vmem:[%s4941_s29 + $0x20] sm:$0xff]   ;;  %v4487_v33 = vld [vmem:[%s4941_s29 + $0x28] sm:$0xff]   ;;  %v1973_v42 = vld [vmem:[%s4946_s12 + $0x50] sm:$0xff] }
 0x421   : > { %v6234_v41 = vadd.f32 %v1922_v24, %v1920_v30  ;;  %v4488_v10 = vld [vmem:[%s4941_s29 + $0x30] sm:$0xff]   ;;  %v1974_v56 = vld [vmem:[%s4946_s12 + $0x58] sm:$0xff]  ;;  %v1975_v20 = vld [vmem:[%s4946_s12 + $0x60] sm:$0xff] }
 0x422   : > { %3187 = vxpose.xlu0.b32.cont [3/4] (short) %v3183_v21, 128  ;;  %v4489_v18 = vld [vmem:[%s4941_s29 + $0x38] sm:$0xff]   ;;  %v4492_v14 = vld [vmem:[%s4941_s29 + $0x40] sm:$0xff]   ;;  %v1976_v15 = vld [vmem:[%s4946_s12 + $0x68] sm:$0xff] }
 0x423   : > { %2345 = vperm.xlu1 %4478, %v1965_v6   ;;  %v4493_v45 = vld [vmem:[%s4941_s29 + $0x48] sm:$0xff]   ;;  %v1977_v37 = vld [vmem:[%s4946_s12 + $0x70] sm:$0xff]  ;;  %v1978_v44 = vld [vmem:[%s4946_s12 + $0x78] sm:$0xff] }
 0x424   : > { %v4481_v39 = vld [vmem:[#allocation3] sm:$0xff]   ;;  %v4496_v7 = vld [vmem:[%s4941_s29 + $0x50] sm:$0xff]   ;;  %v4497_v27 = vld [vmem:[%s4941_s29 + $0x58] sm:$0xff]  }
 0x425   : > { %v4480_v23 = vld [vmem:[#allocation3 + $0x8] sm:$0xff]   ;;  %v1979_v25 = vld [vmem:[%s4946_s12 + $0x80] sm:$0xff]  ;;  %v1981_v62 = vld [vmem:[%s4946_s12 + $0x90] sm:$0xff] }
 0x426   : > { %3188 = vxpose.xlu0.b32.end [4/4] (short) %v3184_v5, 128  ;;  %4286 = vmatprep.subr.bf16.mxu0 %v4480_v23  ;;  %v1980_v55 = vld [vmem:[%s4946_s12 + $0x88] sm:$0xff]  ;;  %v1982_v28 = vld [vmem:[%s4946_s12 + $0x98] sm:$0xff]  ;;  %v1983_v52 = vld [vmem:[%s4946_s12 + $0xa0] sm:$0xff] }
 0x427   : > { %2350 = vperm.xlu1 %4478, %v1966_v36   ;;  %4287 = vmatpush3.bf16.msra.mxu0 %v4480_v23  ;;  %v1984_v12 = vld [vmem:[%s4946_s12 + $0xa8] sm:$0xff]  ;;  %v1985_v19 = vld [vmem:[%s4946_s12 + $0xb0] sm:$0xff]  ;;  %v1986_v51 = vld [vmem:[%s4946_s12 + $0xb8] sm:$0xff] }
 0x428   : > { %4354 = vmatprep.subr.bf16.mxu1 %v4480_v23  ;;  %4288 = vmatprep.subr.bf16.mxu0 %v4481_v39  ;;  %v1987_v61 = vld [vmem:[%s4946_s12 + $0xc0] sm:$0xff]  ;;  %v1988_v58 = vld [vmem:[%s4946_s12 + $0xc8] sm:$0xff]  ;;  %v1989_v35 = vld [vmem:[%s4946_s12 + $0xd0] sm:$0xff] }
 0x429   : > { %4356 = vmatpush3.bf16.msra.mxu1 %v4480_v23  ;;  %v1967_v48 = vld [vmem:[%s4946_s12 + $0x20] sm:$0xff]  ;;  %v1990_v22 = vld [vmem:[%s4946_s12 + $0xd8] sm:$0xff]  ;;  %v1993_v59 = vld [vmem:[%s4946_s12 + $0xf0] sm:$0xff] }
 0x42a   : > { %4355 = vmatprep.subr.bf16.mxu1 %v4481_v39  ;;  %v1991_v2 = vld [vmem:[%s4946_s12 + $0xe0] sm:$0xff]  ;;  %v1992_v38 = vld [vmem:[%s4946_s12 + $0xe8] sm:$0xff]  ;;  %v1997_v60 = vld [vmem:[%s4959_s19 + $0x10] sm:$0xff] }
 0x42b   : > { %2360 = vperm.xlu1 %4478, %v1968_v47   ;;  %4289 = vmatpush3.bf16.msra.mxu0 %v4481_v39  ;;  %v1995_v0 = vld [vmem:[%s4959_s19] sm:$0xff]  ;;  %v2001_v53 = vld [vmem:[%s4959_s19 + $0x30] sm:$0xff]  ;;  %v2000_v9 = vld [vmem:[%s4959_s19 + $0x28] sm:$0xff] }
 0x42c   : > { %v2002_v34 = vld [vmem:[%s4959_s19 + $0x38] sm:$0xff]  ;;  %v2005_v30 = vld [vmem:[%s4959_s19 + $0x50] sm:$0xff]  ;;  %v2004_v11 = vld [vmem:[%s4959_s19 + $0x48] sm:$0xff] }
 0x42d   : > { %4357 = vmatpush3.bf16.msra.mxu1 %v4481_v39  ;;  %v2007_v36 = vld [vmem:[%s4959_s19 + $0x60] sm:$0xff]  ;;  %v2006_v39 = vld [vmem:[%s4959_s19 + $0x58] sm:$0xff]  ;;  %v2009_v43 = vld [vmem:[%s4959_s19 + $0x70] sm:$0xff] }
 0x42e   : > { %4322 = vmatprep.subr.mxu1 %v3184_v5  ;;  %4291 = vmatmul.mubr.msk.bf16.vlgmr.msra.gmra.mxu0 %vm2123_vm0, %v4483_v63  ;;  %v2008_v63 = vld [vmem:[%s4959_s19 + $0x68] sm:$0xff] }
 0x42f   : > { %2365 = vperm.xlu1 %4478, %v1969_v3   ;;  %4294 = vmatprep.mubr.msk.bf16.mxu0 %vm2123_vm0, %v4484_v54 }
 0x430   : > { %4315 = vmatmul.mubr.msk.bf16.vlgmr.msra.gmra.mxu1 %vm2123_vm0, %v4491_v8  ;;  %v2011_v8 = vld [vmem:[%s4959_s19 + $0x80] sm:$0xff] }
 0x431   : > { %4318 = vmatprep.mubr.msk.bf16.mxu1 %vm2123_vm0, %v4494_v13  ;;  %4323 = vmatpush3.msra.mxu1 %v3184_v5  ;;  %v2003_v5 = vld [vmem:[%s4959_s19 + $0x40] sm:$0xff]  ;;  %v2010_v13 = vld [vmem:[%s4959_s19 + $0x78] sm:$0xff] }
 0x432   : > { %4324 = vmatprep.subr.mxu1 %v3183_v21 }
 0x433   : > { %2370 = vperm.xlu1 %4478, %v1970_v32   ;;  %4325 = vmatpush3.msra.mxu1 %v3183_v21  ;;  %v1998_v21 = vld [vmem:[%s4959_s19 + $0x18] sm:$0xff] }
 0x434   : > { %4326 = vmatprep.subr.mxu1 %v6219_v29 }
 0x435   : > { %4327 = vmatpush3.msra.mxu1 %v6219_v29  ;;  %v1996_v29 = vld [vmem:[%s4959_s19 + $0x8] sm:$0xff] }
 0x436   : > { %4328 = vmatprep.subr.mxu1 %v6216_v46  ;;  %4295 = vmatmul.mubr.msk.bf16.gmra.mxu0 %vm2123_vm0, %v4485_v57 }
 0x437   : > { %2375 = vperm.xlu1 %4478, %v1971_v17   ;;  %4298 = vmatprep.mubr.msk.bf16.mxu0 %vm2123_vm0, %v4486_v31  ;;  %v2013_v17 = vld [vmem:[%s4959_s19 + $0x90] sm:$0xff]  ;;  %v2012_v31 = vld [vmem:[%s4959_s19 + $0x88] sm:$0xff] }
 0x438   : > { %4319 = vmatmul.mubr.msk.bf16.gmra.mxu1 %vm2123_vm0, %v4495_v1 }
 0x439   : > { %4329 = vmatpush3.msra.mxu1 %v6216_v46  ;;  %v1994_v46 = vld [vmem:[%s4946_s12 + $0xf8] sm:$0xff] }
 0x43b   : > { %2380 = vperm.xlu1 %4478, %v1972_v49  }
 0x43e   : > { %4299 = vmatmul.mubr.msk.bf16.gmra.mxu0 %vm2123_vm0, %v4487_v33  ;;  %v2015_v33 = vld [vmem:[%s4959_s19 + $0xa0] sm:$0xff] }
 0x43f   : > { %2385 = vperm.xlu1 %4478, %v1973_v42   ;;  %4302 = vmatprep.mubr.msk.bf16.mxu0 %vm2123_vm0, %v4488_v10  ;;  %v2014_v42 = vld [vmem:[%s4959_s19 + $0x98] sm:$0xff] }
 0x443   : > { %2390 = vperm.xlu1 %4478, %v1974_v56  }
 0x446   : > { %4303 = vmatmul.mubr.msk.bf16.gmra.mxu0 %vm2123_vm0, %v4489_v18  ;;  %v2017_v18 = vld [vmem:[%s4959_s19 + $0xb0] sm:$0xff] }
 0x447   : > { %2395 = vperm.xlu1 %4478, %v1975_v20   ;;  %4306 = vmatprep.mubr.msk.bf16.mxu0 %vm2123_vm0, %v4492_v14  ;;  %v2016_v20 = vld [vmem:[%s4959_s19 + $0xa8] sm:$0xff] }
 0x44b   : > { %2400 = vperm.xlu1 %4478, %v1976_v15  }
 0x44e   : > { %4307 = vmatmul.mubr.msk.bf16.gmra.mxu0 %vm2123_vm0, %v4493_v45  ;;  %v2021_v45 = vld [vmem:[%s4959_s19 + $0xd0] sm:$0xff] }
 0x44f   : > { %2405 = vperm.xlu1 %4478, %v1977_v37   ;;  %4310 = vmatprep.mubr.msk.bf16.mxu0 %vm2123_vm0, %v4496_v7  ;;  %v2018_v37 = vld [vmem:[%s4959_s19 + $0xb8] sm:$0xff] }
 0x450   : > { %4479 = vset.pattern.permute.xlu0 %v4818_v16  ;;  %v1999_v16 = vld [vmem:[%s4959_s19 + $0x20] sm:$0xff] }
 0x453   : > { %2410 = vperm.xlu1 %4478, %v1978_v44  }
 0x456   : > { %4311 = vmatmul.mubr.msk.bf16.gmra.mxu0 %vm2123_vm0, %v4497_v27  ;;  %v2019_v27 = vld [vmem:[%s4959_s19 + $0xc0] sm:$0xff] }
 0x457   : > { %2415 = vperm.xlu1 %4478, %v1979_v25   ;;  %v2023_v25 = vld [vmem:[%s4959_s19 + $0xe0] sm:$0xff] }
 0x45b   : > { %2420 = vperm.xlu1 %4478, %v1980_v55  }
 0x45f   : > { %2425 = vperm.xlu1 %4478, %v1981_v62  }
 0x463   : > { %2430 = vperm.xlu1 %4478, %v1982_v28   ;;  %v2020_v28 = vld [vmem:[%s4959_s19 + $0xc8] sm:$0xff] }
 0x467   : > { %2435 = vperm.xlu1 %4478, %v1983_v52  }
 0x46b   : > { %2440 = vperm.xlu1 %4478, %v1984_v12  }
 0x46f   : > { %2445 = vperm.xlu1 %4478, %v1985_v19   ;;  %v2022_v19 = vld [vmem:[%s4959_s19 + $0xd8] sm:$0xff] }
 0x473   : > { %2450 = vperm.xlu1 %4478, %v1986_v51  }
 0x477   : > { %2455 = vperm.xlu1 %4478, %v1987_v61  }
 0x47b   : > { %2460 = vperm.xlu1 %4478, %v1988_v58   ;;  %v2024_v58 = vld [vmem:[%s4959_s19 + $0xe8] sm:$0xff] }
 0x47f   : > { %2355 = vperm.xlu0 %4479, %v1967_v48   ;;  %2465 = vperm.xlu1 %4478, %v1989_v35  }
 0x483   : > { %2475 = vperm.xlu0 %4479, %v1991_v2   ;;  %2470 = vperm.xlu1 %4478, %v1990_v22  }
 0x487   : > { %2485 = vperm.xlu0 %4479, %v1993_v59   ;;  %2480 = vperm.xlu1 %4478, %v1992_v38  }
 0x48b   : > { %2848 = vperm.xlu0 %4479, %v1995_v0   ;;  %2490 = vperm.xlu1 %4478, %v1994_v46   ;;  %v1924_v46 = vrot.slane %v6234_v41, 4 }
 0x48f   : > { %2854 = vperm.xlu0 %4479, %v1997_v60   ;;  %2851 = vperm.xlu1 %4478, %v1996_v29   ;;  %v1925_v29 = vadd.f32 %v1924_v46, %v6234_v41 }
 0x493   : > { %2860 = vperm.xlu0 %4479, %v1999_v16   ;;  %2857 = vperm.xlu1 %4478, %v1998_v21   ;;  %v1926_v21 = vrot.slane %v1925_v29, 2 }
 0x496   : > { %v3201_v40 = vpop.trf.xlu0  ;;  %v6307_v50 = vpop.permute.xlu1 %2335 }
 0x497   : > { %2866 = vperm.xlu0 %4479, %v2001_v53   ;;  %2863 = vperm.xlu1 %4478, %v2000_v9   ;;  %v1927_v9 = vadd.f32 %v1926_v21, %v1925_v29 }
 0x498   : > { %4330 = vmatprep.mubr.msk.f32.mxu1 %vm2123_vm0, %v3201_v40 }
 0x49a   : > { %v3202_v4 = vpop.trf.xlu0  ;;  %v6312_v26 = vpop.permute.xlu1 %2340 }
 0x49b   : > { %2872 = vperm.xlu0 %4479, %v2003_v5   ;;  %2869 = vperm.xlu1 %4478, %v2002_v34   ;;  %v1928_v5 = vrot.slane %v1927_v9, 1 }
 0x49c   : > { %4331 = vmatmul.mubr.msk.f32.vlgmr.msra.gmra.mxu1 %vm2123_vm0, %v3202_v4 }
 0x49d   : > { %v6392_v4 = vadd.f32 %v1928_v5, %v1927_v9 }
 0x49e   : > { %v3203_v24 = vpop.trf.xlu0  ;;  %v6317_v6 = vpop.permute.xlu1 %2345 }
 0x49f   : > { %2878 = vperm.xlu0 %4479, %v2005_v30   ;;  %2875 = vperm.xlu1 %4478, %v2004_v11   ;;  %v2495_v41 = vadd.f32 %v6317_v6, %v6392_v4 }
 0x4a0   : > { %4333 = vmatprep.mubr.msk.f32.mxu1 %vm2123_vm0, %v3203_v24  ;;  %v2493_v24 = vadd.f32 %v6307_v50, %v6392_v4 }
 0x4a2   : > { %v3204_v23 = vpop.trf.xlu0  ;;  %v6322_v47 = vpop.permute.xlu1 %2350 }
 0x4a3   : > { %2884 = vperm.xlu0 %4479, %v2007_v36   ;;  %2881 = vperm.xlu1 %4478, %v2006_v39  }
 0x4a4   : > { %4334 = vmatmul.mubr.msk.f32.gmra.mxu1 %vm2123_vm0, %v3204_v23 }
 0x4a6   : > { %v3205_v3 = vpop.trf.xlu0  ;;  %v6327_v54 = vpop.permute.xlu1 %2360 }
 0x4a7   : > { %2890 = vperm.xlu0 %4479, %v2009_v43   ;;  %2887 = vperm.xlu1 %4478, %v2008_v63   ;;  %v6439_v9 = vadd.f32 %v6327_v54, %v6392_v4 }
 0x4a8   : > { %4336 = vmatprep.mubr.msk.f32.mxu1 %vm2123_vm0, %v3205_v3 }
 0x4aa   : > { %v3206_v32 = vpop.trf.xlu0  ;;  %v6332_v57 = vpop.permute.xlu1 %2365 }
 0x4ab   : > { %2896 = vperm.xlu0 %4479, %v2011_v8   ;;  %2893 = vperm.xlu1 %4478, %v2010_v13  }
 0x4ac   : > { %4337 = vmatmul.mubr.msk.f32.gmra.mxu1 %vm2123_vm0, %v3206_v32 }
 0x4ae   : > { %v3207_v1 = vpop.trf.xlu0  ;;  %v6337_v49 = vpop.permute.xlu1 %2370 }
 0x4af   : > { %2902 = vperm.xlu0 %4479, %v2013_v17   ;;  %2899 = vperm.xlu1 %4478, %v2012_v31  }
 0x4b0   : > { %4339 = vmatprep.mubr.msk.f32.mxu1 %vm2123_vm0, %v3207_v1  ;;  %v2494_v1 = vadd.f32 %v6312_v26, %v6392_v4 }
 0x4b2   : > { %v3208_v10 = vpop.trf.xlu0  ;;  %v6342_v56 = vpop.permute.xlu1 %2375 }
 0x4b3   : > { %2908 = vperm.xlu0 %4479, %v2015_v33   ;;  %2905 = vperm.xlu1 %4478, %v2014_v42  }
 0x4b4   : > { %4340 = vmatmul.mubr.msk.f32.gmra.mxu1 %vm2123_vm0, %v3208_v10 }
 0x4b6   : > { %v3209_v14 = vpop.trf.xlu0  ;;  %v6347_v15 = vpop.permute.xlu1 %2380 }
 0x4b7   : > { %2914 = vperm.xlu0 %4479, %v2017_v18   ;;  %2911 = vperm.xlu1 %4478, %v2016_v20  }
 0x4b8   : > { %4342 = vmatprep.mubr.msk.f32.mxu1 %vm2123_vm0, %v3209_v14 }
 0x4ba   : > { %v3210_v7 = vpop.trf.xlu0  ;;  %v6352_v44 = vpop.permute.xlu1 %2385 }
 0x4bb   : > { %2926 = vperm.xlu0 %4479, %v2021_v45   ;;  %2917 = vperm.xlu1 %4478, %v2018_v37  }
 0x4bc   : > { %4343 = vmatmul.mubr.msk.f32.gmra.mxu1 %vm2123_vm0, %v3210_v7 }
 0x4be   : > { %v3211_v55 = vpop.trf.xlu0  ;;  %v6357_v62 = vpop.permute.xlu1 %2390 }
 0x4bf   : > { %7889 = vst [vmem:[#allocation64_spill] sm:$0xff] %v6357_v62  ;;  %2920 = vperm.xlu1 %4478, %v2019_v27   ;;  %4345 = vmatprep.mubr.msk.f32.mxu1 %vm2123_vm0, %v3211_v55  ;;  %v2496_v55 = vadd.f32 %v6322_v47, %v6392_v4 }
 0x4c0   : > { %2932 = vperm.xlu0 %4479, %v2023_v25  }
 0x4c2   : > { %v3212_v52 = vpop.trf.xlu0  ;;  %v6361_v12 = vpop.permute.xlu1 %2395 }
 0x4c3   : > { %7890 = vst [vmem:[#allocation65_spill] sm:$0xff] %v6361_v12  ;;  %2923 = vperm.xlu1 %4478, %v2020_v28   ;;  %4346 = vmatmul.mubr.msk.f32.gmra.mxu1 %vm2123_vm0, %v3212_v52 }
 0x4c6   : > { %v3213_v51 = vpop.trf.xlu0  ;;  %v6365_v61 = vpop.permute.xlu1 %2400 }
 0x4c7   : > { %7891 = vst [vmem:[#allocation66_spill] sm:$0xff] %v6365_v61  ;;  %2929 = vperm.xlu1 %4478, %v2022_v19   ;;  %4348 = vmatprep.mubr.msk.f32.mxu1 %vm2123_vm0, %v3213_v51  ;;  %v7685_v51 = vlaneseq }
 0x4ca   : > { %v3214_v48 = vpop.trf.xlu0  ;;  %v6369_v35 = vpop.permute.xlu1 %2405 }
 0x4cb   : > { %7892 = vst [vmem:[#allocation67_spill] sm:$0xff] %v6369_v35  ;;  %2935 = vperm.xlu1 %4478, %v2024_v58   ;;  %4349 = vmatmul.mubr.msk.f32.gmra.mxu1 %vm2123_vm0, %v3214_v48 }
 0x4ce   : > { %v3215_v2 = vpop.trf.xlu0  ;;  %v6372_v22 = vpop.permute.xlu1 %2410 }
 0x4cf   : > { %7893 = vst [vmem:[#allocation68_spill] sm:$0xff] %v6372_v22  ;;  %4351 = vmatprep.mubr.msk.f32.mxu1 %vm2123_vm0, %v3215_v2 }
 0x4d2   : > { %v3216_v59 = vpop.trf.xlu0  ;;  %v6375_v38 = vpop.permute.xlu1 %2415 }
 0x4d3   : > { %7894 = vst [vmem:[#allocation69_spill] sm:$0xff] %v6375_v38  ;;  %4352 = vmatmul.mubr.msk.f32.gmra.mxu1 %vm2123_vm0, %v3216_v59 }
 0x4d6   : > { %v6378_v0 = vpop.permute.xlu1 %2420 }
 0x4d7   : > { %7895 = vst [vmem:[#allocation70_spill] sm:$0xff] %v6378_v0 }
 0x4da   : > { %v6381_v60 = vpop.permute.xlu1 %2425 }
 0x4db   : > { %7896 = vst [vmem:[#allocation71_spill] sm:$0xff] %v6381_v60 }
 0x4de   : > { %v6384_v16 = vpop.permute.xlu1 %2430 }
 0x4df   : > { %7897 = vst [vmem:[#allocation72_spill] sm:$0xff] %v6384_v16 }
 0x4e2   : > { %v6386_v53 = vpop.permute.xlu1 %2435 }
 0x4e3   : > { %7898 = vst [vmem:[#allocation73_spill] sm:$0xff] %v6386_v53 }
 0x4e6   : > { %v6388_v40 = vpop.permute.xlu1 %2440 }
 0x4e7   : > { %7899 = vst [vmem:[#allocation74_spill] sm:$0xff] %v6388_v40 }
 0x4ea   : > { %v6390_v34 = vpop.permute.xlu1 %2445 }
 0x4eb   : > { %7900 = vst [vmem:[#allocation75_spill] sm:$0xff] %v6390_v34 }
 0x4ee   : > { %v6394_v30 = vpop.permute.xlu1 %2450  ;;  %v4292_v11 = vpop.f32.mrf.mxu0 }
 0x4ef   : > { %7901 = vst [vmem:[#allocation76_spill] sm:$0xff] %v6394_v30  ;;  %v2527_v36 = vmul.f32 2.0, %v4292_v11  ;;  %v6442_v11 = vand.u32 127, %v7685_v51 }
 0x4f0   : > { %v4316_v39 = vpop.f32.mrf.mxu1  ;;  %v2206_v23 = vpop.f32.mrf.mxu0 }
 0x4f1   : > { %v2525_v43 = vmul.f32 2.0, %v2206_v23  ;;  %v2559_v17 = vsub.f32 %v2495_v41, %v2527_v36  ;;  %v6427_v58 = vmul.f32 2.0, %v4316_v39  ;;  %v2499_v41 = vadd.f32 %v6332_v57, %v6392_v4 }
 0x4f2   : > { %v6400_v63 = vpop.permute.xlu1 %2455  ;;  %v2302_v3 = vpop.f32.mrf.mxu1  ;;  %v2500_v36 = vadd.f32 %v6337_v49, %v6392_v4 }
 0x4f3   : > { %7902 = vst [vmem:[#allocation77_spill] sm:$0xff] %v6400_v63  ;;  %v6404_v8 = vadd.f32 %v6400_v63, %v6392_v4  ;;  %v4293_v13 = vpop.f32.mrf.mxu0  ;;  %v6406_v32 = vmul.f32 2.0, %v2302_v3  ;;  %v2557_v31 = vsub.f32 %v2493_v24, %v2525_v43  ;;  %v6416_v45 = vmax.f32 %v2559_v17, 0.0 }
 0x4f4   : > { %v2528_v48 = vmul.f32 2.0, %v4293_v13  ;;  %v6454_v3 = vadd.f32 %v6342_v56, %v6392_v4  ;;  %v6458_v13 = vadd.f32 %v6347_v15, %v6392_v4  ;;  %v6462_v17 = vadd.f32 %v6352_v44, %v6392_v4 }
 0x4f5   : > { %v2209_v33 = vpop.f32.mrf.mxu0  ;;  %v6412_v10 = vmax.f32 %v2557_v31, 0.0  ;;  %v6466_v31 = vadd.f32 %v6357_v62, %v6392_v4  ;;  %vm2637_vm13 = vcmp.eq.f32.partialorder %v6416_v45, inf  ;;  %vm2639_vm14 = vcmp.eq.f32.partialorder %v6416_v45, 0.0 }
 0x4f6   : > { %v6414_v18 = vpop.permute.xlu1 %2460  ;;  %v2526_v20 = vmul.f32 2.0, %v2209_v33  ;;  %v2560_v5 = vsub.f32 %v2496_v55, %v2528_v48  ;;  %v6470_v33 = vadd.f32 %v6361_v12, %v6392_v4  ;;  %v6494_v55 = vadd.f32 %v6381_v60, %v6392_v4 }
 0x4f7   : > { %7903 = vst [vmem:[#allocation78_spill] sm:$0xff] %v6414_v18  ;;  %v4296_v14 = vpop.f32.mrf.mxu0  ;;  %4498 = vrsqrt.f32 %v6412_v10  ;;  %vm2623_vm5 = vcmp.eq.f32.partialorder %v6412_v10, inf  ;;  %vm2625_vm15 = vcmp.eq.f32.partialorder %v6412_v10, 0.0 }
 0x4f8   : > { %v2558_v37 = vsub.f32 %v2494_v1, %v2526_v20  ;;  %4500 = vrsqrt.f32 %v6416_v45  ;;  %v2531_v39 = vmul.f32 2.0, %v4296_v14  ;;  %v4317_v1 = vpop.f32.mrf.mxu1  ;;  %v6474_v20 = vadd.f32 %v6365_v61, %v6392_v4 }
 0x4f9   : > { %v2222_v7 = vpop.f32.mrf.mxu0  ;;  %v6478_v14 = vadd.f32 %v6369_v35, %v6392_v4  ;;  %v6496_v48 = vmax.f32 %v2560_v5, 0.0 }
 0x4fa   : > { %v2529_v27 = vmul.f32 2.0, %v2222_v7  ;;  %v6419_v25 = vpop.permute.xlu0 %2355  ;;  %v6423_v28 = vmax.f32 %v2558_v37, 0.0  ;;  %v6425_v52 = vpop.permute.xlu1 %2465  ;;  %v6482_v37 = vadd.f32 %v6372_v22, %v6392_v4  ;;  %v6486_v7 = vadd.f32 %v6375_v38, %v6392_v4 }
 0x4fb   : > { %7904 = vst [vmem:[#allocation79_spill] sm:$0xff] %v6425_v52  ;;  %v4297_v19 = vpop.f32.mrf.mxu0  ;;  %v2497_v2 = vadd.f32 %v6419_v25, %v6392_v4  ;;  %v6434_v59 = vadd.f32 %v6425_v52, %v6392_v4  ;;  %v2563_v51 = vsub.f32 %v2499_v41, %v2531_v39  ;;  %v6507_v52 = vadd.f32 %v6386_v53, %v6392_v4 }
 0x4fc   : > { %4502 = vrsqrt.f32 %v6423_v28  ;;  %v2532_v24 = vmul.f32 2.0, %v4297_v19  ;;  %v6517_v41 = vadd.f32 %v6390_v34, %v6392_v4  ;;  %v6521_v19 = vadd.f32 %v6394_v30, %v6392_v4 }
 0x4fd   : > { %v2225_v46 = vpop.f32.mrf.mxu0  ;;  %v2561_v29 = vsub.f32 %v2497_v2, %v2529_v27  ;;  %v6490_v27 = vadd.f32 %v6378_v0, %v6392_v4  ;;  %v2305_v0 = vpop.f32.mrf.mxu1  ;;  %v6523_v39 = vmul.f32 2.0, %v4317_v1  ;;  %v6531_v53 = vmax.f32 %v2563_v51, 0.0 }
 0x4fe   : > { %v2530_v5 = vmul.f32 2.0, %v2225_v46  ;;  %v6528_v46 = vpop.permute.xlu0 %2475  ;;  %v2564_v34 = vsub.f32 %v2500_v36, %v2532_v24  ;;  %v2640_v30 = vand.u32 2147483648, %v6416_v45  ;;  %v6539_v38 = vadd.f32 %v6414_v18, %v6392_v4 }
 0x4ff   : > { %v4300_v21 = vpop.f32.mrf.mxu0  ;;  %v6450_v23 = vmax.f32 %v2561_v29, 0.0  ;;  %v6500_v29 = vadd.f32 %v6384_v16, %v6392_v4  ;;  %v6513_v16 = vadd.f32 %v6388_v40, %v6392_v4  ;;  %7905 = vst [vmem:[#allocation80_spill] sm:$0xff] %v6528_v46  ;;  %v4320_v62 = vpop.f32.mrf.mxu1  ;;  %v7906_v51 = vsub.f32 %v6404_v8, %v6406_v32 }
 0x500   : > { %v2562_v61 = vsub.f32 %v6439_v9, %v2530_v5  ;;  %v2535_v35 = vmul.f32 2.0, %v4300_v21  ;;  %v6548_v36 = vmul.f32 2.0, %v2305_v0  ;;  %vm2630_vm4 = vcmp.eq.f32.partialorder %v6423_v28, inf  ;;  %v6561_v0 = vpop.permute.xlu1 %2470 }
 0x501   : > { %v2238_v43 = vpop.f32.mrf.mxu0  ;;  %4504 = vrsqrt.f32 %v6450_v23  ;;  %v6546_v24 = vmax.f32 %v7906_v51, 0.0  ;;  %v2633_v9 = vand.u32 2147483648, %v6423_v28  ;;  %v6559_v8 = vmax.f32 %v2564_v34, 0.0  ;;  %7908 = vst [vmem:[#allocation82_spill] sm:$0xff] %v6561_v0 }
 0x502   : > { %4506 = vrsqrt.f32 %v6496_v48  ;;  %v2533_v60 = vmul.f32 2.0, %v2238_v43  ;;  %v6565_v5 = vmax.f32 %v2562_v61, 0.0  ;;  %v2567_v51 = vsub.f32 %v6462_v17, %v2535_v35  ;;  %v6568_v18 = vpop.permute.xlu0 %2485 }
 0x503   : > { %v6503_v42 = vpop.f32.mrf.mxu0  ;;  %4508 = vrsqrt.f32 %v6531_v53  ;;  %7909 = vst [vmem:[#allocation83_spill] sm:$0xff] %v6568_v18  ;;  %vm2632_vm6 = vcmp.eq.f32.partialorder %v6423_v28, 0.0  ;;  %v6574_v34 = vadd.f32 %v6528_v46, %v6392_v4  ;;  %v7910_v61 = vsub.f32 %v6434_v59, %v6427_v58 }
 0x504   : > { %v4499_v2 = vpop.eup %4498  ;;  %4510 = vrsqrt.f32 %v6546_v24  ;;  %vm2644_vm7 = vcmp.eq.f32.partialorder %v6496_v48, inf  ;;  %v2536_v17 = vmul.f32 2.0, %v6503_v42  ;;  %vm2651_vm8 = vcmp.eq.f32.partialorder %v6450_v23, inf }
 0x505   : > { %v2622_v63 = vmul.f32 %v4499_v2, %v6412_v10  ;;  %v2626_v2 = vand.u32 2147483648, %v6412_v10  ;;  %v4501_v40 = vpop.eup %4500  ;;  %v2241_v22 = vpop.f32.mrf.mxu0  ;;  %4512 = vrsqrt.f32 %v6559_v8  ;;  %vm2665_vm11 = vcmp.eq.f32.partialorder %v6531_v53, inf }
 0x506   : > { %v2636_v12 = vmul.f32 %v4501_v40, %v6416_v45  ;;  %4514 = vrsqrt.f32 %v6565_v5  ;;  %vm2653_vm10 = vcmp.eq.f32.partialorder %v6450_v23, 0.0  ;;  %vm2658_vm12 = vcmp.eq.f32.partialorder %v6565_v5, inf }
 0x507   : > { %v2624_v1 = vsel %vm2623_vm5, %v6412_v10, %v2622_v63  ;;  %v6550_v63 = vmul.f32 2.0, %v4320_v62  ;;  %v2565_v62 = vsub.f32 %v6454_v3, %v2533_v60  ;;  %v4304_v32 = vpop.f32.mrf.mxu0  ;;  %v6578_v60 = vadd.f32 %v6561_v0, %v6392_v4 }
 0x508   : > { %v2627_v21 = vsel %vm2625_vm15, %v2626_v2, %v2624_v1  ;;  %v6583_v2 = vmax.f32 %v7910_v61, 0.0  ;;  %v2638_v35 = vsel %vm2637_vm13, %v6416_v45, %v2636_v12  ;;  %v6598_v12 = vmax.f32 %v2567_v51, 0.0  ;;  %v6605_v1 = vpop.permute.xlu1 %2480 }
 0x509   : > { %7907 = vst [vmem:[#allocation81_spill] sm:$0xff] %v6550_v63  ;;  %v4503_v43 = vpop.eup %4502  ;;  %v3008_v3 = vmul.f32 0.1, %v2627_v21  ;;  %v2254_v21 = vpop.f32.mrf.mxu0  ;;  %v2641_v58 = vsel %vm2639_vm14, %v2640_v30, %v2638_v35  ;;  %v6602_v61 = vadd.f32 %v6568_v18, %v6392_v4  ;;  %7911 = vst [vmem:[#allocation84_spill] sm:$0xff] %v6605_v1  ;;  %v6613_v51 = vadd.f32 %v6605_v1, %v6392_v4 }
 0x50a   : > { %v2629_v10 = vmul.f32 %v4503_v43, %v6423_v28  ;;  %v6592_v43 = vmax.f32 %v2565_v62, 0.0  ;;  %v2534_v62 = vmul.f32 2.0, %v2241_v22  ;;  %v3010_v46 = vmul.f32 0.1, %v2641_v58  ;;  %v2849_v35 = vpop.permute.xlu0 %2848 }
 0x50b   : > { %v3040_v40 = vmul.f32 1.442695, %v3008_v3  ;;  %v2539_v18 = vmul.f32 2.0, %v4304_v32  ;;  %vm2943_vm9 = vcmp.eq.s32.totalorder %v6442_v11, %v2849_v35  ;;  %v2568_v58 = vsub.f32 %v6466_v31, %v2536_v17 }
 0x50c   : > { %v2631_v30 = vsel %vm2630_vm4, %v6423_v28, %v2629_v10  ;;  %4516 = vrsqrt.f32 %v6592_v43  ;;  %v4305_v10 = vpop.f32.mrf.mxu0  ;;  %v2537_v45 = vmul.f32 2.0, %v2254_v21  ;;  %v2566_v28 = vsub.f32 %v6458_v13, %v2534_v62  ;;  %v6631_v21 = vpop.permute.xlu1 %2490 }
 0x50d   : > { %v2634_v42 = vsel %vm2632_vm6, %v2633_v9, %v2631_v30  ;;  %4518 = vpow2.f32 %v3040_v40  ;;  %v3044_v9 = vmul.f32 1.442695, %v3010_v46  ;;  %v2571_v30 = vsub.f32 %v6478_v14, %v2539_v18  ;;  %7912 = vst [vmem:[#allocation85_spill] sm:$0xff] %v6631_v21 }
 0x50e   : > { %v4505_v59 = vpop.eup %4504  ;;  %v3009_v3 = vmul.f32 0.1, %v2634_v42  ;;  %4520 = vrsqrt.f32 %v6598_v12  ;;  %v2654_v31 = vand.u32 2147483648, %v6450_v23  ;;  %v2257_v42 = vpop.f32.mrf.mxu0  ;;  %v6635_v46 = vmax.f32 %v2568_v58, 0.0 }
 0x50f   : > { %v4507_v0 = vpop.eup %4506  ;;  %v2650_v22 = vmul.f32 %v4505_v59, %v6450_v23  ;;  %v6640_v40 = vsel %vm2943_vm9, %v6307_v50, 0.0  ;;  %v6644_v18 = vadd.f32 %v6631_v21, %v6392_v4  ;;  %v2569_v14 = vsub.f32 %v6470_v33, %v2537_v45 }
 0x510   : > { %v3042_v32 = vmul.f32 1.442695, %v3009_v3  ;;  %v2643_v17 = vmul.f32 %v4507_v0, %v6496_v48  ;;  %v4509_v13 = vpop.eup %4508  ;;  %v6648_v62 = vmax.f32 %v2566_v28, 0.0  ;;  %v2538_v3 = vmul.f32 2.0, %v2257_v42  ;;  %v2852_v42 = vpop.permute.xlu1 %2851 }
 0x511   : > { %v2652_v1 = vsel %vm2651_vm8, %v6450_v23, %v2650_v22  ;;  %v2540_v23 = vmul.f32 2.0, %v4305_v10  ;;  %v6650_v22 = vmax.f32 %v2571_v30, 0.0  ;;  %v6653_v50 = vpop.eup %4510  ;;  %v2664_v58 = vmul.f32 %v4509_v13, %v6531_v53 }
 0x512   : > { %4522 = vpow2.f32 %v3042_v32  ;;  %v2655_v35 = vsel %vm2653_vm10, %v2654_v31, %v2652_v1  ;;  %v2645_v33 = vsel %vm2644_vm7, %v6496_v48, %v2643_v17  ;;  %vm2646_vm3 = vcmp.eq.f32.partialorder %v6496_v48, 0.0  ;;  %v4513_v45 = vpop.eup %4512  ;;  %v4308_v32 = vpop.f32.mrf.mxu0 }
 0x513   : > { %4524 = vpow2.f32 %v3044_v9  ;;  %v3012_v4 = vmul.f32 0.1, %v2655_v35  ;;  %v6662_v10 = vmax.f32 %v2569_v14, 0.0  ;;  %v7913_v28 = vand.u32 2147483648, %v6496_v48  ;;  %v4515_v30 = vpop.eup %4514  ;;  %v2855_v31 = vpop.permute.xlu0 %2854 }
 0x514   : > { %4526 = vrsqrt.f32 %v6583_v2  ;;  %v2572_v17 = vsub.f32 %v6482_v37, %v2540_v23  ;;  %vm2944_vm1 = vcmp.eq.s32.totalorder %v6442_v11, %v2852_v42  ;;  %v2570_v14 = vsub.f32 %v6474_v20, %v2538_v3 }
 0x515   : > { %4528 = vrsqrt.f32 %v6635_v46  ;;  %v2648_v9 = vsel %vm2646_vm3, %v7913_v28, %v2645_v33  ;;  %v3048_v13 = vmul.f32 1.442695, %v3012_v4  ;;  %v2582_v48 = vsub.f32 %v6539_v38, %v6548_v36 }
 0x516   : > { %4530 = vrsqrt.f32 %v6648_v62  ;;  %v3011_v35 = vmul.f32 0.1, %v2648_v9  ;;  %v2543_v28 = vmul.f32 2.0, %v4308_v32  ;;  %vm2679_vm2 = vcmp.eq.f32.partialorder %v6592_v43, inf }
 0x517   : > { %4532 = vrsqrt.f32 %v6650_v22  ;;  %v2666_v20 = vsel %vm2665_vm11, %v6531_v53, %v2664_v58  ;;  %vm2667_vm0 = vcmp.eq.f32.partialorder %v6531_v53, 0.0  ;;  %vm2945_vm5 = vcmp.eq.s32.totalorder %v6442_v11, %v2855_v31  ;;  %v2270_v58 = vpop.f32.mrf.mxu0  ;;  %v2861_v1 = vpop.permute.xlu0 %2860 }
 0x518   : > { %4534 = vpow2.f32 %v3048_v13  ;;  %v3046_v33 = vmul.f32 1.442695, %v3011_v35  ;;  %v6685_v36 = vmax.f32 %v2572_v17, 0.0  ;;  %v2657_v3 = vmul.f32 %v4515_v30, %v6565_v5 }
 0x519   : > { %v4517_v59 = vpop.eup %4516  ;;  %4536 = vrsqrt.f32 %v6662_v10  ;;  %v2976_v9 = vsel %vm2944_vm1, %v6312_v26, 0.0  ;;  %v6692_v32 = vmax.f32 %v2570_v14, 0.0  ;;  %v6695_v35 = vmul.f32 %v4513_v45, %v6559_v8 }
 0x51a   : > { %4538 = vpow2.f32 %v3046_v33  ;;  %v4519_v23 = vpop.eup %4518  ;;  %v7914_v17 = vsub.f32 %v6578_v60, %v6523_v39  ;;  %v2575_v30 = vsub.f32 %v6494_v55, %v2543_v28  ;;  %v7915_v4 = vand.u32 2147483648, %v6531_v53  ;;  %v2858_v55 = vpop.permute.xlu1 %2857 }
 0x51b   : > { %v4521_v13 = vpop.eup %4520  ;;  %v2678_v14 = vmul.f32 %v4517_v59, %v6592_v43  ;;  %v2977_v45 = vsel %vm2945_vm5, %v6317_v6, 0.0  ;;  %vm2947_vm13 = vcmp.eq.s32.totalorder %v6442_v11, %v2861_v1  ;;  %v3104_v39 = vmul.f32 %v4519_v23, %v6640_v40  ;;  %v2318_v53 = vpop.f32.mrf.mxu1 }
 0x51c   : > { %v6700_v33 = vmax.f32 %v7914_v17, 0.0  ;;  %v2669_v26 = vsel %vm2667_vm0, %v7915_v4, %v2666_v20  ;;  %4540 = vrsqrt.f32 %v6685_v36  ;;  %v2541_v28 = vmul.f32 2.0, %v2270_v58  ;;  %v4309_v6 = vpop.f32.mrf.mxu0 }
 0x51d   : > { %4542 = vrsqrt.f32 %v6692_v32  ;;  %v3014_v59 = vmul.f32 0.1, %v2669_v26  ;;  %v2659_v4 = vsel %vm2658_vm12, %v6565_v5, %v2657_v3  ;;  %vm2660_vm15 = vcmp.eq.f32.partialorder %v6565_v5, 0.0  ;;  %v4321_v1 = vpop.f32.mrf.mxu1 }
 0x51e   : > { %vm2672_vm14 = vcmp.eq.f32.partialorder %v6559_v8, inf  ;;  %4544 = vrsqrt.f32 %v6700_v33  ;;  %v2979_v40 = vsel %vm2947_vm13, %v6419_v25, 0.0  ;;  %v6725_v23 = vmax.f32 %v2575_v30, 0.0 }
 0x51f   : > { %v4523_v42 = vpop.eup %4522  ;;  %vm2946_vm4 = vcmp.eq.s32.totalorder %v6442_v11, %v2858_v55  ;;  %v6730_v3 = vmax.f32 %v2582_v48, 0.0  ;;  %v3052_v17 = vmul.f32 1.442695, %v3014_v59  ;;  %v2573_v0 = vsub.f32 %v6486_v7, %v2541_v28  ;;  %v6739_v48 = vpop.permute.xlu1 %2863 }
 0x520   : > { %v3105_v60 = vmul.f32 %v4523_v42, %v2976_v9  ;;  %v4525_v20 = vpop.eup %4524  ;;  %v7916_v9 = vand.u32 2147483648, %v6565_v5  ;;  %v6733_v21 = vmul.f32 2.0, %v2318_v53  ;;  %v2544_v63 = vmul.f32 2.0, %v4309_v6  ;;  %v2273_v5 = vpop.f32.mrf.mxu0 }
 0x521   : > { %v4527_v31 = vpop.eup %4526  ;;  %v3106_v37 = vmul.f32 %v4525_v20, %v2977_v45  ;;  %4546 = vpow2.f32 %v3052_v17  ;;  %vm2693_vm6 = vcmp.eq.f32.partialorder %v6598_v12, inf  ;;  %v2680_v45 = vsel %vm2679_vm2, %v6592_v43, %v2678_v14 }
 0x522   : > { %v2662_v58 = vsel %vm2660_vm15, %v7916_v9, %v2659_v4  ;;  %v4529_v42 = vpop.eup %4528  ;;  %v3136_v38 = vadd.f32 %v3105_v60, %v3104_v39  ;;  %v6735_v4 = vmul.f32 2.0, %v4321_v1  ;;  %4548 = vrsqrt.f32 %v6725_v23  ;;  %v2867_v1 = vpop.permute.xlu0 %2866 }
 0x523   : > { %v3013_v26 = vmul.f32 0.1, %v2662_v58  ;;  %v4531_v25 = vpop.eup %4530  ;;  %v2585_v7 = vsub.f32 %v6574_v34, %v6733_v21  ;;  %vm2681_vm7 = vcmp.eq.f32.partialorder %v6592_v43, 0.0  ;;  %v2692_v60 = vmul.f32 %v4521_v13, %v6598_v12 }
 0x524   : > { %v4533_v9 = vpop.eup %4532  ;;  %v2978_v28 = vsel %vm2946_vm4, %v6322_v47, 0.0  ;;  %v6754_v59 = vmul.f32 %v4527_v31, %v6583_v2  ;;  %v6758_v14 = vmul.f32 %v6653_v50, %v6546_v24  ;;  %v3137_v58 = vadd.f32 %v3136_v38, %v3106_v37 }
 0x525   : > { %v3050_v30 = vmul.f32 1.442695, %v3013_v26  ;;  %v4535_v39 = vpop.eup %4534  ;;  %vm2686_vm9 = vcmp.eq.f32.partialorder %v6648_v62, inf  ;;  %v2576_v47 = vsub.f32 %v6500_v29, %v2544_v63  ;;  %v7917_v55 = vand.u32 2147483648, %v6592_v43  ;;  %v4312_v26 = vpop.f32.mrf.mxu0 }
 0x526   : > { %v4537_v20 = vpop.eup %4536  ;;  %v3108_v6 = vmul.f32 %v4535_v39, %v2979_v40  ;;  %v2717_v50 = vand.u32 2147483648, %v6692_v32  ;;  %v6770_v38 = vmax.f32 %v2573_v0, 0.0  ;;  %v2685_v39 = vmul.f32 %v4531_v25, %v6648_v62  ;;  %v2321_v0 = vpop.f32.mrf.mxu1 }
 0x527   : > { %4550 = vpow2.f32 %v3050_v30  ;;  %v4539_v17 = vpop.eup %4538  ;;  %v2683_v31 = vsel %vm2681_vm7, %v7917_v55, %v2680_v45  ;;  %v6773_v30 = vmul.f32 %v4529_v42, %v6635_v46  ;;  %vm2949_vm8 = vcmp.eq.s32.totalorder %v6442_v11, %v2867_v1 }
 0x528   : > { %4552 = vrsqrt.f32 %v6730_v3  ;;  %v3107_v37 = vmul.f32 %v4539_v17, %v2978_v28  ;;  %v2542_v29 = vmul.f32 2.0, %v2273_v5  ;;  %v6778_v63 = vmul.f32 %v4533_v9, %v6650_v22  ;;  %v6783_v28 = vpop.permute.xlu1 %2869  ;;  %v2286_v9 = vpop.f32.mrf.mxu0 }
 0x529   : > { %v6781_v43 = vmul.f32 %v4537_v20, %v6662_v10  ;;  %v3016_v55 = vmul.f32 0.1, %v2683_v31  ;;  %v4541_v17 = vpop.eup %4540  ;;  %v6787_v25 = vmax.f32 %v2576_v47, 0.0  ;;  %v2673_v5 = vsel %vm2672_vm14, %v6559_v8, %v6695_v35 }
 0x52a   : > { %v3138_v45 = vadd.f32 %v3137_v58, %v3107_v37  ;;  %v4543_v20 = vpop.eup %4542  ;;  %4554 = vrsqrt.f32 %v6770_v38  ;;  %v2738_v58 = vand.u32 2147483648, %v6770_v38  ;;  %v2981_v31 = vsel %vm2949_vm8, %v6332_v57, 0.0 }
 0x52b   : > { %v4545_v40 = vpop.eup %4544  ;;  %vm2948_vm11 = vcmp.eq.s32.totalorder %v6442_v11, %v6739_v48  ;;  %v2574_v47 = vsub.f32 %v6490_v27, %v2542_v29  ;;  %vm2674_vm10 = vcmp.eq.f32.partialorder %v6559_v8, 0.0  ;;  %v2554_v35 = vmul.f32 2.0, %v2321_v0 }
 0x52c   : > { %v3139_v37 = vadd.f32 %v3138_v45, %v3108_v6  ;;  %vm2707_vm12 = vcmp.eq.f32.partialorder %v6662_v10, inf  ;;  %v6804_v53 = vmul.f32 %v4541_v17, %v6685_v36  ;;  %v3056_v42 = vmul.f32 1.442695, %v3016_v55 }
 0x52d   : > { %v7918_v13 = vand.u32 2147483648, %v6559_v8  ;;  %v2545_v57 = vmul.f32 2.0, %v2286_v9  ;;  %4556 = vrsqrt.f32 %v6787_v25  ;;  %v2586_v45 = vsub.f32 %v6613_v51, %v2554_v35  ;;  %v2873_v51 = vpop.permute.xlu0 %2872 }
 0x52e   : > { %v2694_v27 = vsel %vm2693_vm6, %v6598_v12, %v2692_v60  ;;  %v4547_v29 = vpop.eup %4546  ;;  %vm2700_vm3 = vcmp.eq.f32.partialorder %v6635_v46, inf  ;;  %v6815_v0 = vmul.f32 %v4543_v20, %v6692_v32  ;;  %v2980_v8 = vsel %vm2948_vm11, %v6327_v54, 0.0  ;;  %v6827_v60 = vpop.permute.xlu1 %2875 }
 0x52f   : > { %v2676_v1 = vsel %vm2674_vm10, %v7918_v13, %v2673_v5  ;;  %v6824_v13 = vmax.f32 %v2585_v7, 0.0  ;;  %vm2695_vm1 = vcmp.eq.f32.partialorder %v6598_v12, 0.0  ;;  %v4549_v55 = vpop.eup %4548  ;;  %v6829_v17 = vmax.f32 %v2574_v47, 0.0  ;;  %v4313_v20 = vpop.f32.mrf.mxu0 }
 0x530   : > { %v3015_v6 = vmul.f32 0.1, %v2676_v1  ;;  %vm2951_vm2 = vcmp.eq.s32.totalorder %v6442_v11, %v2873_v51  ;;  %v2547_v9 = vmul.f32 2.0, %v4312_v26  ;;  %4558 = vpow2.f32 %v3056_v42 }
 0x531   : > { %v2577_v54 = vsub.f32 %v6507_v52, %v2545_v57  ;;  %v7919_v34 = vand.u32 2147483648, %v6598_v12  ;;  %v2687_v7 = vsel %vm2686_vm9, %v6648_v62, %v2685_v39  ;;  %v3110_v35 = vmul.f32 %v4547_v29, %v2981_v31 }
 0x532   : > { %v3054_v5 = vmul.f32 1.442695, %v3015_v6  ;;  %vm2688_vm0 = vcmp.eq.f32.partialorder %v6648_v62, 0.0  ;;  %v6840_v26 = vmul.f32 %v4545_v40, %v6700_v33  ;;  %v2759_v42 = vand.u32 2147483648, %v6787_v25  ;;  %v2289_v40 = vpop.f32.mrf.mxu0 }
 0x533   : > { %v2697_v21 = vsel %vm2695_vm1, %v7919_v34, %v2694_v27  ;;  %v6847_v52 = vsel %vm2951_vm2, %v6342_v56, 0.0  ;;  %vm2721_vm5 = vcmp.eq.f32.partialorder %v6650_v22, inf  ;;  %v6851_v12 = vmul.f32 %v4549_v55, %v6725_v23 }
 0x534   : > { %v4551_v48 = vpop.eup %4550  ;;  %4560 = vpow2.f32 %v3054_v5  ;;  %v2579_v31 = vsub.f32 %v6517_v41, %v2547_v9  ;;  %v3018_v57 = vmul.f32 0.1, %v2697_v21  ;;  %v2822_v6 = vand.u32 2147483648, %v6824_v13 }
 0x535   : > { %v3109_v1 = vmul.f32 %v4551_v48, %v2980_v8  ;;  %v4553_v47 = vpop.eup %4552  ;;  %4562 = vrsqrt.f32 %v6824_v13  ;;  %v6856_v27 = vmax.f32 %v2577_v54, 0.0  ;;  %v7920_v29 = vand.u32 2147483648, %v6648_v62  ;;  %v6860_v8 = vpop.permute.xlu1 %2881 }
 0x536   : > { %4564 = vrsqrt.f32 %v6829_v17  ;;  %vm2714_vm13 = vcmp.eq.f32.partialorder %v6692_v32, inf  ;;  %v6864_v51 = vmul.f32 %v4553_v47, %v6730_v3  ;;  %vm2950_vm15 = vcmp.eq.s32.totalorder %v6442_v11, %v6783_v28 }
 0x537   : > { %v3140_v39 = vadd.f32 %v3139_v37, %v3109_v1  ;;  %v2690_v56 = vsel %vm2688_vm0, %v7920_v29, %v2687_v7  ;;  %v2879_v37 = vpop.permute.xlu0 %2878  ;;  %v3060_v55 = vmul.f32 1.442695, %v3018_v57  ;;  %v2548_v9 = vmul.f32 2.0, %v4313_v20  ;;  %v4555_v62 = vpop.eup %4554 }
 0x538   : > { %vm2953_vm14 = vcmp.eq.s32.totalorder %v6442_v11, %v2879_v37  ;;  %v3017_v5 = vmul.f32 0.1, %v2690_v56  ;;  %v2546_v48 = vmul.f32 2.0, %v2289_v40  ;;  %v6869_v54 = vmax.f32 %v2579_v31, 0.0 }
 0x539   : > { %v3141_v41 = vadd.f32 %v3140_v39, %v3110_v35  ;;  %v6871_v34 = vmax.f32 %v2586_v45, 0.0  ;;  %v2708_v21 = vsel %vm2707_vm12, %v6662_v10, %v6781_v43  ;;  %vm2709_vm4 = vcmp.eq.f32.partialorder %v6662_v10, 0.0 }
 0x53a   : > { %vm2735_vm6 = vcmp.eq.f32.partialorder %v6770_v38, inf  ;;  %4566 = vrsqrt.f32 %v6856_v27  ;;  %v3058_v7 = vmul.f32 1.442695, %v3017_v5  ;;  %v2578_v20 = vsub.f32 %v6513_v16, %v2546_v48  ;;  %v4557_v43 = vpop.eup %4556 }
 0x53b   : > { %v7921_v35 = vand.u32 2147483648, %v6662_v10  ;;  %4568 = vpow2.f32 %v3060_v55  ;;  %v2701_v47 = vsel %vm2700_vm3, %v6635_v46, %v6773_v30  ;;  %vm2702_vm7 = vcmp.eq.f32.partialorder %v6635_v46, 0.0  ;;  %v6892_v10 = vpop.permute.xlu1 %2887  ;;  %v2885_v48 = vpop.permute.xlu0 %2884 }
 0x53c   : > { %vm2728_vm9 = vcmp.eq.f32.partialorder %v6685_v36, inf  ;;  %v2734_v39 = vmul.f32 %v4555_v62, %v6770_v38  ;;  %v2745_v31 = vand.u32 2147483648, %v6829_v17  ;;  %4570 = vpow2.f32 %v3058_v7 }
 0x53d   : > { %v2711_v1 = vsel %vm2709_vm4, %v7921_v35, %v2708_v21  ;;  %v2580_v16 = vsub.f32 %v6521_v19, %v2548_v9  ;;  %vm2749_vm8 = vcmp.eq.f32.partialorder %v6725_v23, inf  ;;  %v2982_v30 = vsel %vm2950_vm15, %v6337_v49, 0.0  ;;  %v4559_v9 = vpop.eup %4558 }
 0x53e   : > { %v3020_v45 = vmul.f32 0.1, %v2711_v1  ;;  %v6902_v57 = vsel %vm2953_vm14, %v6352_v44, 0.0  ;;  %v6904_v40 = vmax.f32 %v2578_v20, 0.0  ;;  %v7922_v29 = vand.u32 2147483648, %v6635_v46 }
 0x53f   : > { %4572 = vrsqrt.f32 %v6869_v54  ;;  %v2780_v19 = vand.u32 2147483648, %v6869_v54  ;;  %v2829_v55 = vand.u32 2147483648, %v6871_v34  ;;  %v6912_v49 = vmul.f32 %v4557_v43, %v6787_v25 }
 0x540   : > { %v2704_v56 = vsel %vm2702_vm7, %v7922_v29, %v2701_v47  ;;  %v3064_v5 = vmul.f32 1.442695, %v3020_v45  ;;  %4574 = vrsqrt.f32 %v6871_v34  ;;  %v2766_v44 = vand.u32 2147483648, %v6856_v27 }
 0x541   : > { %v3019_v28 = vmul.f32 0.1, %v2704_v56  ;;  %v4561_v37 = vpop.eup %4560  ;;  %vm2742_vm11 = vcmp.eq.f32.partialorder %v6829_v17, inf  ;;  %vm2952_vm10 = vcmp.eq.s32.totalorder %v6442_v11, %v6827_v60  ;;  %v6919_v46 = vmax.f32 %v2580_v16, 0.0 }
 0x542   : > { %v2722_v62 = vsel %vm2721_vm5, %v6650_v22, %v6778_v63  ;;  %vm2723_vm12 = vcmp.eq.f32.partialorder %v6650_v22, 0.0  ;;  %v4563_v21 = vpop.eup %4562  ;;  %v3111_v7 = vmul.f32 %v4561_v37, %v2982_v30  ;;  %4576 = vrsqrt.f32 %v6904_v40  ;;  %v6934_v63 = vpop.permute.xlu1 %2893 }
 0x543   : > { %v3062_v20 = vmul.f32 1.442695, %v3019_v28  ;;  %v7923_v35 = vand.u32 2147483648, %v6650_v22  ;;  %4578 = vpow2.f32 %v3064_v5  ;;  %v2715_v47 = vsel %vm2714_vm13, %v6692_v32, %v6815_v0  ;;  %v4565_v43 = vpop.eup %4564 }
 0x544   : > { %vm2716_vm3 = vcmp.eq.f32.partialorder %v6692_v32, 0.0  ;;  %v3112_v16 = vmul.f32 %v4559_v9, %v6847_v52  ;;  %v3142_v30 = vadd.f32 %v3141_v41, %v3111_v7  ;;  %v6940_v29 = vmul.f32 %v4563_v21, %v6824_v13  ;;  %v2891_v41 = vpop.permute.xlu0 %2890 }
 0x545   : > { %v2725_v1 = vsel %vm2723_vm12, %v7923_v35, %v2722_v62  ;;  %4580 = vpow2.f32 %v3062_v20  ;;  %v2718_v22 = vsel %vm2716_vm3, %v2717_v50, %v2715_v47  ;;  %vm2763_vm1 = vcmp.eq.f32.partialorder %v6856_v27, inf }
 0x546   : > { %v3022_v45 = vmul.f32 0.1, %v2725_v1  ;;  %vm2955_vm2 = vcmp.eq.s32.totalorder %v6442_v11, %v2885_v48  ;;  %v3021_v56 = vmul.f32 0.1, %v2718_v22  ;;  %vm2756_vm0 = vcmp.eq.f32.partialorder %v6787_v25, inf  ;;  %v7924_v48 = vld [vmem:[#allocation65_spill] sm:$0xff] }
 0x547   : > { %v3143_v5 = vadd.f32 %v3142_v30, %v3112_v16  ;;  %4582 = vrsqrt.f32 %v6919_v46  ;;  %v2736_v52 = vsel %vm2735_vm6, %v6770_v38, %v2734_v39  ;;  %vm2737_vm5 = vcmp.eq.f32.partialorder %v6770_v38, 0.0  ;;  %v4567_v37 = vpop.eup %4566  ;;  %v6972_v38 = vpop.permute.xlu1 %2899 }
 0x548   : > { %v3068_v0 = vmul.f32 1.442695, %v3022_v45  ;;  %v2741_v32 = vmul.f32 %v4565_v43, %v6829_v17  ;;  %v2984_v50 = vsel %vm2952_vm10, %v6347_v15, 0.0  ;;  %v3066_v9 = vmul.f32 1.442695, %v3021_v56  ;;  %v4569_v60 = vpop.eup %4568 }
 0x549   : > { %v2739_v28 = vsel %vm2737_vm5, %v2738_v58, %v2736_v52  ;;  %vm2777_vm13 = vcmp.eq.f32.partialorder %v6869_v54, inf  ;;  %v6959_v62 = vsel %vm2955_vm2, %v7924_v48, 0.0  ;;  %v2729_v21 = vsel %vm2728_vm9, %v6685_v36, %v6804_v53  ;;  %v4571_v58 = vpop.eup %4570 }
 0x54a   : > { %4584 = vpow2.f32 %v3068_v0  ;;  %v3024_v39 = vmul.f32 0.1, %v2739_v28  ;;  %vm2954_vm15 = vcmp.eq.s32.totalorder %v6442_v11, %v6860_v8  ;;  %vm2730_vm14 = vcmp.eq.f32.partialorder %v6685_v36, 0.0 }
 0x54b   : > { %4586 = vpow2.f32 %v3066_v9  ;;  %v2750_v15 = vsel %vm2749_vm8, %v6725_v23, %v6851_v12  ;;  %v2787_v7 = vand.u32 2147483648, %v6919_v46  ;;  %v7925_v53 = vand.u32 2147483648, %v6685_v36  ;;  %v7927_v9 = vld [vmem:[#allocation64_spill] sm:$0xff] }
 0x54c   : > { %v3072_v20 = vmul.f32 1.442695, %v3024_v39  ;;  %vm2751_vm4 = vcmp.eq.f32.partialorder %v6725_v23, 0.0  ;;  %v3113_v1 = vmul.f32 %v4571_v58, %v2984_v50  ;;  %v2773_v45 = vand.u32 2147483648, %v6904_v40  ;;  %v4573_v30 = vpop.eup %4572  ;;  %v6990_v50 = vpop.permute.xlu0 %2896 }
 0x54d   : > { %v2732_v35 = vsel %vm2730_vm14, %v7925_v53, %v2729_v21  ;;  %v7926_v43 = vand.u32 2147483648, %v6725_v23  ;;  %v2762_v12 = vmul.f32 %v4567_v37, %v6856_v27  ;;  %vm2957_vm6 = vcmp.eq.s32.totalorder %v6442_v11, %v2891_v41  ;;  %v6986_v0 = vpop.eup %4574  ;;  %v7003_v39 = vpop.permute.xlu1 %2905 }
 0x54e   : > { %v3023_v47 = vmul.f32 0.1, %v2732_v35  ;;  %v2743_v36 = vsel %vm2742_vm11, %v6829_v17, %v2741_v32  ;;  %vm2805_vm7 = vcmp.eq.f32.partialorder %v6583_v2, inf  ;;  %v3114_v56 = vmul.f32 %v4569_v60, %v6902_v57  ;;  %v7928_v60 = vld [vmem:[#allocation67_spill] sm:$0xff] }
 0x54f   : > { %v2753_v16 = vsel %vm2751_vm4, %v7926_v43, %v2750_v15  ;;  %v3144_v52 = vadd.f32 %v3143_v5, %v3113_v1  ;;  %vm2744_vm9 = vcmp.eq.f32.partialorder %v6829_v17, 0.0  ;;  %vm2770_vm8 = vcmp.eq.f32.partialorder %v6904_v40, inf  ;;  %v4577_v5 = vpop.eup %4576 }
 0x550   : > { %v3026_v22 = vmul.f32 0.1, %v2753_v16  ;;  %v3070_v23 = vmul.f32 1.442695, %v3023_v47  ;;  %v2986_v28 = vsel %vm2954_vm15, %v7927_v9, 0.0  ;;  %vm2956_vm11 = vcmp.eq.s32.totalorder %v6442_v11, %v6892_v10  ;;  %v4579_v21 = vpop.eup %4578  ;;  %v2903_v16 = vpop.permute.xlu0 %2902 }
 0x551   : > { %4588 = vpow2.f32 %v3072_v20  ;;  %v2746_v57 = vsel %vm2744_vm9, %v2745_v31, %v2743_v36  ;;  %v2776_v32 = vmul.f32 %v4573_v30, %v6869_v54  ;;  %v3145_v37 = vadd.f32 %v3144_v52, %v3114_v56  ;;  %v7929_v31 = vld [vmem:[#allocation66_spill] sm:$0xff]  ;;  %v7037_v36 = vpop.permute.xlu1 %2911 }
 0x552   : > { %4590 = vpow2.f32 %v3070_v23  ;;  %v3076_v48 = vmul.f32 1.442695, %v3026_v22  ;;  %v2989_v8 = vsel %vm2957_vm6, %v7928_v60, 0.0  ;;  %v3025_v15 = vmul.f32 0.1, %v2746_v57  ;;  %v4581_v17 = vpop.eup %4580  ;;  %v7930_v60 = vld [vmem:[#allocation69_spill] sm:$0xff] }
 0x553   : > { %v2764_v10 = vsel %vm2763_vm1, %v6856_v27, %v2762_v12  ;;  %vm2765_vm10 = vcmp.eq.f32.partialorder %v6856_v27, 0.0  ;;  %v2988_v58 = vsel %vm2956_vm11, %v7929_v31, 0.0  ;;  %v2757_v53 = vsel %vm2756_vm0, %v6787_v25, %v6912_v49 }
 0x554   : > { %v2767_v20 = vsel %vm2765_vm10, %v2766_v44, %v2764_v10  ;;  %vm2758_vm12 = vcmp.eq.f32.partialorder %v6787_v25, 0.0  ;;  %v2769_v41 = vmul.f32 %v4577_v5, %v6904_v40  ;;  %v3115_v35 = vmul.f32 %v4581_v17, %v2986_v28  ;;  %v4583_v43 = vpop.eup %4582  ;;  %v2909_v10 = vpop.permute.xlu0 %2908  ;;  %v7932_v17 = vld [vmem:[#allocation71_spill] sm:$0xff] }
 0x555   : > { %v3074_v1 = vmul.f32 1.442695, %v3025_v15  ;;  %v3028_v47 = vmul.f32 0.1, %v2767_v20  ;;  %vm2791_vm3 = vcmp.eq.f32.partialorder %v6546_v24, inf  ;;  %vm2784_vm1 = vcmp.eq.f32.partialorder %v6919_v46, inf  ;;  %v7071_v20 = vpop.permute.xlu1 %2917 }
 0x556   : > { %4592 = vpow2.f32 %v3076_v48  ;;  %v2760_v27 = vsel %vm2758_vm12, %v2759_v42, %v2757_v53  ;;  %v2778_v49 = vsel %vm2777_vm13, %v6869_v54, %v2776_v32  ;;  %vm2779_vm2 = vcmp.eq.f32.partialorder %v6869_v54, 0.0 }
 0x557   : > { %vm2798_vm0 = vcmp.eq.f32.partialorder %v6730_v3, inf  ;;  %v3116_v44 = vmul.f32 %v4579_v21, %v6959_v62  ;;  %v3146_v30 = vadd.f32 %v3145_v37, %v3115_v35  ;;  %4594 = vpow2.f32 %v3074_v1  ;;  %v4585_v22 = vpop.eup %4584 }
 0x558   : > { %v3080_v12 = vmul.f32 1.442695, %v3028_v47  ;;  %vm2959_vm5 = vcmp.eq.s32.totalorder %v6442_v11, %v6990_v50  ;;  %vm2958_vm15 = vcmp.eq.s32.totalorder %v6442_v11, %v6934_v63  ;;  %v3027_v25 = vmul.f32 0.1, %v2760_v27  ;;  %v4587_v56 = vpop.eup %4586 }
 0x559   : > { %v2781_v42 = vsel %vm2779_vm2, %v2780_v19, %v2778_v49  ;;  %v2783_v52 = vmul.f32 %v4583_v43, %v6919_v46  ;;  %v3147_v62 = vadd.f32 %v3146_v30, %v3116_v44  ;;  %vm2961_vm13 = vcmp.eq.s32.totalorder %v6442_v11, %v2903_v16  ;;  %v7934_v49 = vld [vmem:[#allocation70_spill] sm:$0xff]  ;;  %v7935_v30 = vld [vmem:[#allocation73_spill] sm:$0xff] }
 0x55a   : > { %v3030_v23 = vmul.f32 0.1, %v2781_v42  ;;  %v3117_v9 = vmul.f32 %v4587_v56, %v2988_v58  ;;  %v3078_v28 = vmul.f32 1.442695, %v3027_v25  ;;  %v2771_v57 = vsel %vm2770_vm8, %v6904_v40, %v2769_v41 }
 0x55b   : > { %vm2772_vm14 = vcmp.eq.f32.partialorder %v6904_v40, 0.0  ;;  %vm2812_vm4 = vcmp.eq.f32.partialorder %v6700_v33, inf  ;;  %4596 = vpow2.f32 %v3080_v12  ;;  %v2806_v5 = vsel %vm2805_vm7, %v6583_v2, %v6754_v59  ;;  %v7931_v40 = vld [vmem:[#allocation68_spill] sm:$0xff] }
 0x55c   : > { %v3084_v54 = vmul.f32 1.442695, %v3030_v23  ;;  %v2774_v19 = vsel %vm2772_vm14, %v2773_v45, %v2771_v57  ;;  %v3118_v32 = vmul.f32 %v4585_v22, %v2989_v8  ;;  %v3148_v37 = vadd.f32 %v3147_v62, %v3117_v9  ;;  %v7079_v41 = vpop.f32.mrf.mxu1  ;;  %v7937_v62 = vld [vmem:[#allocation72_spill] sm:$0xff]  ;;  %v2915_v23 = vpop.permute.xlu0 %2914 }
 0x55d   : > { %4598 = vpow2.f32 %v3078_v28  ;;  %v3029_v48 = vmul.f32 0.1, %v2774_v19  ;;  %v7054_v21 = vmul.f32 %v6986_v0, %v6871_v34  ;;  %v2991_v15 = vsel %vm2959_vm5, %v7930_v60, 0.0  ;;  %v2921_v9 = vpop.permute.xlu1 %2920 }
 0x55e   : > { %v2990_v45 = vsel %vm2958_vm15, %v7931_v40, 0.0  ;;  %vm2807_vm6 = vcmp.eq.f32.partialorder %v6583_v2, 0.0  ;;  %v4589_v59 = vpop.eup %4588  ;;  %vm2826_vm7 = vcmp.eq.f32.partialorder %v6871_v34, inf  ;;  %v3149_v8 = vadd.f32 %v3148_v37, %v3118_v32  ;;  %v7103_v42 = vpop.f32.mrf.mxu1 }
 0x55f   : > { %v2993_v0 = vsel %vm2961_vm13, %v7932_v17, 0.0  ;;  %v3082_v31 = vmul.f32 1.442695, %v3029_v48  ;;  %v7933_v50 = vand.u32 2147483648, %v6583_v2  ;;  %v4591_v53 = vpop.eup %4590  ;;  %vm2960_vm9 = vcmp.eq.s32.totalorder %v6442_v11, %v6972_v38 }
 0x560   : > { %4600 = vpow2.f32 %v3084_v54  ;;  %v2785_v63 = vsel %vm2784_vm1, %v6919_v46, %v2783_v52  ;;  %vm2786_vm8 = vcmp.eq.f32.partialorder %v6919_v46, 0.0  ;;  %vm2819_vm11 = vcmp.eq.f32.partialorder %v6824_v13, inf }
 0x561   : > { %v2809_v58 = vsel %vm2807_vm6, %v7933_v50, %v2806_v5  ;;  %v3119_v35 = vmul.f32 %v4591_v53, %v2990_v45  ;;  %vm2963_vm10 = vcmp.eq.s32.totalorder %v6442_v11, %v2909_v10  ;;  %4602 = vpow2.f32 %v3082_v31  ;;  %v2924_v17 = vpop.permute.xlu1 %2923  ;;  %v7940_v50 = vld [vmem:[#allocation75_spill] sm:$0xff] }
 0x562   : > { %v2788_v2 = vsel %vm2786_vm8, %v2787_v7, %v2785_v63  ;;  %vm2962_vm12 = vcmp.eq.s32.totalorder %v6442_v11, %v7003_v39  ;;  %v3034_v1 = vmul.f32 0.1, %v2809_v58  ;;  %v2792_v43 = vsel %vm2791_vm3, %v6546_v24, %v6758_v14 }
 0x563   : > { %v3031_v47 = vmul.f32 0.1, %v2788_v2  ;;  %v3120_v16 = vmul.f32 %v4589_v59, %v2991_v15  ;;  %v3150_v27 = vadd.f32 %v3149_v8, %v3119_v35  ;;  %vm2793_vm1 = vcmp.eq.f32.partialorder %v6546_v24, 0.0  ;;  %v4593_v7 = vpop.eup %4592 }
 0x564   : > { %v2799_v46 = vsel %vm2798_vm0, %v6730_v3, %v6864_v51  ;;  %v2992_v44 = vsel %vm2960_vm9, %v7934_v49, 0.0  ;;  %v2995_v12 = vsel %vm2963_vm10, %v7935_v30, 0.0  ;;  %v7936_v14 = vand.u32 2147483648, %v6546_v24  ;;  %v4595_v56 = vpop.eup %4594  ;;  %v7112_v19 = vpop.f32.mrf.mxu1 }
 0x565   : > { %v3086_v22 = vmul.f32 1.442695, %v3031_v47  ;;  %v3151_v52 = vadd.f32 %v3150_v27, %v3120_v16  ;;  %v2994_v51 = vsel %vm2962_vm12, %v7937_v62, 0.0  ;;  %vm2800_vm3 = vcmp.eq.f32.partialorder %v6730_v3, 0.0  ;;  %v7941_v47 = vld [vmem:[#allocation74_spill] sm:$0xff] }
 0x566   : > { %v2795_v25 = vsel %vm2793_vm1, %v7936_v14, %v2792_v43  ;;  %v3121_v38 = vmul.f32 %v4595_v56, %v2992_v44  ;;  %v3092_v57 = vmul.f32 1.442695, %v3034_v1  ;;  %v7938_v24 = vand.u32 2147483648, %v6730_v3  ;;  %v7129_v8 = vpop.f32.mrf.mxu1 }
 0x567   : > { %v3032_v28 = vmul.f32 0.1, %v2795_v25  ;;  %4604 = vpow2.f32 %v3086_v22  ;;  %v2813_v39 = vsel %vm2812_vm4, %v6700_v33, %v6840_v26  ;;  %vm2814_vm2 = vcmp.eq.f32.partialorder %v6700_v33, 0.0  ;;  %v7944_v22 = vld [vmem:[#allocation77_spill] sm:$0xff] }
 0x568   : > { %v2802_v54 = vsel %vm2800_vm3, %v7938_v24, %v2799_v46  ;;  %v3122_v37 = vmul.f32 %v4593_v7, %v2993_v0  ;;  %v3152_v48 = vadd.f32 %v3151_v52, %v3121_v38  ;;  %vm2965_vm0 = vcmp.eq.s32.totalorder %v6442_v11, %v2915_v23  ;;  %v4597_v3 = vpop.eup %4596 }
 0x569   : > { %v3088_v5 = vmul.f32 1.442695, %v3032_v28  ;;  %v3033_v32 = vmul.f32 0.1, %v2802_v54  ;;  %v7939_v60 = vand.u32 2147483648, %v6700_v33  ;;  %vm2964_vm5 = vcmp.eq.s32.totalorder %v6442_v11, %v7037_v36 }
 0x56a   : > { %v4599_v10 = vpop.eup %4598  ;;  %v3153_v59 = vadd.f32 %v3152_v48, %v3122_v37  ;;  %v2827_v26 = vsel %vm2826_vm7, %v6871_v34, %v7054_v21  ;;  %vm2828_vm15 = vcmp.eq.f32.partialorder %v6871_v34, 0.0  ;;  %v2997_v58 = vsel %vm2965_vm0, %v7940_v50, 0.0  ;;  %v2927_v34 = vpop.permute.xlu0 %2926  ;;  %v7945_v37 = vld [vmem:[#allocation78_spill] sm:$0xff] }
 0x56b   : > { %v2816_v15 = vsel %vm2814_vm2, %v7939_v60, %v2813_v39  ;;  %4606 = vpow2.f32 %v3088_v5  ;;  %v3090_v40 = vmul.f32 1.442695, %v3033_v32  ;;  %v3123_v33 = vmul.f32 %v4599_v10, %v2994_v51 }
 0x56c   : > { %v3035_v45 = vmul.f32 0.1, %v2816_v15  ;;  %4608 = vpow2.f32 %v3092_v57  ;;  %v2830_v31 = vsel %vm2828_vm15, %v2829_v55, %v2827_v26  ;;  %vm2966_vm13 = vcmp.eq.s32.totalorder %v6442_v11, %v7071_v20  ;;  %v7142_v63 = vpop.f32.mrf.mxu1 }
 0x56d   : > { %4610 = vpow2.f32 %v3090_v40  ;;  %v3037_v53 = vmul.f32 0.1, %v2830_v31  ;;  %v2820_v21 = vsel %vm2819_vm11, %v6824_v13, %v6940_v29  ;;  %v4601_v35 = vpop.eup %4600  ;;  %v3124_v2 = vmul.f32 %v4597_v3, %v2995_v12  ;;  %v7943_v12 = vld [vmem:[#allocation76_spill] sm:$0xff] }
 0x56e   : > { %v3094_v0 = vmul.f32 1.442695, %v3035_v45  ;;  %v3154_v1 = vadd.f32 %v3153_v59, %v3123_v33  ;;  %vm2967_vm14 = vcmp.eq.s32.totalorder %v6442_v11, %v2921_v9  ;;  %vm2821_vm4 = vcmp.eq.f32.partialorder %v6824_v13, 0.0  ;;  %v4603_v55 = vpop.eup %4602  ;;  %v7161_v25 = vpop.f32.mrf.mxu1  ;;  %v7946_v45 = vld [vmem:[#allocation79_spill] sm:$0xff] }
 0x56f   : > { %v2996_v43 = vsel %vm2964_vm5, %v7941_v47, 0.0  ;;  %v3098_v16 = vmul.f32 1.442695, %v3037_v53  ;;  %v2823_v29 = vsel %vm2821_vm4, %v2822_v6, %v2820_v21  ;;  %v7942_v49 = vlaneseq  ;;  %v2930_v6 = vpop.permute.xlu1 %2929 }
 0x570   : > { %4612 = vpow2.f32 %v3094_v0  ;;  %v3125_v27 = vmul.f32 %v4603_v55, %v2996_v43  ;;  %v3155_v46 = vadd.f32 %v3154_v1, %v3124_v2  ;;  %v3036_v7 = vmul.f32 0.1, %v2823_v29  ;;  %v2933_v0 = vpop.permute.xlu0 %2932  ;;  %v7947_v1 = vld [vmem:[#allocation82_spill] sm:$0xff] }
 0x571   : > { %v7153_v44 = vshrl.u32 %v7942_v49, 7  ;;  %v3126_v30 = vmul.f32 %v4601_v35, %v2997_v58  ;;  %vm2969_vm6 = vcmp.eq.s32.totalorder %v6442_v11, %v2927_v34  ;;  %v2998_v36 = vsel %vm2966_vm13, %v7943_v12, 0.0 }
 0x572   : > { %v2999_v14 = vsel %vm2967_vm14, %v7944_v22, 0.0  ;;  %v3156_v13 = vadd.f32 %v3155_v46, %v3125_v27  ;;  %v3096_v56 = vmul.f32 1.442695, %v3036_v7  ;;  %4614 = vpow2.f32 %v3098_v16  ;;  %v7948_v22 = vld [vmem:[#allocation80_spill] sm:$0xff] }
 0x573   : > { %v3412_v52 = vadd.s32 8, %v7153_v44  ;;  %vm3427_vm7 = vcmp.eq.s32.totalorder %v7153_v44, %v6442_v11  ;;  %v3414_v51 = vadd.s32 24, %v7153_v44  ;;  %v3413_v20 = vadd.s32 16, %v7153_v44  ;;  %v2936_v26 = vpop.permute.xlu1 %2935 }
 0x574   : > { %v3443_v62 = vsel %vm3427_vm7, %v7103_v42, 0.0  ;;  %v7169_v23 = vpop.f32.mrf.mxu1  ;;  %v4605_v9 = vpop.eup %4604  ;;  %v3157_v28 = vadd.f32 %v3156_v13, %v3126_v30  ;;  %vm2968_vm9 = vcmp.eq.s32.totalorder %v6442_v11, %v2924_v17  ;;  %4616 = vpow2.f32 %v3096_v56 }
 0x575   : > { %vm3428_vm8 = vcmp.eq.s32.totalorder %v3412_v52, %v6442_v11  ;;  %3459 = vadd.xlane.f32.xlu1 %v3443_v62  ;;  %v3127_v38 = vmul.f32 %v4605_v9, %v2998_v36  ;;  %vm3430_vm11 = vcmp.eq.s32.totalorder %v3414_v51, %v6442_v11  ;;  %vm3429_vm10 = vcmp.eq.s32.totalorder %v3413_v20, %v6442_v11  ;;  %v7949_v52 = vld [vmem:[#allocation84_spill] sm:$0xff] }
 0x576   : > { %v3444_v57 = vsel %vm3428_vm8, %v7079_v41, 0.0  ;;  %v3445_v54 = vsel %vm3429_vm10, %v7129_v8, 0.0  ;;  %v3416_v5 = vadd.s32 40, %v7153_v44  ;;  %v3000_v48 = vsel %vm2968_vm9, %v7945_v37, 0.0  ;;  %v7181_v3 = vpop.f32.mrf.mxu1 }
 0x577   : > { %3461 = vadd.xlane.f32.xlu0 %v3444_v57  ;;  %v3491_v24 = vadd.f32 %v3444_v57, %v3443_v62  ;;  %v3158_v39 = vadd.f32 %v3157_v28, %v3127_v38  ;;  %v3446_v60 = vsel %vm3430_vm11, %v7112_v19, 0.0  ;;  %v3415_v15 = vadd.s32 32, %v7153_v44 }
 0x578   : > { %v4607_v32 = vpop.eup %4606  ;;  %v3001_v10 = vsel %vm2969_vm6, %v7946_v45, 0.0  ;;  %vm2970_vm12 = vcmp.eq.s32.totalorder %v6442_v11, %v2930_v6  ;;  %vm3432_vm1 = vcmp.eq.s32.totalorder %v3416_v5, %v6442_v11  ;;  %v3418_v31 = vadd.s32 56, %v7153_v44 }
 0x579   : > { %v4609_v40 = vpop.eup %4608  ;;  %v3128_v59 = vmul.f32 %v4607_v32, %v2999_v14  ;;  %v3492_v33 = vadd.f32 %v3491_v24, %v3445_v54  ;;  %vm3431_vm3 = vcmp.eq.s32.totalorder %v3415_v15, %v6442_v11  ;;  %v3417_v50 = vadd.s32 48, %v7153_v44 }
 0x57a   : > { %v4611_v17 = vpop.eup %4610  ;;  %v3447_v35 = vsel %vm3431_vm3, %v7161_v25, 0.0  ;;  %v3002_v34 = vsel %vm2970_vm12, %v7947_v1, 0.0  ;;  %vm2972_vm2 = vcmp.eq.s32.totalorder %v6442_v11, %v2936_v26  ;;  %v3130_v47 = vmul.f32 %v4609_v40, %v3001_v10 }
 0x57b   : > { %v3159_v53 = vadd.f32 %v3158_v39, %v3128_v59  ;;  %v3129_v21 = vmul.f32 %v4611_v17, %v3000_v48  ;;  %3465 = vadd.xlane.f32.xlu0 %v3446_v60  ;;  %v3493_v2 = vadd.f32 %v3492_v33, %v3446_v60  ;;  %3467 = vadd.xlane.f32.xlu1 %v3447_v35  ;;  %v3448_v29 = vsel %vm3432_vm1, %v7142_v63, 0.0 }
 0x57c   : > { %v7191_v58 = vpop.f32.mrf.mxu1  ;;  %vm3433_vm0 = vcmp.eq.s32.totalorder %v3417_v50, %v6442_v11  ;;  %vm2971_vm5 = vcmp.eq.s32.totalorder %v6442_v11, %v2933_v0  ;;  %vm3434_vm15 = vcmp.eq.s32.totalorder %v3418_v31, %v6442_v11  ;;  %v3419_v7 = vadd.s32 64, %v7153_v44 }
 0x57d   : > { %v4613_v55 = vpop.eup %4612  ;;  %v3160_v43 = vadd.f32 %v3159_v53, %v3129_v21  ;;  %v3494_v16 = vadd.f32 %v3493_v2, %v3447_v35  ;;  %v3449_v27 = vsel %vm3433_vm0, %v7181_v3, 0.0  ;;  %v3420_v36 = vadd.s32 72, %v7153_v44 }
 0x57e   : > { %v7203_v46 = vpop.f32.mrf.mxu1  ;;  %v3131_v49 = vmul.f32 %v4613_v55, %v3002_v34  ;;  %v3003_v14 = vsel %vm2971_vm5, %v7948_v22, 0.0  ;;  %vm3435_vm13 = vcmp.eq.s32.totalorder %v3419_v7, %v6442_v11  ;;  %v3421_v13 = vadd.s32 80, %v7153_v44 }
 0x57f   : > { %v3161_v30 = vadd.f32 %v3160_v43, %v3130_v47  ;;  %3463 = vadd.xlane.f32.xlu0 %v3445_v54  ;;  %v3495_v12 = vadd.f32 %v3494_v16, %v3448_v29  ;;  %3471 = vadd.xlane.f32.xlu1 %v3449_v27  ;;  %v4615_v6 = vpop.eup %4614  ;;  %v3004_v62 = vsel %vm2972_vm2, %v7949_v52, 0.0  ;;  %v3451_v20 = vsel %vm3435_vm13, %v7203_v46, 0.0  ;;  %v2026_v16 = vld [vmem:[%s4959_s19 + $0xf8] sm:$0xff] }
 0x580   : > { %v3450_v38 = vsel %vm3434_vm15, %v7169_v23, 0.0  ;;  %vm3437_vm14 = vcmp.eq.s32.totalorder %v3421_v13, %v6442_v11  ;;  %vm3436_vm4 = vcmp.eq.s32.totalorder %v3420_v36, %v6442_v11  ;;  %v3422_v54 = vadd.s32 88, %v7153_v44 }
 0x581   : > { %v3162_v56 = vadd.f32 %v3161_v30, %v3131_v49  ;;  %v3496_v51 = vadd.f32 %v3495_v12, %v3449_v27  ;;  %v4617_v28 = vpop.eup %4616  ;;  %v3133_v32 = vmul.f32 %v4615_v6, %v3004_v62  ;;  %v3423_v60 = vadd.s32 96, %v7153_v44  ;;  %v7951_v30 = vld [vmem:[#allocation81_spill] sm:$0xff] }
 0x582   : > { %v3132_v57 = vmul.f32 %v4617_v28, %v3003_v14  ;;  %v3452_v15 = vsel %vm3436_vm4, %v7191_v58, 0.0  ;;  %vm3438_vm6 = vcmp.eq.s32.totalorder %v3422_v54, %v6442_v11  ;;  %v3424_v45 = vadd.s32 104, %v7153_v44 }
 0x583   : > { %v7214_v9 = vpop.f32.mrf.mxu1  ;;  %3469 = vadd.xlane.f32.xlu0 %v3448_v29  ;;  %v3497_v24 = vadd.f32 %v3496_v51, %v3450_v38  ;;  %3475 = vadd.xlane.f32.xlu1 %v3451_v20  ;;  %vm3439_vm7 = vcmp.eq.s32.totalorder %v3423_v60, %v6442_v11  ;;  %v3426_v53 = vadd.s32 120, %v7153_v44  ;;  %v3425_v21 = vadd.s32 112, %v7153_v44  ;;  %v2025_v29 = vld [vmem:[%s4959_s19 + $0xf0] sm:$0xff] }
 0x584   : > { %v3163_v39 = vadd.f32 %v3162_v56, %v3132_v57  ;;  %v3454_v33 = vsel %vm3438_vm6, %v7214_v9, 0.0  ;;  %vm3440_vm9 = vcmp.eq.s32.totalorder %v3424_v45, %v6442_v11  ;;  %v4819_v27 = vmov 0.0  }
 0x585   : > { %v7222_v5 = vpop.f32.mrf.mxu1  ;;  %v3498_v37 = vadd.f32 %v3497_v24, %v3451_v20  ;;  %vm3442_vm8 = vcmp.eq.s32.totalorder %v3426_v53, %v6442_v11  ;;  %vm3441_vm11 = vcmp.eq.s32.totalorder %v3425_v21, %v6442_v11  ;;  %1930 = vst [vmem:[%s4962_s17] sm:$0x1] %v4819_v27  ;;  %v7950_v7 = vsub.f32 %v6644_v18, %v6735_v4 }
 0x586   : > { %v3453_v48 = vsel %vm3437_vm14, %v7222_v5, 0.0  ;;  %v7229_v10 = vadd.f32 %v3163_v39, %v3133_v32  ;;  %v7952_v12 = vsub.f32 %v6602_v61, %v7951_v30  ;;  %v3528_v57 = vmul.f32 2.0, %v7103_v42 }
 0x587   : > { %3473 = vadd.xlane.f32.xlu0 %v3450_v38  ;;  %v3499_v40 = vadd.f32 %v3498_v37, %v3452_v15  ;;  %3479 = vadd.xlane.f32.xlu1 %v3453_v48  ;;  %v2620_v49 = vmax.f32 %v7950_v7, 0.0  ;;  %v3529_v37 = vmul.f32 2.0, %v7079_v41  ;;  %v3533_v7 = vmul.f32 2.0, %v7142_v63 }
 0x588   : > { %v2619_v36 = vmax.f32 %v7952_v12, 0.0  ;;  %v3534_v12 = vmul.f32 2.0, %v7181_v3  ;;  %v7298_v3 = vmul.f32 2.0, %v7222_v5 }
 0x589   : > { %v3500_v59 = vadd.f32 %v3499_v40, %v3453_v48  ;;  %4618 = vrsqrt.f32 %v2620_v49  ;;  %vm2840_vm10 = vcmp.eq.f32.partialorder %v2620_v49, inf  ;;  %v2843_v28 = vand.u32 2147483648, %v2620_v49 }
 0x58a   : > { %4620 = vrsqrt.f32 %v2619_v36  ;;  %vm2833_vm12 = vcmp.eq.f32.partialorder %v2619_v36, inf  ;;  %vm2842_vm1 = vcmp.eq.f32.partialorder %v2620_v49, 0.0  ;;  %v2836_v38 = vand.u32 2147483648, %v2619_v36 }
 0x58b   : > { %v7231_v26 = vpop.f32.mrf.mxu1  ;;  %3477 = vadd.xlane.f32.xlu0 %v3452_v15  ;;  %v3501_v0 = vadd.f32 %v3500_v59, %v3454_v33  ;;  %vm2835_vm3 = vcmp.eq.f32.partialorder %v2619_v36, 0.0 }
 0x58c   : > { %v3456_v35 = vsel %vm3440_vm9, %v7231_v26, 0.0 }
 0x58d   : > { %v7236_v17 = vpop.f32.mrf.mxu1 }
 0x58e   : > { %v3455_v31 = vsel %vm3439_vm7, %v7236_v17, 0.0 }
 0x58f   : > { %3483 = vadd.xlane.f32.xlu1 %v3455_v31  ;;  %v3502_v50 = vadd.f32 %v3501_v0, %v3455_v31  ;;  %3481 = vadd.xlane.f32.xlu0 %v3454_v33  ;;  %v3531_v0 = vmul.f32 2.0, %v7112_v19  ;;  %v3530_v19 = vmul.f32 2.0, %v7129_v8  ;;  %v7286_v8 = vmul.f32 2.0, %v7191_v58 }
 0x591   : > { %v3503_v2 = vadd.f32 %v3502_v50, %v3456_v35  ;;  %v3532_v50 = vmul.f32 2.0, %v7161_v25 }
 0x593   : > { %v7242_v1 = vpop.f32.mrf.mxu1  ;;  %3485 = vadd.xlane.f32.xlu0 %v3456_v35 }
 0x594   : > { %v3458_v55 = vsel %vm3442_vm8, %v7242_v1, 0.0 }
 0x595   : > { %v7246_v34 = vpop.f32.mrf.mxu1 }
 0x596   : > { %v3457_v47 = vsel %vm3441_vm11, %v7246_v34, 0.0  ;;  %v4619_v56 = vpop.eup %4618 }
 0x597   : > { %v3504_v44 = vadd.f32 %v3503_v2, %v3457_v47  ;;  %3487 = vadd.xlane.f32.xlu1 %v3457_v47  ;;  %3489 = vadd.xlane.f32.xlu0 %v3458_v55  ;;  %v4621_v52 = vpop.eup %4620  ;;  %v2839_v62 = vmul.f32 %v4619_v56, %v2620_v49  ;;  %v7308_v56 = vmul.f32 2.0, %v7242_v1 }
 0x598   : > { %v2832_v20 = vmul.f32 %v4621_v52, %v2619_v36  ;;  %v7312_v52 = vmul.f32 2.0, %v7246_v34 }
 0x599   : > { %v3505_v43 = vadd.f32 %v3504_v44, %v3458_v55  ;;  %v2841_v4 = vsel %vm2840_vm10, %v2620_v49, %v2839_v62  ;;  %v3535_v49 = vmul.f32 2.0, %v7169_v23 }
 0x59a   : > { %v2844_v32 = vsel %vm2842_vm1, %v2843_v28, %v2841_v4  ;;  %v2834_v39 = vsel %vm2833_vm12, %v2619_v36, %v2832_v20  ;;  %v3536_v36 = vmul.f32 2.0, %v7203_v46  ;;  %v7302_v46 = vmul.f32 2.0, %v7231_v26 }
 0x59b   : > { %v3506_v22 = vrot.slane %v3505_v43, 4  ;;  %v3039_v45 = vmul.f32 0.1, %v2844_v32  ;;  %v2837_v59 = vsel %vm2835_vm3, %v2836_v38, %v2834_v39 }
 0x59c   : > { %v3038_v21 = vmul.f32 0.1, %v2837_v59 }
 0x59d   : > { %v3507_v14 = vadd.f32 %v3506_v22, %v3505_v43  ;;  %v3102_v35 = vmul.f32 1.442695, %v3039_v45 }
 0x59e   : > { %v3100_v27 = vmul.f32 1.442695, %v3038_v21 }
 0x59f   : > { %v3508_v13 = vrot.slane %v3507_v14, 2 }
 0x5a1   : > { %v3509_v6 = vadd.f32 %v3508_v13, %v3507_v14  ;;  %v7291_v14 = vmul.f32 2.0, %v7214_v9  ;;  %v7305_v9 = vmul.f32 2.0, %v7236_v17 }
 0x5a3   : > { %v3510_v51 = vrot.slane %v3509_v6, 1 }
 0x5a5   : > { %v7259_v18 = vadd.f32 %v3510_v51, %v3509_v6 }
 0x5a8   : > { %2941 = vperm.xlu1 %4478, %v2026_v16  }
 0x5ad   : > { %2938 = vperm.xlu0 %4479, %v2025_v29  }
 0x5fe   : > { %v3460_v61 = vpop.xlane.xlu1 %3459 }
 0x5ff   : > { %v3512_v24 = vadd.f32 %v7259_v18, %v3460_v61 }
 0x600   : > { %v3462_v54 = vpop.xlane.xlu0 %3461 }
 0x601   : > { %v3513_v48 = vadd.f32 %v7259_v18, %v3462_v54  ;;  %v3544_v60 = vsub.f32 %v3512_v24, %v3528_v57 }
 0x603   : > { %v3545_v15 = vsub.f32 %v3513_v48, %v3529_v37  ;;  %v7265_v40 = vmax.f32 %v3544_v60, 0.0 }
 0x604   : > { %v3466_v33 = vpop.xlane.xlu0 %3465  ;;  %v3468_v31 = vpop.xlane.xlu1 %3467 }
 0x605   : > { %v7268_v42 = vmax.f32 %v3545_v15, 0.0  ;;  %4622 = vrsqrt.f32 %v7265_v40  ;;  %v3515_v41 = vadd.f32 %v7259_v18, %v3466_v33  ;;  %v3516_v53 = vadd.f32 %v7259_v18, %v3468_v31 }
 0x606   : > { %vm3578_vm2 = vcmp.eq.f32.partialorder %v7265_v40, inf  ;;  %vm3580_vm0 = vcmp.eq.f32.partialorder %v7265_v40, 0.0  ;;  %v3581_v26 = vand.u32 2147483648, %v7265_v40 }
 0x607   : > { %4624 = vrsqrt.f32 %v7268_v42  ;;  %v3547_v2 = vsub.f32 %v3515_v41, %v3531_v0  ;;  %v3548_v47 = vsub.f32 %v3516_v53, %v3532_v50  ;;  %vm3585_vm5 = vcmp.eq.f32.partialorder %v7268_v42, inf }
 0x608   : > { %v3464_v55 = vpop.xlane.xlu0 %3463  ;;  %v3472_v43 = vpop.xlane.xlu1 %3471  ;;  %4626 = vpow2.f32 %v3102_v35  ;;  %vm3587_vm15 = vcmp.eq.f32.partialorder %v7268_v42, 0.0  ;;  %v3588_v28 = vand.u32 2147483648, %v7268_v42 }
 0x609   : > { %v3514_v44 = vadd.f32 %v7259_v18, %v3464_v55  ;;  %v7277_v16 = vmax.f32 %v3547_v2, 0.0  ;;  %v7279_v29 = vmax.f32 %v3548_v47, 0.0  ;;  %v3518_v25 = vadd.f32 %v7259_v18, %v3472_v43 }
 0x60b   : > { %v3546_v30 = vsub.f32 %v3514_v44, %v3530_v19  ;;  %4628 = vrsqrt.f32 %v7277_v16  ;;  %v3550_v58 = vsub.f32 %v3518_v25, %v3534_v12  ;;  %vm3599_vm13 = vcmp.eq.f32.partialorder %v7277_v16, inf }
 0x60c   : > { %v3470_v22 = vpop.xlane.xlu0 %3469  ;;  %4630 = vrsqrt.f32 %v7279_v29  ;;  %v3476_v23 = vpop.xlane.xlu1 %3475  ;;  %vm3601_vm14 = vcmp.eq.f32.partialorder %v7277_v16, 0.0  ;;  %v3602_v24 = vand.u32 2147483648, %v7277_v16  ;;  %vm3606_vm4 = vcmp.eq.f32.partialorder %v7279_v29, inf }
 0x60d   : > { %v7293_v13 = vmax.f32 %v3546_v30, 0.0  ;;  %v3517_v63 = vadd.f32 %v7259_v18, %v3470_v22  ;;  %v3520_v6 = vadd.f32 %v7259_v18, %v3476_v23  ;;  %4632 = vpow2.f32 %v3100_v27 }
 0x60e   : > { %v7314_v51 = vmax.f32 %v3550_v58, 0.0  ;;  %vm3608_vm6 = vcmp.eq.f32.partialorder %v7279_v29, 0.0  ;;  %v3609_v15 = vand.u32 2147483648, %v7279_v29 }
 0x60f   : > { %4634 = vrsqrt.f32 %v7293_v13  ;;  %v3549_v5 = vsub.f32 %v3517_v63, %v3533_v7  ;;  %v3552_v20 = vsub.f32 %v3520_v6, %v3536_v36  ;;  %vm3592_vm7 = vcmp.eq.f32.partialorder %v7293_v13, inf }
 0x610   : > { %v3474_v62 = vpop.xlane.xlu0 %3473  ;;  %4636 = vrsqrt.f32 %v7314_v51  ;;  %v3480_v33 = vpop.xlane.xlu1 %3479  ;;  %vm3594_vm9 = vcmp.eq.f32.partialorder %v7293_v13, 0.0  ;;  %v3595_v31 = vand.u32 2147483648, %v7293_v13  ;;  %vm3620_vm8 = vcmp.eq.f32.partialorder %v7314_v51, inf }
 0x611   : > { %v3519_v17 = vadd.f32 %v7259_v18, %v3474_v62  ;;  %v7322_v34 = vmax.f32 %v3549_v5, 0.0  ;;  %v7327_v38 = vmax.f32 %v3552_v20, 0.0  ;;  %vm3622_vm11 = vcmp.eq.f32.partialorder %v7314_v51, 0.0 }
 0x612   : > { %v4623_v1 = vpop.eup %4622  ;;  %v3522_v44 = vadd.f32 %v7259_v18, %v3480_v33 }
 0x613   : > { %v3577_v4 = vmul.f32 %v4623_v1, %v7265_v40  ;;  %v3551_v61 = vsub.f32 %v3519_v17, %v3535_v49  ;;  %4638 = vrsqrt.f32 %v7322_v34  ;;  %vm3613_vm10 = vcmp.eq.f32.partialorder %v7322_v34, inf }
 0x614   : > { %v4625_v57 = vpop.eup %4624  ;;  %v3478_v54 = vpop.xlane.xlu0 %3477  ;;  %4640 = vrsqrt.f32 %v7327_v38  ;;  %vm3615_vm12 = vcmp.eq.f32.partialorder %v7322_v34, 0.0  ;;  %vm3634_vm3 = vcmp.eq.f32.partialorder %v7327_v38, inf  ;;  %v3554_v62 = vsub.f32 %v3522_v44, %v7298_v3 }
 0x615   : > { %v3584_v32 = vmul.f32 %v4625_v57, %v7268_v42  ;;  %v3579_v39 = vsel %vm3578_vm2, %v7265_v40, %v3577_v4  ;;  %v7338_v37 = vmax.f32 %v3551_v61, 0.0  ;;  %v3521_v48 = vadd.f32 %v7259_v18, %v3478_v54  ;;  %v7351_v0 = vpop.eup %4626 }
 0x616   : > { %v3582_v60 = vsel %vm3580_vm0, %v3581_v26, %v3579_v39  ;;  %vm3636_vm0 = vcmp.eq.f32.partialorder %v7327_v38, 0.0 }
 0x617   : > { %v3586_v45 = vsel %vm3585_vm5, %v7268_v42, %v3584_v32  ;;  %v3688_v59 = vsub.f32 0.0, %v3582_v60  ;;  %4642 = vrsqrt.f32 %v7338_v37  ;;  %v3553_v50 = vsub.f32 %v3521_v48, %v7286_v8 }
 0x618   : > { %v3589_v40 = vsel %vm3587_vm15, %v3588_v28, %v3586_v45  ;;  %v3482_v41 = vpop.xlane.xlu0 %3481  ;;  %v4629_v53 = vpop.eup %4628  ;;  %v3623_v42 = vand.u32 2147483648, %v7314_v51  ;;  %v3616_v8 = vand.u32 2147483648, %v7322_v34  ;;  %vm3627_vm1 = vcmp.eq.f32.partialorder %v7338_v37, inf }
 0x619   : > { %v3689_v21 = vsub.f32 0.0, %v3589_v40  ;;  %v3704_v35 = vmul.f32 0.1, %v3688_v59  ;;  %v3523_v2 = vadd.f32 %v7259_v18, %v3482_v41  ;;  %v4631_v55 = vpop.eup %4630  ;;  %v3598_v47 = vmul.f32 %v4629_v53, %v7277_v16  ;;  %v3484_v28 = vpop.xlane.xlu1 %3483 }
 0x61a   : > { %v7363_v19 = vmax.f32 %v3553_v50, 0.0  ;;  %v7366_v43 = vpop.eup %4632  ;;  %v3605_v7 = vmul.f32 %v4631_v55, %v7279_v29  ;;  %vm3629_vm2 = vcmp.eq.f32.partialorder %v7338_v37, 0.0  ;;  %v3630_v57 = vand.u32 2147483648, %v7338_v37 }
 0x61b   : > { %v3705_v25 = vmul.f32 0.1, %v3689_v21  ;;  %v3720_v27 = vmul.f32 1.442695, %v3704_v35  ;;  %v3555_v49 = vsub.f32 %v3523_v2, %v7291_v14  ;;  %v3600_v12 = vsel %vm3599_vm13, %v7277_v16, %v3598_v47 }
 0x61c   : > { %v4635_v30 = vpop.eup %4634  ;;  %4644 = vrsqrt.f32 %v7363_v19  ;;  %v3603_v22 = vsel %vm3601_vm14, %v3602_v24, %v3600_v12  ;;  %v3607_v14 = vsel %vm3606_vm4, %v7279_v29, %v3605_v7  ;;  %v3637_v29 = vand.u32 2147483648, %v7327_v38 }
 0x61d   : > { %v3722_v36 = vmul.f32 1.442695, %v3705_v25  ;;  %4646 = vpow2.f32 %v3720_v27  ;;  %v3591_v63 = vmul.f32 %v4635_v30, %v7293_v13  ;;  %v3691_v23 = vsub.f32 0.0, %v3603_v22  ;;  %v4637_v6 = vpop.eup %4636 }
 0x61e   : > { %v7385_v58 = vmax.f32 %v3555_v49, 0.0  ;;  %v3610_v5 = vsel %vm3608_vm6, %v3609_v15, %v3607_v14  ;;  %v3619_v1 = vmul.f32 %v4637_v6, %v7314_v51  ;;  %v7407_v60 = vmax.f32 %v3554_v62, 0.0 }
 0x61f   : > { %4648 = vpow2.f32 %v3722_v36  ;;  %v3593_v16 = vsel %vm3592_vm7, %v7293_v13, %v3591_v63  ;;  %v3707_v20 = vmul.f32 0.1, %v3691_v23  ;;  %v3692_v17 = vsub.f32 0.0, %v3610_v5 }
 0x620   : > { %v3596_v26 = vsel %vm3594_vm9, %v3595_v31, %v3593_v16  ;;  %v4639_v4 = vpop.eup %4638  ;;  %4650 = vrsqrt.f32 %v7385_v58  ;;  %v3621_v13 = vsel %vm3620_vm8, %v7314_v51, %v3619_v1  ;;  %v3524_v15 = vadd.f32 %v7259_v18, %v3484_v28  ;;  %v3486_v31 = vpop.xlane.xlu0 %3485 }
 0x621   : > { %v3690_v61 = vsub.f32 0.0, %v3596_v26  ;;  %v3726_v24 = vmul.f32 1.442695, %v3707_v20  ;;  %v3612_v54 = vmul.f32 %v4639_v4, %v7322_v34  ;;  %v3708_v3 = vmul.f32 0.1, %v3692_v17  ;;  %v4641_v32 = vpop.eup %4640  ;;  %v3488_v12 = vpop.xlane.xlu1 %3487 }
 0x622   : > { %v3624_v48 = vsel %vm3622_vm11, %v3623_v42, %v3621_v13  ;;  %v3633_v53 = vmul.f32 %v4641_v32, %v7327_v38  ;;  %vm3641_vm5 = vcmp.eq.f32.partialorder %v7363_v19, inf  ;;  %vm3643_vm15 = vcmp.eq.f32.partialorder %v7363_v19, 0.0 }
 0x623   : > { %v3706_v39 = vmul.f32 0.1, %v3690_v61  ;;  %4652 = vpow2.f32 %v3726_v24  ;;  %v3614_v59 = vsel %vm3613_vm10, %v7322_v34, %v3612_v54  ;;  %v3728_v33 = vmul.f32 1.442695, %v3708_v3 }
 0x624   : > { %v4643_v45 = vpop.eup %4642  ;;  %v3694_v40 = vsub.f32 0.0, %v3624_v48  ;;  %v3617_v41 = vsel %vm3615_vm12, %v3616_v8, %v3614_v59  ;;  %v3635_v34 = vsel %vm3634_vm3, %v7327_v38, %v3633_v53  ;;  %v3490_v25 = vpop.xlane.xlu0 %3489  ;;  %v3644_v49 = vand.u32 2147483648, %v7363_v19  ;;  %v7953_v59 = vld [vmem:[#allocation85_spill] sm:$0xff] }
 0x625   : > { %v3724_v50 = vmul.f32 1.442695, %v3706_v39  ;;  %v3626_v51 = vmul.f32 %v4643_v45, %v7338_v37  ;;  %v3693_v21 = vsub.f32 0.0, %v3617_v41  ;;  %4654 = vpow2.f32 %v3728_v33 }
 0x626   : > { %v3710_v35 = vmul.f32 0.1, %v3694_v40  ;;  %v3638_v44 = vsel %vm3636_vm0, %v3637_v29, %v3635_v34  ;;  %v3525_v22 = vadd.f32 %v7259_v18, %v3486_v31  ;;  %v3556_v23 = vsub.f32 %v3524_v15, %v7305_v9  ;;  %v2942_v29 = vpop.permute.xlu1 %2941  ;;  %v7954_v40 = vld [vmem:[#allocation83_spill] sm:$0xff] }
 0x627   : > { %4656 = vpow2.f32 %v3724_v50  ;;  %v3628_v2 = vsel %vm3627_vm1, %v7338_v37, %v3626_v51  ;;  %v3709_v55 = vmul.f32 0.1, %v3693_v21  ;;  %v3696_v30 = vsub.f32 0.0, %v3638_v44  ;;  %v3176_v51 = vld [vmem:[#allocation6] sm:$0x1] }
 0x628   : > { %v3631_v47 = vsel %vm3629_vm2, %v3630_v57, %v3628_v2  ;;  %v3732_v42 = vmul.f32 1.442695, %v3710_v35  ;;  %4658 = vrsqrt.f32 %v7407_v60  ;;  %v3527_v14 = vadd.f32 %v7259_v18, %v3490_v25  ;;  %v2939_v24 = vpop.permute.xlu0 %2938 }
 0x629   : > { %v4645_v27 = vpop.eup %4644  ;;  %v3695_v7 = vsub.f32 0.0, %v3631_v47  ;;  %v3730_v36 = vmul.f32 1.442695, %v3709_v55  ;;  %v3712_v63 = vmul.f32 0.1, %v3696_v30  ;;  %v3557_v5 = vsub.f32 %v3525_v22, %v7302_v46 }
 0x62a   : > { %v4647_v8 = vpop.eup %4646  ;;  %4660 = vpow2.f32 %v3732_v42  ;;  %v3640_v37 = vmul.f32 %v4645_v27, %v7363_v19  ;;  %v3526_v62 = vadd.f32 %v7259_v18, %v3488_v12  ;;  %v7444_v1 = vmax.f32 %v3556_v23, 0.0 }
 0x62b   : > { %3752 = vst [vmem:[%s4964_s20] sm:$0xff] %v4647_v8  ;;  %v3711_v38 = vmul.f32 0.1, %v3695_v7  ;;  %4662 = vpow2.f32 %v3730_v36  ;;  %v3736_v17 = vmul.f32 1.442695, %v3712_v63  ;;  %v7446_v4 = vmax.f32 %v3557_v5, 0.0 }
 0x62c   : > { %v4649_v6 = vpop.eup %4648  ;;  %v3642_v16 = vsel %vm3641_vm5, %v7363_v19, %v3640_v37  ;;  %v3559_v61 = vsub.f32 %v3527_v14, %v7308_v56  ;;  %v3558_v57 = vsub.f32 %v3526_v62, %v7312_v52  ;;  %vm3655_vm13 = vcmp.eq.f32.partialorder %v7385_v58, inf }
 0x62d   : > { %3753 = vst [vmem:[%s4964_s20 + $0x8] sm:$0xff] %v4649_v6  ;;  %v3734_v20 = vmul.f32 1.442695, %v3711_v38  ;;  %v3645_v26 = vsel %vm3643_vm15, %v3644_v49, %v3642_v16  ;;  %v4651_v9 = vpop.eup %4650  ;;  %v3658_v19 = vand.u32 2147483648, %v7385_v58  ;;  %vm3657_vm14 = vcmp.eq.f32.partialorder %v7385_v58, 0.0 }
 0x62e   : > { %v3697_v28 = vsub.f32 0.0, %v3645_v26  ;;  %v3654_v18 = vmul.f32 %v4651_v9, %v7385_v58  ;;  %v7458_v13 = vmax.f32 %v3559_v61, 0.0  ;;  %v7460_v48 = vmax.f32 %v3558_v57, 0.0 }
 0x62f   : > { %4664 = vpow2.f32 %v3734_v20  ;;  %vm2974_vm4 = vcmp.eq.s32.totalorder %v6442_v11, %v2942_v29  ;;  %vm2973_vm6 = vcmp.eq.s32.totalorder %v6442_v11, %v2939_v24  ;;  %vm3648_vm7 = vcmp.eq.f32.partialorder %v7407_v60, inf  ;;  %v3007_v24 = vld [vmem:[%s4962_s17] sm:$0x1] }
 0x630   : > { %v3713_v46 = vmul.f32 0.1, %v3697_v28  ;;  %4666 = vpow2.f32 %v3736_v17  ;;  %v4653_v54 = vpop.eup %4652  ;;  %v3656_v3 = vsel %vm3655_vm13, %v7385_v58, %v3654_v18  ;;  %v3006_v33 = vsel %vm2974_vm4, %v7953_v59, 0.0 }
 0x631   : > { %4668 = vrsqrt.f32 %v7446_v4  ;;  %3755 = vst [vmem:[%s4964_s20 + $0x18] sm:$0xff] %v4653_v54  ;;  %v3659_v52 = vsel %vm3657_vm14, %v3658_v19, %v3656_v3  ;;  %v3005_v31 = vsel %vm2973_vm6, %v7954_v40, 0.0  ;;  %vm3650_vm9 = vcmp.eq.f32.partialorder %v7407_v60, 0.0 }
 0x632   : > { %v3738_v56 = vmul.f32 1.442695, %v3713_v46  ;;  %4670 = vrsqrt.f32 %v7444_v1  ;;  %v4655_v32 = vpop.eup %4654  ;;  %v3699_v39 = vsub.f32 0.0, %v3659_v52  ;;  %v3134_v53 = vmul.f32 %v7366_v43, %v3005_v31 }
 0x633   : > { %3756 = vst [vmem:[%s4964_s20 + $0x20] sm:$0xff] %v4655_v32  ;;  %v3651_v21 = vand.u32 2147483648, %v7407_v60  ;;  %v3135_v34 = vmul.f32 %v7351_v0, %v3006_v33  ;;  %v3177_v43 = vmax.f32 %v3176_v51, 1.0  ;;  %vm3662_vm8 = vcmp.eq.f32.partialorder %v7444_v1, inf }
 0x634   : > { %v4657_v15 = vpop.eup %4656  ;;  %4672 = vpow2.f32 %v3738_v56  ;;  %v3715_v58 = vmul.f32 0.1, %v3699_v39  ;;  %v3165_v55 = vadd.f32 %v7229_v10, %v3134_v53  ;;  %vm3664_vm11 = vcmp.eq.f32.partialorder %v7444_v1, 0.0 }
 0x635   : > { %3754 = vst [vmem:[%s4964_s20 + $0x10] sm:$0xff] %v4657_v15  ;;  %4674 = vrsqrt.f32 %v7458_v13  ;;  %v4659_v45 = vpop.eup %4658  ;;  %vm3669_vm10 = vcmp.eq.f32.partialorder %v7446_v4, inf  ;;  %vm3671_vm12 = vcmp.eq.f32.partialorder %v7446_v4, 0.0  ;;  %v3672_v8 = vand.u32 2147483648, %v7446_v4 }
 0x636   : > { %4676 = vrsqrt.f32 %v7460_v48  ;;  %v3742_v41 = vmul.f32 1.442695, %v3715_v58  ;;  %v3647_v11 = vmul.f32 %v4659_v45, %v7407_v60  ;;  %v3166_v44 = vadd.f32 %v3165_v55, %v3135_v34 }
 0x637   : > { %v4661_v50 = vpop.eup %4660  ;;  %v3665_v38 = vand.u32 2147483648, %v7444_v1  ;;  %vm3683_vm1 = vcmp.eq.f32.partialorder %v7458_v13, inf  ;;  %vm3685_vm3 = vcmp.eq.f32.partialorder %v7458_v13, 0.0  ;;  %v3686_v9 = vand.u32 2147483648, %v7458_v13 }
 0x638   : > { %3758 = vst [vmem:[%s4964_s20 + $0x30] sm:$0xff] %v4661_v50  ;;  %v4663_v35 = vpop.eup %4662  ;;  %4678 = vpow2.f32 %v3742_v41  ;;  %v3649_v2 = vsel %vm3648_vm7, %v7407_v60, %v3647_v11  ;;  %v3167_v49 = vrot.slane %v3166_v44, 4  ;;  %vm3676_vm2 = vcmp.eq.f32.partialorder %v7460_v48, inf }
 0x639   : > { %3757 = vst [vmem:[%s4964_s20 + $0x28] sm:$0xff] %v4663_v35  ;;  %v3652_v47 = vsel %vm3650_vm9, %v3651_v21, %v3649_v2  ;;  %4680 = vrcp.f32 %v3177_v43  ;;  %v3679_v57 = vand.u32 2147483648, %v7460_v48  ;;  %vm3678_vm0 = vcmp.eq.f32.partialorder %v7460_v48, 0.0 }
 0x63a   : > { %v3698_v42 = vsub.f32 0.0, %v3652_v47  ;;  %v3168_v12 = vadd.f32 %v3167_v49, %v3166_v44 }
 0x63c   : > { %v4665_v25 = vpop.eup %4664  ;;  %v3714_v7 = vmul.f32 0.1, %v3698_v42  ;;  %v3169_v63 = vrot.slane %v3168_v12, 2 }
 0x63d   : > { %v4667_v27 = vpop.eup %4666  ;;  %3759 = vst [vmem:[%s4964_s20 + $0x38] sm:$0xff] %v4665_v25 }
 0x63e   : > { %v4669_v30 = vpop.eup %4668  ;;  %3760 = vst [vmem:[%s4964_s20 + $0x40] sm:$0xff] %v4667_v27  ;;  %v3740_v0 = vmul.f32 1.442695, %v3714_v7  ;;  %v3170_v26 = vadd.f32 %v3169_v63, %v3168_v12 }
 0x63f   : > { %v4671_v60 = vpop.eup %4670  ;;  %v3668_v10 = vmul.f32 %v4669_v30, %v7446_v4 }
 0x640   : > { %v3661_v36 = vmul.f32 %v4671_v60, %v7444_v1  ;;  %4682 = vpow2.f32 %v3740_v0  ;;  %v3171_v18 = vrot.slane %v3170_v26, 1 }
 0x641   : > { %v4673_v37 = vpop.eup %4672  ;;  %v3670_v22 = vsel %vm3669_vm10, %v7446_v4, %v3668_v10 }
 0x642   : > { %v4675_v23 = vpop.eup %4674  ;;  %3761 = vst [vmem:[%s4964_s20 + $0x48] sm:$0xff] %v4673_v37  ;;  %v3673_v14 = vsel %vm3671_vm12, %v3672_v8, %v3670_v22  ;;  %v3663_v6 = vsel %vm3662_vm8, %v7444_v1, %v3661_v36  ;;  %v3172_v52 = vadd.f32 %v3171_v18, %v3170_v26 }
 0x643   : > { %v4677_v16 = vpop.eup %4676  ;;  %v3701_v5 = vsub.f32 0.0, %v3673_v14  ;;  %v3666_v62 = vsel %vm3664_vm11, %v3665_v38, %v3663_v6  ;;  %v3682_v20 = vmul.f32 %v4675_v23, %v7458_v13 }
 0x644   : > { %v3700_v17 = vsub.f32 0.0, %v3666_v62  ;;  %v3675_v28 = vmul.f32 %v4677_v16, %v7460_v48 }
 0x645   : > { %v3717_v4 = vmul.f32 0.1, %v3701_v5  ;;  %v3684_v61 = vsel %vm3683_vm1, %v7458_v13, %v3682_v20  ;;  %v4679_v1 = vpop.eup %4678  ;;  %v3173_v13 = vadd.f32 %v3172_v52, %v3007_v24 }
 0x646   : > { %v3716_v46 = vmul.f32 0.1, %v3700_v17  ;;  %v3687_v19 = vsel %vm3685_vm3, %v3686_v9, %v3684_v61  ;;  %v3677_v29 = vsel %vm3676_vm2, %v7460_v48, %v3675_v28  ;;  %3763 = vst [vmem:[%s4964_s20 + $0x58] sm:$0xff] %v4679_v1  ;;  %v4681_v48 = vpop.eup %4680 }
 0x647   : > { %v3746_v54 = vmul.f32 1.442695, %v3717_v4  ;;  %v3703_v3 = vsub.f32 0.0, %v3687_v19  ;;  %v3680_v56 = vsel %vm3678_vm0, %v3679_v57, %v3677_v29  ;;  %3174 = vst [vmem:[%s4962_s17] sm:$0x1] %v3173_v13 }
 0x648   : > { %v3744_v32 = vmul.f32 1.442695, %v3716_v46  ;;  %v3702_v39 = vsub.f32 0.0, %v3680_v56 }
 0x649   : > { %4684 = vpow2.f32 %v3746_v54  ;;  %v3719_v15 = vmul.f32 0.1, %v3703_v3 }
 0x64a   : > { %4686 = vpow2.f32 %v3744_v32  ;;  %v3718_v58 = vmul.f32 0.1, %v3702_v39 }
 0x64b   : > { %v3750_v45 = vmul.f32 1.442695, %v3719_v15 }
 0x64c   : > { %v3748_v59 = vmul.f32 1.442695, %v3718_v58 }
 0x64d   : > { %4688 = vpow2.f32 %v3750_v45  ;;  %v4683_v33 = vpop.eup %4682 }
 0x64e   : > { %4690 = vpow2.f32 %v3748_v59  ;;  %3762 = vst [vmem:[%s4964_s20 + $0x50] sm:$0xff] %v4683_v33  ;;  %v3175_v40 = vld [vmem:[%s4962_s17] sm:$0x1] }
 0x64f   : > { %v3179_v31 = vmul.f32 %v4681_v48, %v3175_v40 }
 0x651   : > { %3180 = vst [vmem:[%s4962_s17] sm:$0x1] %v3179_v31 }
 0x656   : > { %v4685_v50 = vpop.eup %4684 }
 0x657   : > { %v4687_v41 = vpop.eup %4686  ;;  %3765 = vst [vmem:[%s4964_s20 + $0x68] sm:$0xff] %v4685_v50 }
 0x658   : > { %3764 = vst [vmem:[%s4964_s20 + $0x60] sm:$0xff] %v4687_v41 }
 0x65a   : > { %v4689_v11 = vpop.eup %4688 }
 0x65b   : > { %v4691_v51 = vpop.eup %4690  ;;  %3767 = vst [vmem:[%s4964_s20 + $0x78] sm:$0xff] %v4689_v11 }
 0x65c   : > { %3766 = vst [vmem:[%s4964_s20 + $0x70] sm:$0xff] %v4691_v51 }
 0x65d PF: > { %s4126_s23 = sshll.u32 %s4802_s25, 4  ;;  %s3794_s7 = sshll.u32 %s4962_s17, 4  ;;  %s3795_s7 = int_to_ptr.vmem [resolvable:$true] %s3794_s7 }
 0x65e   : > { %s3792_s27 = scalar_lea.hbm %s7602_s5, %s4126_s23  ;;  %s3774_s8 = scalar_lea.sflag [#allocation8], %s4929_s14 }
 0x65f   : > { %s4692_s10 = scalar_lea.vmem %s3795_s7, 16  ;;  %s4820_s13 = smov [#allocation7]  }
 0x660   : > { %p4693_p4 = scmp.ne.s32.totalorder %s3795_s7, %s4692_s10  ;;  %s4696_s15 = sshll.u32 %s4820_s13, 4  ;;  %s4697_s15 = int_to_ptr.vmem [resolvable:$false] %s4696_s15 }
 0x661   : > { %s4698_s16 = scalar_lea.vmem %s4697_s15, 32  ;;  %p4699_p7 = scmp.lt.s32.totalorder %s3795_s7, %s4697_s15 }
 0x662   : > { %p4694_p5 = pnand %p4693_p4, %p4908_p3  ;;  %p4700_p8 = scmp.lt.s32.totalorder %s4698_s16, %s4692_s10 }
 0x664   : > { %p4695_p6 = pneg %p4694_p5  ;;  %p4701_p10 = por %p4700_p8, %p4699_p7 }
 0x666   : > { %p4702_p11 = pnand %p4701_p10, %p4695_p6 }
 0x668   : > { %4705 = shalt.err (!%p4702_p11)
}
 0x669   : > { %s4706_s18 = scalar_lea.hbm %s3792_s27, 16  ;;  %s4710_s11 = scalar_lea.hbm %s7602_s5, 32 }
 0x66a   : > { %p4707_p12 = scmp.ne.s32.totalorder %s3792_s27, %s4706_s18  ;;  %p4711_p1 = scmp.lt.s32.totalorder %s3792_s27, %s7602_s5 }
 0x66b   : > { %p4712_p2 = scmp.lt.s32.totalorder %s4710_s11, %s4706_s18 }
 0x66c   : > { %p4708_p13 = pnand %p4707_p12, %p4908_p3 }
 0x66d   : > { %p4713_p4 = por %p4712_p2, %p4711_p1 }
 0x66e   : > { %p4709_p0 = pneg %p4708_p13 }
 0x670   : > { %p4714_p5 = pnand %p4713_p4, %p4709_p0 }
 0x672   : > { %4717 = shalt.err (!%p4714_p5)
}
 0x673   : > { %4358 = dma.vmem_to_hbm [thread:$0]  (%p4908_p3), %s3795_s7, 16, %s3792_s27, %s3774_s8  }
 0x674   : > { %s4143_s17 = sshll.u32 %s4802_s25, 11  ;;  %s3807_s21 = sshll.u32 %s4964_s20, 4  ;;  %s7544_s21 = int_to_ptr.vmem [resolvable:$true] %s3807_s21 }
 0x675   : > { %s7542_s24 = scalar_lea.hbm %s7603_s6, %s4143_s17  ;;  %s3778_s26 = scalar_lea.sflag [#allocation10], %s4929_s14 }
 0x676   : > { %s4718_s10 = scalar_lea.vmem %s7544_s21, 2048  ;;  %s4821_s13 = smov [#allocation9]  }
 0x677   : > { %p4719_p6 = scmp.ne.s32.totalorder %s7544_s21, %s4718_s10  ;;  %s4722_s27 = sshll.u32 %s4821_s13, 4  ;;  %s4723_s27 = int_to_ptr.vmem [resolvable:$false] %s4722_s27 }
 0x678   : > { %s4724_s25 = scalar_lea.vmem %s4723_s27, 4096  ;;  %p4725_p10 = scmp.lt.s32.totalorder %s7544_s21, %s4723_s27 }
 0x679   : > { %p4720_p7 = pnand %p4719_p6, %p4908_p3  ;;  %p4726_p11 = scmp.lt.s32.totalorder %s4724_s25, %s4718_s10 }
 0x67b   : > { %p4721_p8 = pneg %p4720_p7  ;;  %p4727_p12 = por %p4726_p11, %p4725_p10 }
 0x67d   : > { %p4728_p13 = pnand %p4727_p12, %p4721_p8 }
 0x67f   : > { %4731 = shalt.err (!%p4728_p13)
}
 0x680   : > { %s4732_s20 = scalar_lea.hbm %s7542_s24, 2048  ;;  %s4736_s15 = scalar_lea.hbm %s7603_s6, 4096 }
 0x681   : > { %p4733_p0 = scmp.ne.s32.totalorder %s7542_s24, %s4732_s20  ;;  %p4737_p4 = scmp.lt.s32.totalorder %s7542_s24, %s7603_s6 }
 0x682   : > { %p4738_p5 = scmp.lt.s32.totalorder %s4736_s15, %s4732_s20 }
 0x683   : > { %p4734_p1 = pnand %p4733_p0, %p4908_p3 }
 0x684   : > { %p4739_p6 = por %p4738_p5, %p4737_p4 }
 0x685   : > { %p4735_p2 = pneg %p4734_p1 }
 0x687   : > { %p4740_p7 = pnand %p4739_p6, %p4735_p2 }
 0x689   : > { %4743 = shalt.err (!%p4740_p7)
}
 0x68a   : > { %s4822_s29 = smov 128   ;;  %s4823_s30 = smov 8  }
 0x68b   : > { %4359 = dma.vmem_to_hbm [thread:$0]  (%p4908_p3), %s7544_s21, 2048, %s7542_s24, %s3778_s26, %s4822_s29, %s4822_s29, %s4823_s30  }
 0x68c PF: > { %s7955_s11 = sld [smem:[#allocation13_spill]]  ;;  %p4369_p8 = scmp.ge.s32.totalorder %s4814_s28, 2 }
 0x68e   : > { %p4363_p10 = pnand %p4369_p8, %p4918_p9 }
 0x690   : > { %p4364_p11 = pneg %p4363_p10 }
 0x692   : > { %s3830_s19 = sand.u32 1, %s7955_s11  }
 0x693   : > { %s3831_s17 = scalar_lea.sflag [#allocation8], %s3830_s19 }
 0x694   : > { %4777 = dma.done.wait (%p4364_p11), %s3831_s17, 16  }
 0x695   : > { %4779 = vsyncadd (%p4364_p11), %s3831_s17, 4294967280  ;;  %s3839_s22 = scalar_lea.sflag [#allocation10], %s3830_s19 }
 0x696   : > { %4781 = dma.done.wait (%p4364_p11), %s3839_s22, 2048  }
 0x697   : > { %4783 = vsyncadd (%p4364_p11), %s3839_s22, 4294965248  ;;  %s23_s28 = sadd.s32 1, %s4814_s28   ;;  %s7957_s21 = sld [smem:[#allocation14_spill]] }
 0x698   : > { %p20_p12 = scmp.ge.s32.totalorder %s23_s28, 44   ;;  %s7958_s22 = sld [smem:[#allocation15_spill]] }
 0x699   : > { %s7959_s23 = sld [smem:[#allocation21_spill]] }
 0x69a   : > { %s7960_s24 = sld [smem:[#allocation16_spill]]  ;;  %22 = sbr.rel (!%p20_p12) target bundleno = 7 (0x7), region = 125 }
 0x69b   : > { %s7961_s25 = sld [smem:[#allocation17_spill]] }
 0x69c   : > { %s7962_s26 = sld [smem:[#allocation18_spill]] }
 0x69d   : > { %s7963_s27 = sld [smem:[#allocation19_spill]] }
 0x69f   :  { %3844 = vsyncpa [#allocation8], 1 }
 0x6a0   :  { %3846 = vsyncpa [#allocation8 + $0x1], 1 }
 0x6a1   :  { %3847 = vsyncpa [#allocation10], 1 }
 0x6a2   :  { %3849 = vsyncpa [#allocation10 + $0x1], 1 }

</bundles_post_ra>
